<compile_context>
chip_gen: v6e
topology: v6e:2x2x1
jax: 0.10.0
libtpu: 0.0.40
codegen_flags: <defaults>
</compile_context>

<pallas_src>
import functools

import jax
import jax.numpy as jnp
from jax import lax
from jax.experimental import pallas as pl
from jax.experimental.pallas import tpu as pltpu

# ---- tiny synthetic config (stands in for the HF config) ----
# All lane (last) dims are multiples of 128 per the performance review.
VOCAB = 256
HIDDEN = 256
N_LAYERS = 2
N_HEADS = 2
HEAD_DIM = HIDDEN // N_HEADS          # 128 -> head slices are vreg-aligned
FFN = 512
EPS = 1e-6


# ----------------------------- fused kernel -----------------------------

def _rmsnorm_f32(x, w):
    """x: (T, D) f32, w: (1, D) f32 -> (T, D) f32."""
    var = jnp.mean(x * x, axis=-1, keepdims=True)
    return x * lax.rsqrt(var + EPS) * w


def _decoder_kernel(mask_ref, x0_ref, ln1_ref, ln2_ref, wqkv_ref, wo_ref,
                    wgu_ref, wd_ref, lnf_ref, lmh_ref, logits_ref, x_sc):
    """grid = (batch, layer). One step == one layer of one batch element."""
    l = pl.program_id(1)
    n_layers = pl.num_programs(1)

    # Load this batch element's embeddings into the resident activation
    # scratch at the start of its layer loop.
    @pl.when(l == 0)
    def _():
        x_sc[...] = x0_ref[...].astype(jnp.float32)

    x = x_sc[...]                                       # (T, D) f32
    D = HIDDEN
    Dh = HEAD_DIM

    # ---------------- attention block ----------------
    h = _rmsnorm_f32(x, ln1_ref[...])
    # fused QKV projection: (T, D) @ (D, 3D) -> (T, 3D), bf16 in / f32 acc.
    # NOTE: 1/sqrt(Dh) is pre-folded into the Q columns of wqkv at init.
    qkv = jnp.dot(h.astype(jnp.bfloat16), wqkv_ref[...],
                  preferred_element_type=jnp.float32)
    qkv_b = qkv.astype(jnp.bfloat16)                    # single cast, sliced below

    bias = mask_ref[...]                                # (T, T) f32 additive mask

    head_outs = []
    for hh in range(N_HEADS):                           # unrolled at trace time
        q_h = qkv_b[:, hh * Dh:(hh + 1) * Dh]           # 128-lane aligned slices
        k_h = qkv_b[:, D + hh * Dh:D + (hh + 1) * Dh]
        v_h = qkv_b[:, 2 * D + hh * Dh:2 * D + (hh + 1) * Dh]
        s = lax.dot_general(q_h, k_h, (((1,), (1,)), ((), ())),
                            preferred_element_type=jnp.float32)    # (T, T) f32
        s = s + bias                                    # hoisted causal mask
        s = s - jnp.max(s, axis=-1, keepdims=True)
        p = jnp.exp(s)                                  # unnormalized probs
        denom = jnp.sum(p, axis=-1, keepdims=True)      # (T, 1), >= 1
        o_h = jnp.dot(p.astype(jnp.bfloat16), v_h,
                      preferred_element_type=jnp.float32)           # (T, Dh)
        # deferred softmax normalization on the (T, Dh) output (EUP recip).
        o_h = o_h * pl.reciprocal(denom, approx=True)
        head_outs.append(o_h)
    attn = jnp.concatenate(head_outs, axis=-1)          # 128-lane aligned concat

    x = x + jnp.dot(attn.astype(jnp.bfloat16), wo_ref[...],
                    preferred_element_type=jnp.float32)

    # ---------------- SwiGLU MLP ----------------
    h2 = _rmsnorm_f32(x, ln2_ref[...])
    gu = jnp.dot(h2.astype(jnp.bfloat16), wgu_ref[...],
                 preferred_element_type=jnp.float32)     # (T, 2F) f32
    g = gu[:, :FFN]
    u = gu[:, FFN:]
    act = (g * jax.nn.sigmoid(g)) * u                    # SwiGLU in f32
    x = x + jnp.dot(act.astype(jnp.bfloat16), wd_ref[...],
                    preferred_element_type=jnp.float32)

    x_sc[...] = x                                        # carry to next layer

    # ------------- final norm + LM head (last layer only) -------------
    @pl.when(l == n_layers - 1)
    def _():
        hf = _rmsnorm_f32(x, lnf_ref[...])
        logits_ref[...] = jnp.dot(hf.astype(jnp.bfloat16), lmh_ref[...],
                                  preferred_element_type=jnp.float32)


# ----------------------------- model glue -----------------------------

def init_params(key):
    def dense(k, shape, scale=0.02):
        return (scale * jax.random.normal(k, shape)).astype(jnp.bfloat16)

    keys = jax.random.split(key, 2 + N_LAYERS)
    embed = dense(keys[0], (VOCAB, HIDDEN))
    lm_head = dense(keys[1], (HIDDEN, VOCAB))

    inv_sqrt_dh = 1.0 / (HEAD_DIM ** 0.5)

    wqkv, wo, wgu, wd, ln1, ln2 = [], [], [], [], [], []
    for li in range(N_LAYERS):
        lk = jax.random.split(keys[2 + li], 7)
        # Bake the attention score scale 1/sqrt(head_dim) into the Q weights
        # (semantically identical, zero runtime cost).
        wq = (dense(lk[0], (HIDDEN, HIDDEN)).astype(jnp.float32)
              * inv_sqrt_dh).astype(jnp.bfloat16)
        wk = dense(lk[1], (HIDDEN, HIDDEN))
        wv = dense(lk[2], (HIDDEN, HIDDEN))
        wqkv.append(jnp.concatenate([wq, wk, wv], axis=1))   # (D, 3D)
        wo.append(dense(lk[3], (HIDDEN, HIDDEN)))
        wg = dense(lk[4], (HIDDEN, FFN))
        wu = dense(lk[5], (HIDDEN, FFN))
        wgu.append(jnp.concatenate([wg, wu], axis=1))        # (D, 2F)
        wd.append(dense(lk[6], (FFN, HIDDEN)))
        ln1.append(jnp.ones((1, HIDDEN), jnp.float32))
        ln2.append(jnp.ones((1, HIDDEN), jnp.float32))

    return {
        "embed": embed,                      # (V, D)    bf16
        "lm_head": lm_head,                  # (D, V)    bf16
        "ln_f": jnp.ones((1, HIDDEN), jnp.float32),
        "ln1": jnp.stack(ln1),               # (L, 1, D)  f32
        "ln2": jnp.stack(ln2),               # (L, 1, D)  f32
        "wqkv": jnp.stack(wqkv),             # (L, D, 3D) bf16
        "wo": jnp.stack(wo),                 # (L, D, D)  bf16
        "wgu": jnp.stack(wgu),               # (L, D, 2F) bf16
        "wd": jnp.stack(wd),                 # (L, F, D)  bf16
    }


def text_decoder_forward(params, input_ids):
    """Causal-LM forward: input_ids (B, T) int32 -> logits (B, T, VOCAB) f32."""
    B, T = input_ids.shape
    # TODO(synk): embedding gather stays in plain JAX.
    x0 = jnp.take(params["embed"], input_ids.reshape(-1), axis=0)
    x0 = x0.reshape(B, T, HIDDEN)                        # (B, T, D) bf16

    # Causal mask built ONCE as an additive f32 bias; DMA'd once into VMEM
    # (constant index_map) and reused by every (batch, layer) grid step.
    qi = lax.broadcasted_iota(jnp.int32, (T, T), 0)
    ki = lax.broadcasted_iota(jnp.int32, (T, T), 1)
    mask_bias = jnp.where(ki <= qi, 0.0, -1e30).astype(jnp.float32)

    logits = pl.pallas_call(
        _decoder_kernel,
        out_shape=jax.ShapeDtypeStruct((B, T, VOCAB), jnp.float32),
        grid=(B, N_LAYERS),
        in_specs=[
            pl.BlockSpec((T, T), lambda b, l: (0, 0)),                        # mask bias
            pl.BlockSpec((None, T, HIDDEN), lambda b, l: (b, 0, 0)),          # x0
            pl.BlockSpec((None, 1, HIDDEN), lambda b, l: (l, 0, 0)),          # ln1
            pl.BlockSpec((None, 1, HIDDEN), lambda b, l: (l, 0, 0)),          # ln2
            pl.BlockSpec((None, HIDDEN, 3 * HIDDEN), lambda b, l: (l, 0, 0)), # wqkv
            pl.BlockSpec((None, HIDDEN, HIDDEN), lambda b, l: (l, 0, 0)),     # wo
            pl.BlockSpec((None, HIDDEN, 2 * FFN), lambda b, l: (l, 0, 0)),    # wgu
            pl.BlockSpec((None, FFN, HIDDEN), lambda b, l: (l, 0, 0)),        # wd
            pl.BlockSpec((1, HIDDEN), lambda b, l: (0, 0)),                   # ln_f
            pl.BlockSpec((HIDDEN, VOCAB), lambda b, l: (0, 0)),               # lm_head
        ],
        out_specs=pl.BlockSpec((None, T, VOCAB), lambda b, l: (b, 0, 0)),
        scratch_shapes=[pltpu.VMEM((T, HIDDEN), jnp.float32)],  # resident activation
        compiler_params=pltpu.CompilerParams(
            # batch axis parallel (2 TCs on v7x), layer axis is a sequential
            # carry (resident activation scratch + resident output block).
            dimension_semantics=("parallel", "arbitrary"),
            # Explicit budget: ~4 MiB actually used (weights x2 buffers +
            # lm_head + blocks + scratch); 32 MiB is safe on v5e/v6e/v7x.
            vmem_limit_bytes=32 * 1024 * 1024),
    )(mask_bias, x0, params["ln1"], params["ln2"], params["wqkv"],
      params["wo"], params["wgu"], params["wd"], params["ln_f"],
      params["lm_head"])

    return logits


if __name__ == "__main__":
    key = jax.random.PRNGKey(0)
    pkey, dkey = jax.random.split(key)
    params = init_params(pkey)
    B, T = 2, 128
    input_ids = jax.random.randint(dkey, (B, T), 0, VOCAB, dtype=jnp.int32)

    logits = jax.jit(functools.partial(text_decoder_forward, params))(input_ids)
    jax.block_until_ready(logits)

    assert logits.shape == (B, T, VOCAB), logits.shape
    assert logits.dtype == jnp.float32
    assert bool(jnp.all(jnp.isfinite(logits)))
    print("KERNEL_OK")
</pallas_src>

<mosaic_0001>
module attributes {stable_mosaic.version = 11 : i64} {
  func.func @_decoder_kernel(%arg0: i32, %arg1: i32, %arg2: memref<128x128xf32, #tpu.memory_space<vmem>>, %arg3: memref<1x128x256xbf16, #tpu.memory_space<vmem>>, %arg4: memref<1x1x256xf32, #tpu.memory_space<vmem>>, %arg5: memref<1x1x256xf32, #tpu.memory_space<vmem>>, %arg6: memref<1x256x768xbf16, #tpu.memory_space<vmem>>, %arg7: memref<1x256x256xbf16, #tpu.memory_space<vmem>>, %arg8: memref<1x256x1024xbf16, #tpu.memory_space<vmem>>, %arg9: memref<1x512x256xbf16, #tpu.memory_space<vmem>>, %arg10: memref<1x256xf32, #tpu.memory_space<vmem>>, %arg11: memref<256x256xbf16, #tpu.memory_space<vmem>>, %arg12: memref<1x128x256xf32, #tpu.memory_space<vmem>>, %arg13: memref<128x256xf32, #tpu.memory_space<vmem>>) attributes {dimension_semantics = [#tpu.dimension_semantics<parallel>, #tpu.dimension_semantics<arbitrary>], iteration_bounds = array<i64: 2, 2>, scalar_prefetch = 0 : i64, scratch_operands = 1 : i64, tpu.core_type = #tpu.core_type<tc>, window_params = [{pipeline_mode = #tpu.pipeline_mode<synchronous>, transform_indices = @transform_0, window_bounds = array<i64: 128, 128>}, {transform_indices = @transform_1, window_bounds = array<i64: 1, 128, 256>}, {transform_indices = @transform_2, window_bounds = array<i64: 1, 1, 256>}, {transform_indices = @transform_3, window_bounds = array<i64: 1, 1, 256>}, {transform_indices = @transform_4, window_bounds = array<i64: 1, 256, 768>}, {transform_indices = @transform_5, window_bounds = array<i64: 1, 256, 256>}, {transform_indices = @transform_6, window_bounds = array<i64: 1, 256, 1024>}, {transform_indices = @transform_7, window_bounds = array<i64: 1, 512, 256>}, {pipeline_mode = #tpu.pipeline_mode<synchronous>, transform_indices = @transform_8, window_bounds = array<i64: 1, 256>}, {pipeline_mode = #tpu.pipeline_mode<synchronous>, transform_indices = @transform_9, window_bounds = array<i64: 256, 256>}, {transform_indices = @transform_10, window_bounds = array<i64: 1, 128, 256>}]} {
    %c0_i32 = arith.constant 0 : i32
    %0 = arith.cmpi eq, %arg1, %c0_i32 : i32
    %1 = arith.extui %0 : i1 to i32
    %c0_i32_0 = arith.constant 0 : i32
    %2 = arith.cmpi ne, %1, %c0_i32_0 : i32
    scf.if %2 {
      %c0_43 = arith.constant 0 : index
      %c0_44 = arith.constant 0 : index
      %c0_45 = arith.constant 0 : index
      %100 = vector.load %arg3[%c0_43, %c0_44, %c0_45] : memref<1x128x256xbf16, #tpu.memory_space<vmem>>, vector<1x128x256xbf16>
      %101 = vector.shape_cast %100 : vector<1x128x256xbf16> to vector<128x256xbf16>
      %102 = arith.extf %101 : vector<128x256xbf16> to vector<128x256xf32>
      %c0_46 = arith.constant 0 : index
      %c0_47 = arith.constant 0 : index
      %103 = vector.load %arg13[%c0_46, %c0_47] : memref<128x256xf32, #tpu.memory_space<vmem>>, vector<128x256xf32>
      tpu.vector_store %arg13[%c0_46, %c0_47], %102 {strides = array<i32>} : memref<128x256xf32, #tpu.memory_space<vmem>>, vector<128x256xf32>,
    } else {
    }
    %c0 = arith.constant 0 : index
    %c0_1 = arith.constant 0 : index
    %3 = vector.load %arg13[%c0, %c0_1] : memref<128x256xf32, #tpu.memory_space<vmem>>, vector<128x256xf32>
    %c0_2 = arith.constant 0 : index
    %c0_3 = arith.constant 0 : index
    %c0_4 = arith.constant 0 : index
    %4 = vector.load %arg4[%c0_2, %c0_3, %c0_4] : memref<1x1x256xf32, #tpu.memory_space<vmem>>, vector<1x1x256xf32>
    %5 = vector.shape_cast %4 : vector<1x1x256xf32> to vector<1x256xf32>
    %6 = arith.mulf %3, %3 : vector<128x256xf32>
    %cst = arith.constant dense<0.000000e+00> : vector<128xf32>
    %7 = vector.multi_reduction <add>, %6, %cst [1] : vector<128x256xf32> to vector<128xf32>
    %8 = vector.shape_cast %7 : vector<128xf32> to vector<128x1xf32>
    %cst_5 = arith.constant 2.560000e+02 : f32
    %9 = vector.broadcast %cst_5 : f32 to vector<128x1xf32>
    %10 = arith.divf %8, %9 : vector<128x1xf32>
    %cst_6 = arith.constant 9.99999997E-7 : f32
    %11 = vector.broadcast %cst_6 : f32 to vector<128x1xf32>
    %12 = arith.addf %10, %11 : vector<128x1xf32>
    %13 = math.rsqrt %12 : vector<128x1xf32>
    %14 = vector.broadcast %13 : vector<128x1xf32> to vector<128x256xf32>
    %15 = arith.mulf %3, %14 : vector<128x256xf32>
    %16 = vector.broadcast %5 : vector<1x256xf32> to vector<128x256xf32>
    %17 = arith.mulf %15, %16 : vector<128x256xf32>
    %18 = arith.truncf %17 : vector<128x256xf32> to vector<128x256xbf16>
    %c0_7 = arith.constant 0 : index
    %c0_8 = arith.constant 0 : index
    %c0_9 = arith.constant 0 : index
    %19 = vector.load %arg6[%c0_7, %c0_8, %c0_9] : memref<1x256x768xbf16, #tpu.memory_space<vmem>>, vector<1x256x768xbf16>
    %20 = vector.shape_cast %19 : vector<1x256x768xbf16> to vector<256x768xbf16>
    %cst_10 = arith.constant dense<0.000000e+00> : vector<128x768xf32>
    %21 = tpu.matmul %18, %20, %cst_10 {dimension_numbers = #tpu.dot_dimension_numbers<[1], [0], [0], [1], [0, 0, 1, 1], [], []>} : vector<128x256xbf16>, vector<256x768xbf16>, vector<128x768xf32> -> vector<128x768xf32>
    %22 = arith.truncf %21 : vector<128x768xf32> to vector<128x768xbf16>
    %c0_11 = arith.constant 0 : index
    %c0_12 = arith.constant 0 : index
    %23 = vector.load %arg2[%c0_11, %c0_12] : memref<128x128xf32, #tpu.memory_space<vmem>>, vector<128x128xf32>
    %24 = vector.extract_strided_slice %22 {offsets = [0, 0], sizes = [128, 128], strides = [1, 1]} : vector<128x768xbf16> to vector<128x128xbf16>
    %25 = vector.extract_strided_slice %22 {offsets = [0, 256], sizes = [128, 128], strides = [1, 1]} : vector<128x768xbf16> to vector<128x128xbf16>
    %26 = vector.extract_strided_slice %22 {offsets = [0, 512], sizes = [128, 128], strides = [1, 1]} : vector<128x768xbf16> to vector<128x128xbf16>
    %cst_13 = arith.constant dense<0.000000e+00> : vector<128x128xf32>
    %27 = tpu.matmul %24, %25, %cst_13 {dimension_numbers = #tpu.dot_dimension_numbers<[1], [1], [0], [0], [0, 0, 1, 0], [], []>} : vector<128x128xbf16>, vector<128x128xbf16>, vector<128x128xf32> -> vector<128x128xf32>
    %28 = arith.addf %27, %23 : vector<128x128xf32>
    %cst_14 = arith.constant dense<0xFF800000> : vector<128xf32>
    %29 = vector.multi_reduction <maximumf>, %28, %cst_14 [1] : vector<128x128xf32> to vector<128xf32>
    %30 = vector.shape_cast %29 : vector<128xf32> to vector<128x1xf32>
    %31 = vector.broadcast %30 : vector<128x1xf32> to vector<128x128xf32>
    %32 = arith.subf %28, %31 : vector<128x128xf32>
    %33 = math.exp %32 : vector<128x128xf32>
    %cst_15 = arith.constant dense<0.000000e+00> : vector<128xf32>
    %34 = vector.multi_reduction <add>, %33, %cst_15 [1] : vector<128x128xf32> to vector<128xf32>
    %35 = vector.shape_cast %34 : vector<128xf32> to vector<128x1xf32>
    %36 = arith.truncf %33 : vector<128x128xf32> to vector<128x128xbf16>
    %cst_16 = arith.constant dense<0.000000e+00> : vector<128x128xf32>
    %37 = tpu.matmul %36, %26, %cst_16 {dimension_numbers = #tpu.dot_dimension_numbers<[1], [0], [0], [1], [0, 0, 1, 1], [], []>} : vector<128x128xbf16>, vector<128x128xbf16>, vector<128x128xf32> -> vector<128x128xf32>
    %38 = tpu.reciprocal %35 {approx = true} : vector<128x1xf32> -> vector<128x1xf32>
    %39 = vector.broadcast %38 : vector<128x1xf32> to vector<128x128xf32>
    %40 = arith.mulf %37, %39 : vector<128x128xf32>
    %41 = vector.extract_strided_slice %22 {offsets = [0, 128], sizes = [128, 128], strides = [1, 1]} : vector<128x768xbf16> to vector<128x128xbf16>
    %42 = vector.extract_strided_slice %22 {offsets = [0, 384], sizes = [128, 128], strides = [1, 1]} : vector<128x768xbf16> to vector<128x128xbf16>
    %43 = vector.extract_strided_slice %22 {offsets = [0, 640], sizes = [128, 128], strides = [1, 1]} : vector<128x768xbf16> to vector<128x128xbf16>
    %cst_17 = arith.constant dense<0.000000e+00> : vector<128x128xf32>
    %44 = tpu.matmul %41, %42, %cst_17 {dimension_numbers = #tpu.dot_dimension_numbers<[1], [1], [0], [0], [0, 0, 1, 0], [], []>} : vector<128x128xbf16>, vector<128x128xbf16>, vector<128x128xf32> -> vector<128x128xf32>
    %45 = arith.addf %44, %23 : vector<128x128xf32>
    %cst_18 = arith.constant dense<0xFF800000> : vector<128xf32>
    %46 = vector.multi_reduction <maximumf>, %45, %cst_18 [1] : vector<128x128xf32> to vector<128xf32>
    %47 = vector.shape_cast %46 : vector<128xf32> to vector<128x1xf32>
    %48 = vector.broadcast %47 : vector<128x1xf32> to vector<128x128xf32>
    %49 = arith.subf %45, %48 : vector<128x128xf32>
    %50 = math.exp %49 : vector<128x128xf32>
    %cst_19 = arith.constant dense<0.000000e+00> : vector<128xf32>
    %51 = vector.multi_reduction <add>, %50, %cst_19 [1] : vector<128x128xf32> to vector<128xf32>
    %52 = vector.shape_cast %51 : vector<128xf32> to vector<128x1xf32>
    %53 = arith.truncf %50 : vector<128x128xf32> to vector<128x128xbf16>
    %cst_20 = arith.constant dense<0.000000e+00> : vector<128x128xf32>
    %54 = tpu.matmul %53, %43, %cst_20 {dimension_numbers = #tpu.dot_dimension_numbers<[1], [0], [0], [1], [0, 0, 1, 1], [], []>} : vector<128x128xbf16>, vector<128x128xbf16>, vector<128x128xf32> -> vector<128x128xf32>
    %55 = tpu.reciprocal %52 {approx = true} : vector<128x1xf32> -> vector<128x1xf32>
    %56 = vector.broadcast %55 : vector<128x1xf32> to vector<128x128xf32>
    %57 = arith.mulf %54, %56 : vector<128x128xf32>
    %58 = tpu.concatenate %40, %57 in 1 : vector<128x128xf32>, vector<128x128xf32> -> vector<128x256xf32>
    %59 = arith.truncf %58 : vector<128x256xf32> to vector<128x256xbf16>
    %c0_21 = arith.constant 0 : index
    %c0_22 = arith.constant 0 : index
    %c0_23 = arith.constant 0 : index
    %60 = vector.load %arg7[%c0_21, %c0_22, %c0_23] : memref<1x256x256xbf16, #tpu.memory_space<vmem>>, vector<1x256x256xbf16>
    %61 = vector.shape_cast %60 : vector<1x256x256xbf16> to vector<256x256xbf16>
    %cst_24 = arith.constant dense<0.000000e+00> : vector<128x256xf32>
    %62 = tpu.matmul %59, %61, %cst_24 {dimension_numbers = #tpu.dot_dimension_numbers<[1], [0], [0], [1], [0, 0, 1, 1], [], []>} : vector<128x256xbf16>, vector<256x256xbf16>, vector<128x256xf32> -> vector<128x256xf32>
    %63 = arith.addf %3, %62 : vector<128x256xf32>
    %c0_25 = arith.constant 0 : index
    %c0_26 = arith.constant 0 : index
    %c0_27 = arith.constant 0 : index
    %64 = vector.load %arg5[%c0_25, %c0_26, %c0_27] : memref<1x1x256xf32, #tpu.memory_space<vmem>>, vector<1x1x256xf32>
    %65 = vector.shape_cast %64 : vector<1x1x256xf32> to vector<1x256xf32>
    %66 = arith.mulf %63, %63 : vector<128x256xf32>
    %cst_28 = arith.constant dense<0.000000e+00> : vector<128xf32>
    %67 = vector.multi_reduction <add>, %66, %cst_28 [1] : vector<128x256xf32> to vector<128xf32>
    %68 = vector.shape_cast %67 : vector<128xf32> to vector<128x1xf32>
    %cst_29 = arith.constant 2.560000e+02 : f32
    %69 = vector.broadcast %cst_29 : f32 to vector<128x1xf32>
    %70 = arith.divf %68, %69 : vector<128x1xf32>
    %cst_30 = arith.constant 9.99999997E-7 : f32
    %71 = vector.broadcast %cst_30 : f32 to vector<128x1xf32>
    %72 = arith.addf %70, %71 : vector<128x1xf32>
    %73 = math.rsqrt %72 : vector<128x1xf32>
    %74 = vector.broadcast %73 : vector<128x1xf32> to vector<128x256xf32>
    %75 = arith.mulf %63, %74 : vector<128x256xf32>
    %76 = vector.broadcast %65 : vector<1x256xf32> to vector<128x256xf32>
    %77 = arith.mulf %75, %76 : vector<128x256xf32>
    %78 = arith.truncf %77 : vector<128x256xf32> to vector<128x256xbf16>
    %c0_31 = arith.constant 0 : index
    %c0_32 = arith.constant 0 : index
    %c0_33 = arith.constant 0 : index
    %79 = vector.load %arg8[%c0_31, %c0_32, %c0_33] : memref<1x256x1024xbf16, #tpu.memory_space<vmem>>, vector<1x256x1024xbf16>
    %80 = vector.shape_cast %79 : vector<1x256x1024xbf16> to vector<256x1024xbf16>
    %cst_34 = arith.constant dense<0.000000e+00> : vector<128x1024xf32>
    %81 = tpu.matmul %78, %80, %cst_34 {dimension_numbers = #tpu.dot_dimension_numbers<[1], [0], [0], [1], [0, 0, 1, 1], [], []>} : vector<128x256xbf16>, vector<256x1024xbf16>, vector<128x1024xf32> -> vector<128x1024xf32>
    %82 = vector.extract_strided_slice %81 {offsets = [0, 0], sizes = [128, 512], strides = [1, 1]} : vector<128x1024xf32> to vector<128x512xf32>
    %83 = vector.extract_strided_slice %81 {offsets = [0, 512], sizes = [128, 512], strides = [1, 1]} : vector<128x1024xf32> to vector<128x512xf32>
    %84 = arith.negf %82 : vector<128x512xf32>
    %85 = math.exp %84 : vector<128x512xf32>
    %cst_35 = arith.constant 1.000000e+00 : f32
    %86 = vector.broadcast %cst_35 : f32 to vector<128x512xf32>
    %87 = arith.addf %86, %85 : vector<128x512xf32>
    %88 = arith.divf %86, %87 : vector<128x512xf32>
    %89 = arith.mulf %82, %88 : vector<128x512xf32>
    %90 = arith.mulf %89, %83 : vector<128x512xf32>
    %91 = arith.truncf %90 : vector<128x512xf32> to vector<128x512xbf16>
    %c0_36 = arith.constant 0 : index
    %c0_37 = arith.constant 0 : index
    %c0_38 = arith.constant 0 : index
    %92 = vector.load %arg9[%c0_36, %c0_37, %c0_38] : memref<1x512x256xbf16, #tpu.memory_space<vmem>>, vector<1x512x256xbf16>
    %93 = vector.shape_cast %92 : vector<1x512x256xbf16> to vector<512x256xbf16>
    %cst_39 = arith.constant dense<0.000000e+00> : vector<128x256xf32>
    %94 = tpu.matmul %91, %93, %cst_39 {dimension_numbers = #tpu.dot_dimension_numbers<[1], [0], [0], [1], [0, 0, 1, 1], [], []>} : vector<128x512xbf16>, vector<512x256xbf16>, vector<128x256xf32> -> vector<128x256xf32>
    %95 = arith.addf %63, %94 : vector<128x256xf32>
    %c0_40 = arith.constant 0 : index
    %c0_41 = arith.constant 0 : index
    %96 = vector.load %arg13[%c0_40, %c0_41] : memref<128x256xf32, #tpu.memory_space<vmem>>, vector<128x256xf32>
    tpu.vector_store %arg13[%c0_40, %c0_41], %95 {strides = array<i32>} : memref<128x256xf32, #tpu.memory_space<vmem>>, vector<128x256xf32>,
    %c1_i32 = arith.constant 1 : i32
    %97 = arith.cmpi eq, %arg1, %c1_i32 : i32
    %98 = arith.extui %97 : i1 to i32
    %c0_i32_42 = arith.constant 0 : i32
    %99 = arith.cmpi ne, %98, %c0_i32_42 : i32
    scf.if %99 {
      %c0_43 = arith.constant 0 : index
      %c0_44 = arith.constant 0 : index
      %100 = vector.load %arg10[%c0_43, %c0_44] : memref<1x256xf32, #tpu.memory_space<vmem>>, vector<1x256xf32>
      %101 = arith.mulf %95, %95 : vector<128x256xf32>
      %cst_45 = arith.constant dense<0.000000e+00> : vector<128xf32>
      %102 = vector.multi_reduction <add>, %101, %cst_45 [1] : vector<128x256xf32> to vector<128xf32>
      %103 = vector.shape_cast %102 : vector<128xf32> to vector<128x1xf32>
      %cst_46 = arith.constant 2.560000e+02 : f32
      %104 = vector.broadcast %cst_46 : f32 to vector<128x1xf32>
      %105 = arith.divf %103, %104 : vector<128x1xf32>
      %cst_47 = arith.constant 9.99999997E-7 : f32
      %106 = vector.broadcast %cst_47 : f32 to vector<128x1xf32>
      %107 = arith.addf %105, %106 : vector<128x1xf32>
      %108 = math.rsqrt %107 : vector<128x1xf32>
      %109 = vector.broadcast %108 : vector<128x1xf32> to vector<128x256xf32>
      %110 = arith.mulf %95, %109 : vector<128x256xf32>
      %111 = vector.broadcast %100 : vector<1x256xf32> to vector<128x256xf32>
      %112 = arith.mulf %110, %111 : vector<128x256xf32>
      %113 = arith.truncf %112 : vector<128x256xf32> to vector<128x256xbf16>
      %c0_48 = arith.constant 0 : index
      %c0_49 = arith.constant 0 : index
      %114 = vector.load %arg11[%c0_48, %c0_49] : memref<256x256xbf16, #tpu.memory_space<vmem>>, vector<256x256xbf16>
      %cst_50 = arith.constant dense<0.000000e+00> : vector<128x256xf32>
      %115 = tpu.matmul %113, %114, %cst_50 {dimension_numbers = #tpu.dot_dimension_numbers<[1], [0], [0], [1], [0, 0, 1, 1], [], []>} : vector<128x256xbf16>, vector<256x256xbf16>, vector<128x256xf32> -> vector<128x256xf32>
      %c0_51 = arith.constant 0 : index
      %c0_52 = arith.constant 0 : index
      %c0_53 = arith.constant 0 : index
      %116 = vector.load %arg12[%c0_51, %c0_52, %c0_53] : memref<1x128x256xf32, #tpu.memory_space<vmem>>, vector<1x128x256xf32>
      %117 = vector.shape_cast %116 : vector<1x128x256xf32> to vector<128x256xf32>
      %118 = vector.shape_cast %115 : vector<128x256xf32> to vector<1x128x256xf32>
      tpu.vector_store %arg12[%c0_51, %c0_52, %c0_53], %118 {strides = array<i32>} : memref<1x128x256xf32, #tpu.memory_space<vmem>>, vector<1x128x256xf32>,
    } else {
    }
    return
  }
  func.func @transform_0(%arg0: i32, %arg1: i32) -> (i32, i32) {
    %c0_i32 = arith.constant 0 : i32
    %c0_i32_0 = arith.constant 0 : i32
    %c0_i32_1 = arith.constant 0 : i32
    return %c0_i32, %c0_i32_0 : i32, i32
  }
  func.func @transform_1(%arg0: i32, %arg1: i32) -> (i32, i32, i32) {
    %c0_i32 = arith.constant 0 : i32
    %c0_i32_0 = arith.constant 0 : i32
    %c0_i32_1 = arith.constant 0 : i32
    return %arg0, %c0_i32, %c0_i32_0 : i32, i32, i32
  }
  func.func @transform_2(%arg0: i32, %arg1: i32) -> (i32, i32, i32) {
    %c0_i32 = arith.constant 0 : i32
    %c0_i32_0 = arith.constant 0 : i32
    %c0_i32_1 = arith.constant 0 : i32
    return %arg1, %c0_i32, %c0_i32_0 : i32, i32, i32
  }
  func.func @transform_3(%arg0: i32, %arg1: i32) -> (i32, i32, i32) {
    %c0_i32 = arith.constant 0 : i32
    %c0_i32_0 = arith.constant 0 : i32
    %c0_i32_1 = arith.constant 0 : i32
    return %arg1, %c0_i32, %c0_i32_0 : i32, i32, i32
  }
  func.func @transform_4(%arg0: i32, %arg1: i32) -> (i32, i32, i32) {
    %c0_i32 = arith.constant 0 : i32
    %c0_i32_0 = arith.constant 0 : i32
    %c0_i32_1 = arith.constant 0 : i32
    return %arg1, %c0_i32, %c0_i32_0 : i32, i32, i32
  }
  func.func @transform_5(%arg0: i32, %arg1: i32) -> (i32, i32, i32) {
    %c0_i32 = arith.constant 0 : i32
    %c0_i32_0 = arith.constant 0 : i32
    %c0_i32_1 = arith.constant 0 : i32
    return %arg1, %c0_i32, %c0_i32_0 : i32, i32, i32
  }
  func.func @transform_6(%arg0: i32, %arg1: i32) -> (i32, i32, i32) {
    %c0_i32 = arith.constant 0 : i32
    %c0_i32_0 = arith.constant 0 : i32
    %c0_i32_1 = arith.constant 0 : i32
    return %arg1, %c0_i32, %c0_i32_0 : i32, i32, i32
  }
  func.func @transform_7(%arg0: i32, %arg1: i32) -> (i32, i32, i32) {
    %c0_i32 = arith.constant 0 : i32
    %c0_i32_0 = arith.constant 0 : i32
    %c0_i32_1 = arith.constant 0 : i32
    return %arg1, %c0_i32, %c0_i32_0 : i32, i32, i32
  }
  func.func @transform_8(%arg0: i32, %arg1: i32) -> (i32, i32) {
    %c0_i32 = arith.constant 0 : i32
    %c0_i32_0 = arith.constant 0 : i32
    %c0_i32_1 = arith.constant 0 : i32
    return %c0_i32, %c0_i32_0 : i32, i32
  }
  func.func @transform_9(%arg0: i32, %arg1: i32) -> (i32, i32) {
    %c0_i32 = arith.constant 0 : i32
    %c0_i32_0 = arith.constant 0 : i32
    %c0_i32_1 = arith.constant 0 : i32
    return %c0_i32, %c0_i32_0 : i32, i32
  }
  func.func @transform_10(%arg0: i32, %arg1: i32) -> (i32, i32, i32) {
    %c0_i32 = arith.constant 0 : i32
    %c0_i32_0 = arith.constant 0 : i32
    %c0_i32_1 = arith.constant 0 : i32
    return %arg0, %c0_i32, %c0_i32_0 : i32, i32, i32
  }
}

</mosaic_0001>

<bundles_post_ra>
// kernel: text_decoder_forward.1
= control target key start
LH: loop header
LB: loop body
LE: loop exit
PB: predicated region body
PF: predicated region fallthrough
CT: control target
= control target key end

     0   :  { %s10759_s0 = inlined_call_operand.vmem [shape: f32[128,128], index: 0, kind: input, shape index: {}]   ;;  %s10760_s1 = inlined_call_operand.vmem [shape: bf16[2,128,256], index: 1, kind: input, shape index: {}]   ;;  %s10761_s2 = inlined_call_operand.vmem [shape: f32[2,1,256], index: 2, kind: input, shape index: {}, may-alias: {2,3}]   ;;  %s10762_s3 = inlined_call_operand.vmem [shape: f32[2,1,256], index: 3, kind: input, shape index: {}, may-alias: {2,3}]   ;;  %s10763_s4 = inlined_call_operand.hbm [shape: bf16[2,256,768], index: 4, kind: input, shape index: {}]   ;;  %s10764_s5 = inlined_call_operand.vmem [shape: bf16[2,256,256], index: 5, kind: input, shape index: {}]   ;;  %s10765_s6 = inlined_call_operand.vmem [shape: bf16[2,256,1024], index: 6, kind: input, shape index: {}]   ;;  %s10766_s7 = inlined_call_operand.hbm [shape: bf16[2,512,256], index: 7, kind: input, shape index: {}]   ;;  %s10767_s8 = inlined_call_operand.vmem [shape: f32[1,256], index: 8, kind: input, shape index: {}]   ;;  %s10768_s9 = inlined_call_operand.vmem [shape: bf16[256,256], index: 9, kind: input, shape index: {}]   ;;  %s10769_s10 = inlined_call_operand.hbm [shape: f32[2,128,256], index: 10, kind: output, shape index: {}]  }
   0x1   :  { %10865 = sst [smem:[#allocation104_spill]] %s10763_s4 }
   0x2   :  { %10866 = sst [smem:[#allocation105_spill]] %s10766_s7 }
   0x3   :  { %10867 = sst [smem:[#allocation106_spill]] %s10767_s8 }
   0x4   :  { %10868 = sst [smem:[#allocation107_spill]] %s10768_s9 }
   0x5   :  { %10869 = sst [smem:[#allocation108_spill]] %s10769_s10 }
   0x6   :  { %15 = vsyncpa [#allocation4], 0 }
   0x7   :  { %17 = vsyncpa [#allocation4 + $0x1], 0 }
   0x8   :  { %18 = vsyncpa [#allocation7], 0 }
   0x9   :  { %20 = vsyncpa [#allocation7 + $0x1], 0 }
   0xa   :  { %21 = vsyncpa [#allocation5], 0 }
   0xb   :  { %23 = vsyncpa [#allocation5 + $0x1], 0  ;;  %s8237_s13 = smov 0   ;;  %s8239_s14 = smov 0  }
   0xc   :  { %s8241_s15 = smov 0   ;;  %s8243_s16 = smov 0  }
   0xd   :  { %s8245_s17 = smov 0   ;;  %s8247_s18 = smov 0  }
   0xe   :  { %s8249_s19 = smov 0   ;;  %s8251_s20 = smov 0  }
   0xf   :  { %s8253_s21 = smov 0   ;;  %s8255_s22 = smov 0  }
  0x10   :  { %s8257_s23 = smov 0  }
  0x11 LB: > { %10870 = sst [smem:[#allocation12_spill]] %s8131_s13  ;;  %s6286_s24 = sadd.s32 4294967295, %s8171_s23   ;;  %s8171_s23 = sphi %s8257_s23, %s29_s23   ;;  %s8167_s22 = sphi %s8255_s22, %s11079_s22   ;;  %s8163_s21 = sphi %s8253_s21, %s11078_s21   ;;  %s8159_s20 = sphi %s8251_s20, %s11077_s20   ;;  %s8155_s19 = sphi %s8249_s19, %s11076_s19   ;;  %s8151_s18 = sphi %s8247_s18, %s11075_s18   ;;  %s8147_s17 = sphi %s8245_s17, %s11083_s17   ;;  %s8143_s16 = sphi %s8243_s16, %s11082_s16   ;;  %s8139_s15 = sphi %s8241_s15, %s11073_s15   ;;  %s8135_s14 = sphi %s8239_s14, %s11081_s14   ;;  %s8131_s13 = sphi %s8237_s13, %s11080_s13  }
  0x12   : > { %10871 = sst [smem:[#allocation13_spill]] %s8139_s15  ;;  %s6287_s25 = sadd.s32 4294967294, %s8171_s23  }
  0x13   : > { %10872 = sst [smem:[#allocation14_spill]] %s8151_s18  ;;  %s38_s26 = sadd.s32 1, %s8163_s21 }
  0x14   : > { %10873 = sst [smem:[#allocation15_spill]] %s8163_s21  ;;  %s41_s27 = sadd.s32 1, %s8167_s22 }
  0x15   : > { %10874 = sst [smem:[#allocation16_spill]] %s8167_s22  ;;  %p39_p0 = scmp.ge.s32.totalorder %s38_s26, 2 }
  0x16   : > { %s147_s28 = sadd.s32 1, %s8151_s18  ;;  %p154_p1 = scmp.ne.s32.totalorder %s8151_s18, %s8147_s17 }
  0x17   : > { %p155_p2 = scmp.eq.s32.totalorder %s8171_s23, 0  ;;  %s11085_s26 = smov (%p39_p0, %s38_s26), 0 }
  0x18   : > { %10875 = sst [smem:[#allocation17_spill]] %s11085_s26  ;;  %s11087_s27 = smov (!%p39_p0, %s41_s27), %s8167_s22 }
  0x19   : > { %s144_s29 = ssub.s32 %s8163_s21, %s11085_s26  ;;  %p8303_p3 = por %p155_p2, %p154_p1 }
  0x1a   : > { %p43_p4 = scmp.ge.s32.totalorder %s11087_s27, 2  ;;  %p145_p5 = scmp.eq.s32.totalorder %s144_s29, 0 }
  0x1b   : > { %p160_p6 = scmp.ne.s32.totalorder %s8147_s17, %s8143_s16  ;;  %p161_p7 = scmp.eq.s32.totalorder %s6286_s24, 0 }
  0x1c   : > { %s11089_s27 = smov (%p43_p4, %s11087_s27), 0  ;;  %s293_s10 = sadd.s32 1, %s8139_s15 }
  0x1d   : > { %10877 = sst [smem:[#allocation18_spill]] %s11089_s27  ;;  %p8313_p8 = por %p161_p7, %p160_p6 }
  0x1e   : > { %s8311_s11 = scalar_select %p145_p5, %s8151_s18, %s147_s28  }
  0x1f   : > { %s290_s26 = ssub.s32 %s8167_s22, %s11089_s27  ;;  %p303_p10 = scmp.ne.s32.totalorder %s8139_s15, %s8135_s14 }
  0x20   : > { %10878 = sst [smem:[#allocation19_spill]] %s8311_s11  ;;  %p291_p9 = scmp.eq.s32.totalorder %s290_s26, 0 }
  0x21   : > { %p304_p11 = scmp.eq.s32.totalorder %s6286_s24, 3  ;;  %p309_p13 = scmp.ne.s32.totalorder %s8135_s14, %s8131_s13 }
  0x22   : > { %s8323_s29 = scalar_select %p291_p9, %s8139_s15, %s293_s10  }
  0x23   : > { %p8325_p12 = por %p304_p11, %p303_p10  ;;  %p310_p0 = scmp.eq.s32.totalorder %s6287_s25, 3 }
  0x24   : > { %10880 = sst [smem:[#allocation20_spill]] %s8323_s29  ;;  %p7009_p1 = scmp.lt.s32.totalorder %s8171_s23, 4 }
  0x25   : > { %s10881_s16 = scalar_select %p8325_p12, 1, 0 }
  0x26   : > { %s8333_s28 = sand.u32 1, %s8151_s18   ;;  %p8335_p2 = por %p310_p0, %p309_p13 }
  0x27   : > { %10882 = sst [smem:[#allocation21_spill]] %s10881_s16  ;;  %s6989_s26 = smul.u32 768, %s8333_s28 }
  0x28   : > { %s10883_s11 = scalar_select %p8335_p2, 1, 0 }
  0x29   : > { %p8342_p4 = pnand %p7009_p1, %p8303_p3  ;;  %s6990_s24 = smul.u32 12288, %s8163_s21 }
  0x2a   : > { %10884 = sst [smem:[#allocation22_spill]] %s10883_s11  ;;  %s365_s18 = scalar_lea.vmem [#allocation3], %s6989_s26 }
  0x2b   : > { %s10886_s4 = sld [smem:[#allocation104_spill]]  ;;  %s372_s29 = sshll.u32 %s365_s18, 4  ;;  %s373_s29 = int_to_ptr.vmem [resolvable:$true] %s372_s29 }
  0x2c   : > { %s362_s15 = scalar_lea.sflag [#allocation4], %s8333_s28  ;;  %p7993_p5 = pneg %p8342_p4 }
  0x2d   : > { %s8004_s11 = scalar_lea.vmem %s373_s29, 12288  ;;  %s8173_s30 = smov [#allocation3]  }
  0x2e   : > { %p8005_p6 = scmp.ne.s32.totalorder %s373_s29, %s8004_s11  ;;  %s8009_s13 = sshll.u32 %s8173_s30, 4  ;;  %s8010_s13 = int_to_ptr.vmem [resolvable:$false] %s8009_s13 }
  0x2f   : > { %s8011_s16 = scalar_lea.vmem %s8010_s13, 24576  ;;  %p8012_p9 = scmp.lt.s32.totalorder %s373_s29, %s8010_s13 }
  0x30   : > { %p8007_p3 = pnand %p8005_p6, %p7993_p5  ;;  %p8013_p10 = scmp.lt.s32.totalorder %s8011_s16, %s8004_s11 }
  0x31   : > { %s371_s22 = scalar_lea.hbm %s10886_s4, %s6990_s24 }
  0x32   : > { %p8008_p7 = pneg %p8007_p3  ;;  %p8014_p11 = por %p8013_p10, %p8012_p9 }
  0x34   : > { %p8015_p13 = pnand %p8014_p11, %p8008_p7 }
  0x36   : > { %8018 = shalt.err (!%p8015_p13)
}
  0x37   : > { %s8174_s18 = smov 384   ;;  %s8175_s27 = smov 24  }
  0x38   : > { %7001 = dma.hbm_to_vmem [thread:$0]  (!%p8342_p4), %s371_s22, 12288, %s373_s29, %s362_s15, %s8174_s18, %s8174_s18, %s8175_s27  }
  0x39   : > { %p6294_p0 = scmp.ge.s32.totalorder %s8171_s23, 1  ;;  %p417_p1 = scmp.lt.s32.totalorder %s8171_s23, 5 }
  0x3a   : > { %s6291_s26 = sshll.u32 %s8333_s28, 9  ;;  %s6728_s11 = sshll.u32 %s8163_s21, 13 }
  0x3b   : > { %p8361_p6 = pnand %p6294_p0, %p417_p1  ;;  %s402_s16 = scalar_lea.vmem [#allocation6], %s6291_s26 }
  0x3c   : > { %s409_s24 = sshll.u32 %s402_s16, 4  ;;  %s10888_s7 = sld [smem:[#allocation105_spill]]  ;;  %s410_s24 = int_to_ptr.vmem [resolvable:$true] %s409_s24 }
  0x3d   : > { %s399_s8 = scalar_lea.sflag [#allocation7], %s8333_s28  ;;  %s8032_s9 = scalar_lea.vmem %s410_s24, 8192 }
  0x3e   : > { %p8033_p3 = scmp.ne.s32.totalorder %s410_s24, %s8032_s9  ;;  %s8176_s15 = smov [#allocation6]  }
  0x3f   : > { %s8037_s22 = sshll.u32 %s8176_s15, 4  ;;  %s8038_s22 = int_to_ptr.vmem [resolvable:$false] %s8037_s22 }
  0x40   : > { %p8035_p7 = pnand %p8033_p3, %p7993_p5  ;;  %s8039_s29 = scalar_lea.vmem %s8038_s22, 16384 }
  0x41   : > { %p8040_p10 = scmp.lt.s32.totalorder %s410_s24, %s8038_s22  ;;  %p8041_p11 = scmp.lt.s32.totalorder %s8039_s29, %s8032_s9 }
  0x42   : > { %s408_s4 = scalar_lea.hbm %s10888_s7, %s6728_s11  ;;  %p8036_p9 = pneg %p8035_p7 }
  0x43   : > { %p8042_p13 = por %p8041_p11, %p8040_p10 }
  0x45   : > { %p8043_p0 = pnand %p8042_p13, %p8036_p9 }
  0x47   : > { %8046 = shalt.err (!%p8043_p0)
}
  0x48   : > { %s8177_s18 = smov 128   ;;  %s8178_s27 = smov 8  }
  0x49   : > { %7004 = dma.hbm_to_vmem [thread:$0]  (!%p8342_p4), %s408_s4, 8192, %s410_s24, %s399_s8, %s8177_s18, %s8177_s18, %s8178_s27  }
  0x4a   : > { %421 = sbr.rel (%p8361_p6) target bundleno = 2574 (0xa0e), region = 60 }
  0x4f   : > { %s423_s28 = sand.u32 1, %s8147_s17  }
  0x50   : > { %s6991_s26 = smul.u32 768, %s423_s28  ;;  %s424_s11 = scalar_lea.sflag [#allocation4], %s423_s28 }
  0x52   : > { %s8378_s16 = scalar_lea.vmem [#allocation3], %s6991_s26 }
  0x53   : > { %8118 = dma.done.wait (%p8313_p8), %s424_s11, 12288  }
  0x54   : > { %8120 = vsyncadd (%p8313_p8), %s424_s11, 4294955008  ;;  %s6295_s9 = sshll.u32 %s423_s28, 9  ;;  %s433_s25 = scalar_lea.sflag [#allocation7], %s423_s28 }
  0x55   : > { %s8384_s10 = scalar_lea.vmem [#allocation6], %s6295_s9 }
  0x56   : > { %8122 = dma.done.wait (%p8313_p8), %s433_s25, 8192  }
  0x57   : > { %8124 = vsyncadd (%p8313_p8), %s433_s25, 4294959104  ;;  %s10781_s4 = sand.u32 1, %s8135_s14   ;;  %p501_p4 = scmp.lt.s32.totalorder %s8159_s20, 1 }
  0x58   : > { %s6296_s8 = sshll.u32 %s10781_s4, 8  ;;  %p506_p5 = scmp.lt.s32.totalorder %s8155_s19, 1 }
  0x59   : > { %s502_s13 = scalar_select %p501_p4, %s8159_s20, 1 }
  0x5a   : > { %s507_s24 = scalar_select %p506_p5, %s8155_s19, 1 }
  0x5b   : > { %s6729_s30 = sshll.u32 %s502_s13, 7  ;;  %s8422_s18 = scalar_lea.vmem [#allocation8], %s6296_s8 }
  0x5c   : > { %s8400_s29 = scalar_lea.vmem %s10760_s1, %s6729_s30  ;;  %s6299_s12 = sshll.u32 %s507_s24, 1 }
  0x5d   : > { %s8405_s28 = scalar_lea.vmem %s10761_s2, %s6299_s12  ;;  %s8410_s9 = scalar_lea.vmem %s10762_s3, %s6299_s12 }
  0x5e   : > { %s6730_s25 = sshll.u32 %s507_s24, 8  ;;  %s6731_s4 = sshll.u32 %s507_s24, 10 }
  0x5f   : > { %s8415_s21 = scalar_lea.vmem %s10764_s5, %s6730_s25  ;;  %s8420_s22 = scalar_lea.vmem %s10765_s6, %s6731_s4 }
  0x60   : > { %p6305_p8 = scmp.ne.s32.totalorder %s8155_s19, 0 }
  0x62   : > { %528 = sbr.rel (%p6305_p8) target bundleno = 122 (0x7a), region = 72 }
  0x67   : > { %v529_v0 = vld [vmem:[%s8400_s29] sm:$0xff]  ;;  %v530_v1 = vld [vmem:[%s8400_s29 + $0x8] sm:$0xff]  ;;  %v531_v2 = vld [vmem:[%s8400_s29 + $0x10] sm:$0xff] }
  0x68   : > { %v545_v3 = vunpack.c.l.bf16 %v529_v0  ;;  %v546_v4 = vunpack.c.h.bf16 %v529_v0  ;;  %v547_v5 = vunpack.c.l.bf16 %v530_v1  ;;  %v548_v6 = vunpack.c.h.bf16 %v530_v1  ;;  %v532_v7 = vld [vmem:[%s8400_s29 + $0x18] sm:$0xff]  ;;  %v533_v8 = vld [vmem:[%s8400_s29 + $0x20] sm:$0xff]  ;;  %v534_v9 = vld [vmem:[%s8400_s29 + $0x28] sm:$0xff] }
  0x69   : > { %v549_v10 = vunpack.c.l.bf16 %v531_v2  ;;  %v550_v11 = vunpack.c.h.bf16 %v531_v2  ;;  %v551_v12 = vunpack.c.l.bf16 %v532_v7  ;;  %v552_v13 = vunpack.c.h.bf16 %v532_v7  ;;  %v535_v14 = vld [vmem:[%s8400_s29 + $0x30] sm:$0xff]  ;;  %v536_v15 = vld [vmem:[%s8400_s29 + $0x38] sm:$0xff]  ;;  %v537_v16 = vld [vmem:[%s8400_s29 + $0x40] sm:$0xff] }
  0x6a   : > { %577 = vst [vmem:[#allocation2 + $0xb0] sm:$0xff] %v545_v3  ;;  %578 = vst [vmem:[#allocation2] sm:$0xff] %v546_v4  ;;  %v553_v17 = vunpack.c.l.bf16 %v533_v8  ;;  %v554_v18 = vunpack.c.h.bf16 %v533_v8  ;;  %v555_v19 = vunpack.c.l.bf16 %v534_v9  ;;  %v556_v20 = vunpack.c.h.bf16 %v534_v9  ;;  %v538_v21 = vld [vmem:[%s8400_s29 + $0x48] sm:$0xff]  ;;  %v539_v22 = vld [vmem:[%s8400_s29 + $0x50] sm:$0xff] }
  0x6b   : > { %579 = vst [vmem:[#allocation2 + $0xd8] sm:$0xff] %v547_v5  ;;  %580 = vst [vmem:[#allocation2 + $0x18] sm:$0xff] %v548_v6  ;;  %v540_v23 = vld [vmem:[%s8400_s29 + $0x58] sm:$0xff]  ;;  %v557_v24 = vunpack.c.l.bf16 %v535_v14  ;;  %v558_v25 = vunpack.c.h.bf16 %v535_v14  ;;  %v559_v26 = vunpack.c.l.bf16 %v536_v15  ;;  %v560_v27 = vunpack.c.h.bf16 %v536_v15  ;;  %v541_v28 = vld [vmem:[%s8400_s29 + $0x60] sm:$0xff] }
  0x6c   : > { %581 = vst [vmem:[#allocation2 + $0x50] sm:$0xff] %v549_v10  ;;  %582 = vst [vmem:[#allocation2 + $0x68] sm:$0xff] %v550_v11  ;;  %v542_v29 = vld [vmem:[%s8400_s29 + $0x68] sm:$0xff]  ;;  %v561_v30 = vunpack.c.l.bf16 %v537_v16  ;;  %v562_v31 = vunpack.c.h.bf16 %v537_v16  ;;  %v563_v32 = vunpack.c.l.bf16 %v538_v21  ;;  %v564_v33 = vunpack.c.h.bf16 %v538_v21  ;;  %v543_v34 = vld [vmem:[%s8400_s29 + $0x70] sm:$0xff] }
  0x6d   : > { %583 = vst [vmem:[#allocation2 + $0x30] sm:$0xff] %v551_v12  ;;  %584 = vst [vmem:[#allocation2 + $0x48] sm:$0xff] %v552_v13  ;;  %v544_v35 = vld [vmem:[%s8400_s29 + $0x78] sm:$0xff]  ;;  %v565_v36 = vunpack.c.l.bf16 %v539_v22  ;;  %v566_v37 = vunpack.c.h.bf16 %v539_v22  ;;  %v567_v38 = vunpack.c.l.bf16 %v540_v23  ;;  %v568_v39 = vunpack.c.h.bf16 %v540_v23 }
  0x6e   : > { %585 = vst [vmem:[#allocation2 + $0x80] sm:$0xff] %v553_v17  ;;  %586 = vst [vmem:[#allocation2 + $0x88] sm:$0xff] %v554_v18  ;;  %v569_v40 = vunpack.c.l.bf16 %v541_v28  ;;  %v570_v41 = vunpack.c.h.bf16 %v541_v28  ;;  %v571_v42 = vunpack.c.l.bf16 %v542_v29  ;;  %v572_v43 = vunpack.c.h.bf16 %v542_v29 }
  0x6f   : > { %587 = vst [vmem:[#allocation2 + $0xe8] sm:$0xff] %v555_v19  ;;  %588 = vst [vmem:[#allocation2 + $0xb8] sm:$0xff] %v556_v20  ;;  %v573_v44 = vunpack.c.l.bf16 %v543_v34  ;;  %v574_v45 = vunpack.c.h.bf16 %v543_v34  ;;  %v575_v46 = vunpack.c.l.bf16 %v544_v35  ;;  %v576_v47 = vunpack.c.h.bf16 %v544_v35 }
  0x70   : > { %589 = vst [vmem:[#allocation2 + $0x60] sm:$0xff] %v557_v24  ;;  %590 = vst [vmem:[#allocation2 + $0xf0] sm:$0xff] %v558_v25 }
  0x71   : > { %591 = vst [vmem:[#allocation2 + $0x8] sm:$0xff] %v559_v26  ;;  %592 = vst [vmem:[#allocation2 + $0x78] sm:$0xff] %v560_v27 }
  0x72   : > { %593 = vst [vmem:[#allocation2 + $0x38] sm:$0xff] %v561_v30  ;;  %594 = vst [vmem:[#allocation2 + $0x58] sm:$0xff] %v562_v31 }
  0x73   : > { %595 = vst [vmem:[#allocation2 + $0x40] sm:$0xff] %v563_v32  ;;  %596 = vst [vmem:[#allocation2 + $0xc8] sm:$0xff] %v564_v33 }
  0x74   : > { %597 = vst [vmem:[#allocation2 + $0xe0] sm:$0xff] %v565_v36  ;;  %598 = vst [vmem:[#allocation2 + $0x90] sm:$0xff] %v566_v37 }
  0x75   : > { %599 = vst [vmem:[#allocation2 + $0x70] sm:$0xff] %v567_v38  ;;  %600 = vst [vmem:[#allocation2 + $0xc0] sm:$0xff] %v568_v39 }
  0x76   : > { %601 = vst [vmem:[#allocation2 + $0xa8] sm:$0xff] %v569_v40  ;;  %602 = vst [vmem:[#allocation2 + $0xd0] sm:$0xff] %v570_v41 }
  0x77   : > { %603 = vst [vmem:[#allocation2 + $0x10] sm:$0xff] %v571_v42  ;;  %604 = vst [vmem:[#allocation2 + $0x28] sm:$0xff] %v572_v43 }
  0x78   : > { %605 = vst [vmem:[#allocation2 + $0xa0] sm:$0xff] %v573_v44  ;;  %606 = vst [vmem:[#allocation2 + $0xf8] sm:$0xff] %v574_v45 }
  0x79   : > { %607 = vst [vmem:[#allocation2 + $0x20] sm:$0xff] %v575_v46  ;;  %608 = vst [vmem:[#allocation2 + $0x98] sm:$0xff] %v576_v47 }
  0x7a PF: > { %v8441_v48 = vld [vmem:[#allocation2 + $0xb0] sm:$0xff]  ;;  %v8443_v49 = vld [vmem:[#allocation2] sm:$0xff]  ;;  %v8451_v53 = vld [vmem:[#allocation2 + $0x68] sm:$0xff]  ;;  %p6690_p1 = scmp.ne.s32.totalorder %s8155_s19, 1 }
  0x7b   : > { %v8445_v50 = vld [vmem:[#allocation2 + $0x50] sm:$0xff]  ;;  %v642_v51 = vmul.f32 %v8441_v48, %v8441_v48  ;;  %v643_v52 = vmul.f32 %v8443_v49, %v8443_v49  ;;  %v8455_v55 = vld [vmem:[#allocation2 + $0xd8] sm:$0xff]  ;;  %v647_v57 = vmul.f32 %v8451_v53, %v8451_v53  ;;  %v8467_v61 = vld [vmem:[#allocation2 + $0x48] sm:$0xff]  ;;  %s11063_s27 = sld [smem:[#allocation106_spill]] (!%p6690_p1) }
  0x7c   : > { %v646_v54 = vmul.f32 %v8445_v50, %v8445_v50  ;;  %v8457_v56 = vld [vmem:[#allocation2 + $0x18] sm:$0xff]  ;;  %v644_v58 = vmul.f32 %v8455_v55, %v8455_v55  ;;  %v8465_v60 = vld [vmem:[#allocation2 + $0x30] sm:$0xff]  ;;  %v8469_v62 = vld [vmem:[#allocation2 + $0xe8] sm:$0xff]  ;;  %v649_v1 = vmul.f32 %v8467_v61, %v8467_v61 }
  0x7d   : > { %v645_v59 = vmul.f32 %v8457_v56, %v8457_v56  ;;  %v674_v63 = vadd.f32 %v643_v52, %v642_v51  ;;  %v648_v0 = vmul.f32 %v8465_v60, %v8465_v60  ;;  %v8475_v2 = vld [vmem:[#allocation2 + $0xb8] sm:$0xff]  ;;  %v8477_v3 = vld [vmem:[#allocation2 + $0x80] sm:$0xff]  ;;  %v8479_v4 = vld [vmem:[#allocation2 + $0x88] sm:$0xff]  ;;  %v652_v10 = vmul.f32 %v8469_v62, %v8469_v62 }
  0x7e   : > { %v680_v5 = vadd.f32 %v647_v57, %v646_v54  ;;  %v650_v7 = vmul.f32 %v8477_v3, %v8477_v3  ;;  %v651_v8 = vmul.f32 %v8479_v4, %v8479_v4  ;;  %v653_v11 = vmul.f32 %v8475_v2, %v8475_v2  ;;  %v621_v12 = vld [vmem:[#allocation2 + $0x60] sm:$0xff]  ;;  %v8489_v13 = vld [vmem:[#allocation2 + $0xf0] sm:$0xff]  ;;  %v623_v14 = vld [vmem:[#allocation2 + $0x8] sm:$0xff] }
  0x7f   : > { %675 = vadd.xlane.f32.xlu0 %v674_v63  ;;  %v677_v6 = vadd.f32 %v645_v59, %v644_v58  ;;  %v683_v9 = vadd.f32 %v649_v1, %v648_v0  ;;  %v8491_v15 = vld [vmem:[#allocation2 + $0x78] sm:$0xff]  ;;  %v654_v17 = vmul.f32 %v621_v12, %v621_v12  ;;  %v655_v18 = vmul.f32 %v8489_v13, %v8489_v13  ;;  %v627_v19 = vld [vmem:[#allocation2 + $0x40] sm:$0xff]  ;;  %v628_v20 = vld [vmem:[#allocation2 + $0xc8] sm:$0xff] }
  0x80   : > { %681 = vadd.xlane.f32.xlu1 %v680_v5  ;;  %v686_v16 = vadd.f32 %v651_v8, %v650_v7  ;;  %v689_v21 = vadd.f32 %v653_v11, %v652_v10  ;;  %v656_v22 = vmul.f32 %v623_v14, %v623_v14  ;;  %v657_v23 = vmul.f32 %v8491_v15, %v8491_v15  ;;  %v625_v24 = vld [vmem:[#allocation2 + $0x38] sm:$0xff]  ;;  %v7105_v26 = vld [vmem:[%s8378_s16 + $0x154] ss:$24 sps:$4 sm:$0xff]   ;;  %v629_v27 = vld [vmem:[#allocation2 + $0xe0] sm:$0xff] }
  0x81   : > { %v626_v25 = vld [vmem:[#allocation2 + $0x58] sm:$0xff]  ;;  %v630_v28 = vld [vmem:[#allocation2 + $0x90] sm:$0xff]  ;;  %v692_v31 = vadd.f32 %v655_v18, %v654_v17  ;;  %v658_v32 = vmul.f32 %v625_v24, %v625_v24  ;;  %v632_v35 = vld [vmem:[#allocation2 + $0xc0] sm:$0xff]  ;;  %1438 = vmatprep.subr.bf16.mxu0 %v7105_v26  ;;  %v660_v38 = vmul.f32 %v627_v19, %v627_v19  ;;  %v661_v39 = vmul.f32 %v628_v20, %v628_v20 }
  0x82   : > { %v7107_v29 = vld [vmem:[%s8378_s16 + $0x15c] ss:$24 sps:$4 sm:$0xff]   ;;  %v7109_v30 = vld [vmem:[%s8378_s16 + $0x150] ss:$24 sps:$4 sm:$0xff]   ;;  %v659_v33 = vmul.f32 %v626_v25, %v626_v25  ;;  %v695_v37 = vadd.f32 %v657_v23, %v656_v22  ;;  %v7113_v41 = vld [vmem:[%s8378_s16 + $0x12c] ss:$24 sps:$4 sm:$0xff]   ;;  %v662_v47 = vmul.f32 %v629_v27, %v629_v27  ;;  %v663_v51 = vmul.f32 %v630_v28, %v630_v28 }
  0x83   : > { %678 = vadd.xlane.f32.xlu0 %v677_v6  ;;  %v631_v34 = vld [vmem:[#allocation2 + $0x70] sm:$0xff]  ;;  %1551 = vmatprep.subr.bf16.mxu1 %v7107_v29  ;;  %v7111_v40 = vld [vmem:[%s8378_s16 + $0x124] ss:$24 sps:$4 sm:$0xff]   ;;  %v7115_v42 = vld [vmem:[%s8378_s16 + $0x120] ss:$24 sps:$4 sm:$0xff]   ;;  %v701_v58 = vadd.f32 %v661_v39, %v660_v38  ;;  %v665_v63 = vmul.f32 %v632_v35, %v632_v35 }
  0x84   : > { %684 = vadd.xlane.f32.xlu1 %v683_v9  ;;  %v7110_v36 = vld [vmem:[%s8378_s16 + $0x158] ss:$24 sps:$4 sm:$0xff]   ;;  %1439 = vmatpush1.bf16.msra.mxu0 %v7109_v30  ;;  %v7116_v43 = vld [vmem:[%s8378_s16 + $0x128] ss:$24 sps:$4 sm:$0xff]   ;;  %v7117_v45 = vld [vmem:[%s8378_s16 + $0xf4] ss:$24 sps:$4 sm:$0xff]   ;;  %v698_v46 = vadd.f32 %v659_v33, %v658_v32  ;;  %v664_v59 = vmul.f32 %v631_v34, %v631_v34  ;;  %v704_v8 = vadd.f32 %v663_v51, %v662_v47 }
  0x85   : > { %1552 = vmatpush1.bf16.msra.mxu1 %v7110_v36  ;;  %v633_v44 = vld [vmem:[#allocation2 + $0xa8] sm:$0xff]  ;;  %1440 = vmatprep.subr.bf16.mxu0 %v7111_v40  ;;  %v635_v52 = vld [vmem:[#allocation2 + $0x10] sm:$0xff]  ;;  %v7123_v6 = vld [vmem:[%s8378_s16 + $0xc4] ss:$24 sps:$4 sm:$0xff]  }
  0x86   : > { %v636_v54 = vld [vmem:[#allocation2 + $0x28] sm:$0xff]  ;;  %1553 = vmatprep.subr.bf16.mxu1 %v7113_v41  ;;  %v7119_v57 = vld [vmem:[%s8378_s16 + $0xfc] ss:$24 sps:$4 sm:$0xff]   ;;  %v7122_v5 = vld [vmem:[%s8378_s16 + $0xf8] ss:$24 sps:$4 sm:$0xff]   ;;  %v666_v9 = vmul.f32 %v633_v44, %v633_v44  ;;  %v668_v17 = vmul.f32 %v635_v52, %v635_v52 }
  0x87   : > { %687 = vadd.xlane.f32.xlu0 %v686_v16  ;;  %v634_v0 = vld [vmem:[#allocation2 + $0xd0] sm:$0xff]  ;;  %v7125_v7 = vld [vmem:[%s8378_s16 + $0xcc] ss:$24 sps:$4 sm:$0xff]   ;;  %v640_v12 = vld [vmem:[#allocation2 + $0x98] sm:$0xff]  ;;  %v707_v16 = vadd.f32 %v665_v63, %v664_v59  ;;  %v669_v18 = vmul.f32 %v636_v54, %v636_v54 }
  0x88   : > { %690 = vadd.xlane.f32.xlu1 %v689_v21  ;;  %v7121_v1 = vld [vmem:[%s8378_s16 + $0xf0] ss:$24 sps:$4 sm:$0xff]   ;;  %1441 = vmatpush1.bf16.msra.mxu0 %v7115_v42  ;;  %v667_v10 = vmul.f32 %v634_v0, %v634_v0  ;;  %v639_v11 = vld [vmem:[#allocation2 + $0x20] sm:$0xff]  ;;  %v8511_v19 = vld [vmem:[#allocation2 + $0xf8] sm:$0xff]  ;;  %v673_v29 = vmul.f32 %v640_v12, %v640_v12 }
  0x89   : > { %1554 = vmatpush1.bf16.msra.mxu1 %v7116_v43  ;;  %1442 = vmatprep.subr.bf16.mxu0 %v7117_v45  ;;  %v637_v14 = vld [vmem:[#allocation2 + $0xa0] sm:$0xff]  ;;  %v7129_v22 = vld [vmem:[%s8378_s16 + $0x94] ss:$24 sps:$4 sm:$0xff]   ;;  %v671_v26 = vmul.f32 %v8511_v19, %v8511_v19  ;;  %v713_v27 = vadd.f32 %v669_v18, %v668_v17  ;;  %v672_v28 = vmul.f32 %v639_v11, %v639_v11  ;;  %v7133_v30 = vld [vmem:[%s8378_s16 + $0x90] ss:$24 sps:$4 sm:$0xff]  }
  0x8a   : > { %1555 = vmatprep.subr.bf16.mxu1 %v7119_v57  ;;  %v7127_v20 = vld [vmem:[%s8378_s16 + $0xc0] ss:$24 sps:$4 sm:$0xff]   ;;  %v7131_v23 = vld [vmem:[%s8378_s16 + $0x9c] ss:$24 sps:$4 sm:$0xff]   ;;  %v710_v24 = vadd.f32 %v667_v10, %v666_v9  ;;  %v670_v25 = vmul.f32 %v637_v14, %v637_v14  ;;  %v7137_v33 = vld [vmem:[%s8378_s16 + $0x6c] ss:$24 sps:$4 sm:$0xff]  }
  0x8b   : > { %693 = vadd.xlane.f32.xlu0 %v692_v31  ;;  %v7128_v21 = vld [vmem:[%s8378_s16 + $0xc8] ss:$24 sps:$4 sm:$0xff]   ;;  %v7134_v31 = vld [vmem:[%s8378_s16 + $0x98] ss:$24 sps:$4 sm:$0xff]   ;;  %v7135_v32 = vld [vmem:[%s8378_s16 + $0x64] ss:$24 sps:$4 sm:$0xff]   ;;  %v719_v35 = vadd.f32 %v673_v29, %v672_v28 }
  0x8c   : > { %696 = vadd.xlane.f32.xlu1 %v695_v37  ;;  %1443 = vmatpush1.bf16.msra.mxu0 %v7121_v1  ;;  %v716_v34 = vadd.f32 %v671_v26, %v670_v25  ;;  %v7139_v36 = vld [vmem:[%s8378_s16 + $0x60] ss:$24 sps:$4 sm:$0xff]   ;;  %v7141_v38 = vld [vmem:[%s8378_s16 + $0x34] ss:$24 sps:$4 sm:$0xff]   ;;  %v7145_v40 = vld [vmem:[%s8378_s16 + $0x30] ss:$24 sps:$4 sm:$0xff]  }
  0x8d   : > { %1556 = vmatpush1.bf16.msra.mxu1 %v7122_v5  ;;  %1444 = vmatprep.subr.bf16.mxu0 %v7123_v6  ;;  %v7140_v37 = vld [vmem:[%s8378_s16 + $0x68] ss:$24 sps:$4 sm:$0xff]   ;;  %v7143_v39 = vld [vmem:[%s8378_s16 + $0x3c] ss:$24 sps:$4 sm:$0xff]   ;;  %v7146_v41 = vld [vmem:[%s8378_s16 + $0x38] ss:$24 sps:$4 sm:$0xff]  }
  0x8e   : > { %1557 = vmatprep.subr.bf16.mxu1 %v7125_v7  ;;  %v7147_v42 = vld [vmem:[%s8378_s16 + $0x4] ss:$24 sps:$4 sm:$0xff]   ;;  %v7151_v44 = vld [vmem:[%s8378_s16] ss:$24 sps:$4 sm:$0xff]   ;;  %v7157_v51 = vld [vmem:[%s8378_s16 + $0x2d0] ss:$24 sps:$4 sm:$0xff]  }
  0x8f   : > { %699 = vadd.xlane.f32.xlu0 %v698_v46  ;;  %v7149_v43 = vld [vmem:[%s8378_s16 + $0xc] ss:$24 sps:$4 sm:$0xff]   ;;  %v7152_v45 = vld [vmem:[%s8378_s16 + $0x8] ss:$24 sps:$4 sm:$0xff]   ;;  %v7155_v47 = vld [vmem:[%s8378_s16 + $0x2dc] ss:$24 sps:$4 sm:$0xff]  }
  0x90   : > { %702 = vadd.xlane.f32.xlu1 %v701_v58  ;;  %1445 = vmatpush1.bf16.msra.mxu0 %v7127_v20  ;;  %v7153_v46 = vld [vmem:[%s8378_s16 + $0x2d4] ss:$24 sps:$4 sm:$0xff]   ;;  %v7158_v52 = vld [vmem:[%s8378_s16 + $0x2d8] ss:$24 sps:$4 sm:$0xff]   ;;  %v7159_v54 = vld [vmem:[%s8378_s16 + $0x2a4] ss:$24 sps:$4 sm:$0xff]  }
  0x91   : > { %1558 = vmatpush1.bf16.msra.mxu1 %v7128_v21  ;;  %1446 = vmatprep.subr.bf16.mxu0 %v7129_v22  ;;  %v7161_v57 = vld [vmem:[%s8378_s16 + $0x2ac] ss:$24 sps:$4 sm:$0xff]   ;;  %v7163_v58 = vld [vmem:[%s8378_s16 + $0x2a0] ss:$24 sps:$4 sm:$0xff]   ;;  %v7167_v0 = vld [vmem:[%s8378_s16 + $0x27c] ss:$24 sps:$4 sm:$0xff]  }
  0x92   : > { %1559 = vmatprep.subr.bf16.mxu1 %v7131_v23  ;;  %v7164_v59 = vld [vmem:[%s8378_s16 + $0x2a8] ss:$24 sps:$4 sm:$0xff]   ;;  %v7165_v63 = vld [vmem:[%s8378_s16 + $0x274] ss:$24 sps:$4 sm:$0xff]   ;;  %v7170_v5 = vld [vmem:[%s8378_s16 + $0x278] ss:$24 sps:$4 sm:$0xff]  }
  0x93   : > { %705 = vadd.xlane.f32.xlu0 %v704_v8  ;;  %v7169_v1 = vld [vmem:[%s8378_s16 + $0x270] ss:$24 sps:$4 sm:$0xff]   ;;  %v7171_v6 = vld [vmem:[%s8378_s16 + $0x244] ss:$24 sps:$4 sm:$0xff]   ;;  %v7175_v8 = vld [vmem:[%s8378_s16 + $0x240] ss:$24 sps:$4 sm:$0xff]  }
  0x94   : > { %708 = vadd.xlane.f32.xlu1 %v707_v16  ;;  %1447 = vmatpush1.bf16.msra.mxu0 %v7133_v30  ;;  %v7173_v7 = vld [vmem:[%s8378_s16 + $0x24c] ss:$24 sps:$4 sm:$0xff]   ;;  %v7176_v9 = vld [vmem:[%s8378_s16 + $0x248] ss:$24 sps:$4 sm:$0xff]   ;;  %v7179_v11 = vld [vmem:[%s8378_s16 + $0x21c] ss:$24 sps:$4 sm:$0xff]  }
  0x95   : > { %1560 = vmatpush1.bf16.msra.mxu1 %v7134_v31  ;;  %1448 = vmatprep.subr.bf16.mxu0 %v7135_v32  ;;  %v7177_v10 = vld [vmem:[%s8378_s16 + $0x214] ss:$24 sps:$4 sm:$0xff]   ;;  %v7181_v12 = vld [vmem:[%s8378_s16 + $0x210] ss:$24 sps:$4 sm:$0xff]   ;;  %v7183_v16 = vld [vmem:[%s8378_s16 + $0x1e4] ss:$24 sps:$4 sm:$0xff]  }
  0x96   : > { %1561 = vmatprep.subr.bf16.mxu1 %v7137_v33  ;;  %v7182_v14 = vld [vmem:[%s8378_s16 + $0x218] ss:$24 sps:$4 sm:$0xff]   ;;  %v7185_v17 = vld [vmem:[%s8378_s16 + $0x1ec] ss:$24 sps:$4 sm:$0xff]   ;;  %v7188_v20 = vld [vmem:[%s8378_s16 + $0x1e8] ss:$24 sps:$4 sm:$0xff]  }
  0x97   : > { %711 = vadd.xlane.f32.xlu0 %v710_v24  ;;  %v7187_v18 = vld [vmem:[%s8378_s16 + $0x1e0] ss:$24 sps:$4 sm:$0xff]   ;;  %v7189_v21 = vld [vmem:[%s8378_s16 + $0x1b4] ss:$24 sps:$4 sm:$0xff]   ;;  %v7193_v23 = vld [vmem:[%s8378_s16 + $0x1b0] ss:$24 sps:$4 sm:$0xff]  }
  0x98   : > { %714 = vadd.xlane.f32.xlu1 %v713_v27  ;;  %1449 = vmatpush1.bf16.msra.mxu0 %v7139_v36  ;;  %v7191_v22 = vld [vmem:[%s8378_s16 + $0x1bc] ss:$24 sps:$4 sm:$0xff]   ;;  %v7194_v24 = vld [vmem:[%s8378_s16 + $0x1b8] ss:$24 sps:$4 sm:$0xff]   ;;  %v7197_v26 = vld [vmem:[%s8378_s16 + $0x18c] ss:$24 sps:$4 sm:$0xff]  }
  0x99   : > { %1562 = vmatpush1.bf16.msra.mxu1 %v7140_v37  ;;  %1450 = vmatprep.subr.bf16.mxu0 %v7141_v38  ;;  %v7195_v25 = vld [vmem:[%s8378_s16 + $0x184] ss:$24 sps:$4 sm:$0xff]   ;;  %v7199_v27 = vld [vmem:[%s8378_s16 + $0x180] ss:$24 sps:$4 sm:$0xff]  }
  0x9a   : > { %1563 = vmatprep.subr.bf16.mxu1 %v7143_v39  ;;  %v7200_v28 = vld [vmem:[%s8378_s16 + $0x188] ss:$24 sps:$4 sm:$0xff]   ;;  %v7203_v29 = vld [vmem:[%s8378_s16 + $0x164] ss:$24 sps:$4 sm:$0xff]  }
  0x9b   : > { %717 = vadd.xlane.f32.xlu0 %v716_v34 }
  0x9c   : > { %720 = vadd.xlane.f32.xlu1 %v719_v35  ;;  %1451 = vmatpush1.bf16.msra.mxu0 %v7145_v40 }
  0x9d   : > { %1564 = vmatpush1.bf16.msra.mxu1 %v7146_v41  ;;  %1452 = vmatprep.subr.bf16.mxu0 %v7147_v42  ;;  %v804_v41 = vlaneseq }
  0x9e   : > { %1565 = vmatprep.subr.bf16.mxu1 %v7149_v43 }
  0xa0   : > { %1453 = vmatpush1.bf16.msra.mxu0 %v7151_v44 }
  0xa1   : > { %1566 = vmatpush1.bf16.msra.mxu1 %v7152_v45  ;;  %1454 = vmatprep.subr.bf16.mxu0 %v7153_v46 }
  0xa2   : > { %1567 = vmatprep.subr.bf16.mxu1 %v7155_v47 }
  0xa4   : > { %1455 = vmatpush2.bf16.msra.mxu0 %v7157_v51  ;;  %v805_v51 = vshrl.u32 %v804_v41, 7 }
  0xa5   : > { %1568 = vmatpush2.bf16.msra.mxu1 %v7158_v52  ;;  %1456 = vmatprep.subr.bf16.mxu0 %v7159_v54 }
  0xa6   : > { %1569 = vmatprep.subr.bf16.mxu1 %v7161_v57 }
  0xa8   : > { %1457 = vmatpush2.bf16.msra.mxu0 %v7163_v58 }
  0xa9   : > { %1570 = vmatpush2.bf16.msra.mxu1 %v7164_v59  ;;  %1458 = vmatprep.subr.bf16.mxu0 %v7165_v63 }
  0xaa   : > { %1571 = vmatprep.subr.bf16.mxu1 %v7167_v0  ;;  %v8566_v0 = vsub.s32 1, %v805_v51 }
  0xac   : > { %1459 = vmatpush2.bf16.msra.mxu0 %v7169_v1  ;;  %10889 = vst [vmem:[#allocation23_spill] sm:$0xff] %v8566_v0 }
  0xad   : > { %1572 = vmatpush2.bf16.msra.mxu1 %v7170_v5  ;;  %1460 = vmatprep.subr.bf16.mxu0 %v7171_v6  ;;  %v641_v5 = vld [vmem:[%s8405_s28] sm:$0x3]  ;;  %v8569_v6 = vsub.s32 0, %v805_v51 }
  0xae   : > { %1573 = vmatprep.subr.bf16.mxu1 %v7173_v7 }
  0xaf   : > { %10890 = vst [vmem:[#allocation24_spill] sm:$0xff] %v8569_v6 }
  0xb0   : > { %1461 = vmatpush2.bf16.msra.mxu0 %v7175_v8 }
  0xb1   : > { %1574 = vmatpush2.bf16.msra.mxu1 %v7176_v9  ;;  %1462 = vmatprep.subr.bf16.mxu0 %v7177_v10 }
  0xb2   : > { %1575 = vmatprep.subr.bf16.mxu1 %v7179_v11 }
  0xb4   : > { %1463 = vmatpush2.bf16.msra.mxu0 %v7181_v12 }
  0xb5   : > { %1576 = vmatpush2.bf16.msra.mxu1 %v7182_v14  ;;  %1464 = vmatprep.subr.bf16.mxu0 %v7183_v16  ;;  %v8572_v14 = vrot.slane %v641_v5, %v8566_v0 }
  0xb6   : > { %1577 = vmatprep.subr.bf16.mxu1 %v7185_v17 }
  0xb8   : > { %1465 = vmatpush2.bf16.msra.mxu0 %v7187_v18  ;;  %v8577_v18 = vrot.slane %v641_v5, %v8569_v6 }
  0xb9   : > { %1578 = vmatpush2.bf16.msra.mxu1 %v7188_v20  ;;  %1466 = vmatprep.subr.bf16.mxu0 %v7189_v21 }
  0xba   : > { %1579 = vmatprep.subr.bf16.mxu1 %v7191_v22 }
  0xbc   : > { %1467 = vmatpush2.bf16.msra.mxu0 %v7193_v23 }
  0xbd   : > { %1580 = vmatpush2.bf16.msra.mxu1 %v7194_v24  ;;  %1468 = vmatprep.subr.bf16.mxu0 %v7195_v25 }
  0xbe   : > { %1581 = vmatprep.subr.bf16.mxu1 %v7197_v26 }
  0xc0   : > { %1469 = vmatpush2.bf16.msra.mxu0 %v7199_v27 }
  0xc1   : > { %1582 = vmatpush2.bf16.msra.mxu1 %v7200_v28  ;;  %1664 = vmatprep.subr.bf16.mxu0 %v7203_v29 }
 0x108   : > { %v676_v30 = vpop.xlane.xlu0 %675 }
 0x109   : > { %v723_v31 = vmul.f32 0.00390625, %v676_v30  ;;  %v682_v32 = vpop.xlane.xlu1 %681 }
 0x10a   : > { %v725_v33 = vmul.f32 0.00390625, %v682_v32 }
 0x10b   : > { %v739_v34 = vadd.f32 1e-06, %v723_v31 }
 0x10c   : > { %v741_v35 = vadd.f32 1e-06, %v725_v33  ;;  %v679_v36 = vpop.xlane.xlu0 %678 }
 0x10d   : > { %7393 = vrsqrt.f32 %v739_v34  ;;  %v724_v37 = vmul.f32 0.00390625, %v679_v36  ;;  %v685_v38 = vpop.xlane.xlu1 %684 }
 0x10e   : > { %7395 = vrsqrt.f32 %v741_v35  ;;  %v726_v39 = vmul.f32 0.00390625, %v685_v38 }
 0x10f   : > { %v740_v40 = vadd.f32 1e-06, %v724_v37 }
 0x110   : > { %v742_v42 = vadd.f32 1e-06, %v726_v39  ;;  %v688_v43 = vpop.xlane.xlu0 %687  ;;  %v7206_v39 = vld [vmem:[%s8378_s16 + $0x134] ss:$24 sps:$4 sm:$0xff]  }
 0x111   : > { %7397 = vrsqrt.f32 %v740_v40  ;;  %v691_v44 = vpop.xlane.xlu1 %690  ;;  %v727_v45 = vmul.f32 0.00390625, %v688_v43 }
 0x112   : > { %7399 = vrsqrt.f32 %v742_v42  ;;  %v728_v46 = vmul.f32 0.00390625, %v691_v44  ;;  %v7204_v44 = vld [vmem:[%s8378_s16 + $0x130] ss:$24 sps:$4 sm:$0xff]  }
 0x113   : > { %v743_v47 = vadd.f32 1e-06, %v727_v45 }
 0x114   : > { %v744_v52 = vadd.f32 1e-06, %v728_v46  ;;  %v694_v54 = vpop.xlane.xlu0 %693 }
 0x115   : > { %7401 = vrsqrt.f32 %v743_v47  ;;  %v697_v57 = vpop.xlane.xlu1 %696  ;;  %v729_v58 = vmul.f32 0.00390625, %v694_v54  ;;  %v7209_v54 = vld [vmem:[%s8378_s16 + $0x104] ss:$24 sps:$4 sm:$0xff]  }
 0x116   : > { %7403 = vrsqrt.f32 %v744_v52  ;;  %v730_v59 = vmul.f32 0.00390625, %v697_v57 }
 0x117   : > { %v745_v63 = vadd.f32 1e-06, %v729_v58 }
 0x118   : > { %v746_v1 = vadd.f32 1e-06, %v730_v59  ;;  %v700_v7 = vpop.xlane.xlu0 %699 }
 0x119   : > { %v703_v8 = vpop.xlane.xlu1 %702  ;;  %v731_v9 = vmul.f32 0.00390625, %v700_v7  ;;  %7405 = vrsqrt.f32 %v745_v63 }
 0x11a   : > { %v7394_v10 = vpop.eup %7393  ;;  %v732_v11 = vmul.f32 0.00390625, %v703_v8  ;;  %7407 = vrsqrt.f32 %v746_v1  ;;  %v7207_v1 = vld [vmem:[%s8378_s16 + $0x100] ss:$24 sps:$4 sm:$0xff]  }
 0x11b   : > { %v7396_v12 = vpop.eup %7395  ;;  %v772_v16 = vmul.f32 %v7394_v10, %v8443_v49  ;;  %v771_v17 = vmul.f32 %v7394_v10, %v8441_v48  ;;  %v747_v21 = vadd.f32 1e-06, %v731_v9  ;;  %v7212_v10 = vld [vmem:[%s8378_s16 + $0xd4] ss:$24 sps:$4 sm:$0xff]  }
 0x11c   : > { %v776_v20 = vmul.f32 %v7396_v12, %v8451_v53  ;;  %v748_v23 = vadd.f32 1e-06, %v732_v11  ;;  %v706_v24 = vpop.xlane.xlu0 %705  ;;  %v775_v40 = vmul.f32 %v7396_v12, %v8445_v50 }
 0x11d   : > { %v815_v28 = vmul.f32 %v8572_v14, %v772_v16  ;;  %v814_v49 = vmul.f32 %v8577_v18, %v771_v17  ;;  %v709_v53 = vpop.xlane.xlu1 %708  ;;  %7409 = vrsqrt.f32 %v747_v21  ;;  %v733_v32 = vmul.f32 0.00390625, %v706_v24 }
 0x11e   : > { %v7398_v22 = vpop.eup %7397  ;;  %v819_v29 = vmul.f32 %v8572_v14, %v776_v20  ;;  %7411 = vrsqrt.f32 %v748_v23  ;;  %v734_v36 = vmul.f32 0.00390625, %v709_v53  ;;  %v818_v51 = vmul.f32 %v8577_v18, %v775_v40  ;;  %v7215_v23 = vld [vmem:[%s8378_s16 + $0xa4] ss:$24 sps:$4 sm:$0xff]  }
 0x11f   : > { %v7400_v25 = vpop.eup %7399  ;;  %v774_v26 = vmul.f32 %v7398_v22, %v8457_v56  ;;  %v773_v27 = vmul.f32 %v7398_v22, %v8455_v55  ;;  %v749_v43 = vadd.f32 1e-06, %v733_v32  ;;  %v7844_v32 = vld [vmem:[#allocation2 + $0xc8] sm:$0xff] }
 0x120   : > { %v778_v48 = vmul.f32 %v7400_v25, %v8467_v61  ;;  %v7201_v61 = vld [vmem:[%s8378_s16 + $0x160] ss:$24 sps:$4 sm:$0xff]   ;;  %v777_v41 = vmul.f32 %v7400_v25, %v8465_v60  ;;  %v750_v50 = vadd.f32 1e-06, %v734_v36  ;;  %v712_v46 = vpop.xlane.xlu0 %711 }
 0x121   : > { %v817_v30 = vmul.f32 %v8572_v14, %v774_v26  ;;  %v816_v31 = vmul.f32 %v8577_v18, %v773_v27  ;;  %v715_v45 = vpop.xlane.xlu1 %714  ;;  %7413 = vrsqrt.f32 %v749_v43  ;;  %v735_v63 = vmul.f32 0.00390625, %v712_v46  ;;  %v7841_v27 = vld [vmem:[#allocation2 + $0x60] sm:$0xff] }
 0x122   : > { %v7402_v56 = vpop.eup %7401  ;;  %v821_v55 = vmul.f32 %v8572_v14, %v778_v48  ;;  %v820_v52 = vmul.f32 %v8577_v18, %v777_v41  ;;  %v736_v59 = vmul.f32 0.00390625, %v715_v45  ;;  %7415 = vrsqrt.f32 %v750_v50  ;;  %v7845_v50 = vld [vmem:[#allocation2 + $0x38] sm:$0xff] }
 0x123   : > { %v7404_v33 = vpop.eup %7403  ;;  %v8589_v34 = vpack.c.bf16 %v817_v30, %v815_v28  ;;  %v8591_v35 = vpack.c.bf16 %v816_v31, %v814_v49  ;;  %v780_v37 = vmul.f32 %v7402_v56, %v8479_v4  ;;  %v779_v57 = vmul.f32 %v7402_v56, %v8477_v3  ;;  %v7842_v49 = vld [vmem:[#allocation2 + $0x8] sm:$0xff]  ;;  %v7843_v30 = vld [vmem:[#allocation2 + $0x58] sm:$0xff] }
 0x124   : > { %v8595_v38 = vpack.c.bf16 %v821_v55, %v819_v29  ;;  %v782_v42 = vmul.f32 %v7404_v33, %v8475_v2  ;;  %v781_v58 = vmul.f32 %v7404_v33, %v8469_v62  ;;  %v8620_v9 = vpack.c.bf16 %v820_v52, %v818_v51  ;;  %v718_v17 = vpop.xlane.xlu0 %717  ;;  %v7213_v29 = vld [vmem:[%s8378_s16 + $0xa0] ss:$24 sps:$4 sm:$0xff]   ;;  %v7218_v55 = vld [vmem:[%s8378_s16 + $0x74] ss:$24 sps:$4 sm:$0xff]  }
 0x125   : > { %1470 = vmatprep.mubr.bf16.mxu0 %v8589_v34  ;;  %1583 = vmatprep.mubr.bf16.mxu1 %v8589_v34  ;;  %v823_v60 = vmul.f32 %v8572_v14, %v780_v37  ;;  %v822_v62 = vmul.f32 %v8577_v18, %v779_v57  ;;  %v752_v12 = vadd.f32 1e-06, %v736_v59  ;;  %v721_v16 = vpop.xlane.xlu1 %720  ;;  %v751_v20 = vadd.f32 1e-06, %v735_v63  ;;  %v7219_v46 = vld [vmem:[%s8378_s16 + $0x40] ss:$24 sps:$4 sm:$0xff]  }
 0x126   : > { %1471 = vmatmul.mubr.bf16.vlgmr.msra.gmra.mxu0 %v8591_v35  ;;  %1584 = vmatmul.mubr.bf16.vlgmr.msra.gmra.mxu1 %v8591_v35  ;;  %v7406_v4 = vpop.eup %7405  ;;  %v825_v2 = vmul.f32 %v8572_v14, %v782_v42  ;;  %v824_v3 = vmul.f32 %v8577_v18, %v781_v58  ;;  %v738_v24 = vmul.f32 0.00390625, %v721_v16  ;;  %v737_v25 = vmul.f32 0.00390625, %v718_v17  ;;  %v7847_v51 = vld [vmem:[#allocation2 + $0x90] sm:$0xff] }
 0x127   : > { %1665 = vmatpush1.bf16.msra.mxu0 %v7201_v61  ;;  %1480 = vmatprep.mubr.bf16.mxu0 %v8595_v38  ;;  %v7408_v47 = vpop.eup %7407  ;;  %v784_v7 = vmul.f32 %v7406_v4, %v8489_v13  ;;  %7417 = vrsqrt.f32 %v752_v12  ;;  %v783_v28 = vmul.f32 %v7841_v27, %v7406_v4  ;;  %v7221_v4 = vld [vmem:[%s8378_s16 + $0x44] ss:$24 sps:$4 sm:$0xff]   ;;  %v7224_v58 = vld [vmem:[%s8378_s16 + $0x14] ss:$24 sps:$4 sm:$0xff]  }
 0x128   : > { %1593 = vmatprep.mubr.bf16.mxu1 %v8595_v38  ;;  %1666 = vmatprep.subr.bf16.mxu0 %v7206_v39  ;;  %v8616_v5 = vpack.c.bf16 %v825_v2, %v823_v60  ;;  %v786_v8 = vmul.f32 %v7408_v47, %v8491_v15  ;;  %v7210_v15 = vld [vmem:[%s8378_s16 + $0xd0] ss:$24 sps:$4 sm:$0xff]   ;;  %v8633_v26 = vpack.c.bf16 %v824_v3, %v822_v62  ;;  %7419 = vrsqrt.f32 %v751_v20  ;;  %v7846_v2 = vld [vmem:[#allocation2 + $0x40] sm:$0xff] }
 0x129   : > { %v827_v21 = vmul.f32 %v8572_v14, %v784_v7  ;;  %v785_v48 = vmul.f32 %v7842_v49, %v7408_v47  ;;  %v826_v61 = vmul.f32 %v8577_v18, %v783_v28  ;;  %v754_v37 = vadd.f32 1e-06, %v738_v24  ;;  %v7216_v39 = vld [vmem:[%s8378_s16 + $0x70] ss:$24 sps:$4 sm:$0xff]   ;;  %v7227_v62 = vld [vmem:[%s8378_s16 + $0x2e4] ss:$24 sps:$4 sm:$0xff]  }
 0x12a   : > { %v7410_v11 = vpop.eup %7409  ;;  %v829_v22 = vmul.f32 %v8572_v14, %v786_v8  ;;  %v753_v40 = vadd.f32 1e-06, %v737_v25  ;;  %v7222_v7 = vld [vmem:[%s8378_s16 + $0x10] ss:$24 sps:$4 sm:$0xff]   ;;  %v7849_v12 = vld [vmem:[#allocation2 + $0xe0] sm:$0xff] }
 0x12b   : > { %1667 = vmatpush1.bf16.msra.mxu0 %v7204_v44  ;;  %v7412_v13 = vpop.eup %7411  ;;  %v788_v31 = vmul.f32 %v7843_v30, %v7410_v11  ;;  %v828_v36 = vmul.f32 %v8577_v18, %v785_v48  ;;  %7421 = vrsqrt.f32 %v754_v37  ;;  %v787_v60 = vmul.f32 %v7845_v50, %v7410_v11  ;;  %v7850_v17 = vld [vmem:[#allocation2 + $0x70] sm:$0xff]  ;;  %v7231_v37 = vld [vmem:[%s8378_s16 + $0x280] ss:$24 sps:$4 sm:$0xff]  }
 0x12c   : > { %1668 = vmatprep.subr.bf16.mxu0 %v7209_v54  ;;  %v8636_v53 = vpack.c.bf16 %v829_v22, %v827_v21  ;;  %v790_v56 = vmul.f32 %v7844_v32, %v7412_v13  ;;  %v789_v45 = vmul.f32 %v7846_v2, %v7412_v13  ;;  %7423 = vrsqrt.f32 %v753_v40  ;;  %v7848_v54 = vld [vmem:[#allocation2 + $0xc0] sm:$0xff]  ;;  %v7851_v21 = vld [vmem:[#allocation2 + $0xd0] sm:$0xff] }
 0x12d   : > { %v831_v41 = vmul.f32 %v8572_v14, %v788_v31  ;;  %v8649_v44 = vpack.c.bf16 %v828_v36, %v826_v61  ;;  %v830_v59 = vmul.f32 %v8577_v18, %v787_v60  ;;  %v7230_v25 = vld [vmem:[%s8378_s16 + $0x2b4] ss:$24 sps:$4 sm:$0xff]   ;;  %v7228_v48 = vld [vmem:[%s8378_s16 + $0x2b0] ss:$24 sps:$4 sm:$0xff]   ;;  %v7233_v32 = vld [vmem:[%s8378_s16 + $0x284] ss:$24 sps:$4 sm:$0xff]  }
 0x12e   : > { %1481 = vmatmul.mubr.bf16.gmra.mxu0 %v8620_v9  ;;  %1594 = vmatmul.mubr.bf16.gmra.mxu1 %v8620_v9  ;;  %v7414_v33 = vpop.eup %7413  ;;  %v833_v42 = vmul.f32 %v8572_v14, %v790_v56  ;;  %v832_v63 = vmul.f32 %v8577_v18, %v789_v45  ;;  %v7854_v61 = vld [vmem:[#allocation2 + $0x10] sm:$0xff]  ;;  %v7239_v45 = vld [vmem:[%s8378_s16 + $0x224] ss:$24 sps:$4 sm:$0xff]  }
 0x12f   : > { %1669 = vmatpush1.bf16.msra.mxu0 %v7207_v1  ;;  %1490 = vmatprep.mubr.bf16.mxu0 %v8616_v5  ;;  %v7416_v43 = vpop.eup %7415  ;;  %v792_v52 = vmul.f32 %v7847_v51, %v7414_v33  ;;  %v791_v16 = vmul.f32 %v7849_v12, %v7414_v33  ;;  %v7234_v60 = vld [vmem:[%s8378_s16 + $0x250] ss:$24 sps:$4 sm:$0xff]   ;;  %v7856_v51 = vld [vmem:[#allocation2 + $0xa0] sm:$0xff] }
 0x130   : > { %1670 = vmatprep.subr.bf16.mxu0 %v7212_v10  ;;  %1603 = vmatprep.mubr.bf16.mxu1 %v8616_v5  ;;  %v8652_v47 = vpack.c.bf16 %v833_v42, %v831_v41  ;;  %v794_v57 = vmul.f32 %v7848_v54, %v7416_v43  ;;  %v8665_v3 = vpack.c.bf16 %v832_v63, %v830_v59  ;;  %v7855_v41 = vld [vmem:[#allocation2 + $0x98] sm:$0xff]  ;;  %v7857_v54 = vld [vmem:[#allocation2 + $0x20] sm:$0xff]  ;;  %v7242_v63 = vld [vmem:[%s8378_s16 + $0x1f4] ss:$24 sps:$4 sm:$0xff]  }
 0x131   : > { %v835_v8 = vmul.f32 %v8572_v14, %v792_v52  ;;  %v793_v13 = vmul.f32 %v7850_v17, %v7416_v43  ;;  %v834_v27 = vmul.f32 %v8577_v18, %v791_v16  ;;  %v7236_v43 = vld [vmem:[%s8378_s16 + $0x254] ss:$24 sps:$4 sm:$0xff]   ;;  %v7246_v12 = vld [vmem:[%s8378_s16 + $0x190] ss:$24 sps:$4 sm:$0xff]  }
 0x132   : > { %v837_v10 = vmul.f32 %v8572_v14, %v794_v57 }
 0x133   : > { %1671 = vmatpush1.bf16.msra.mxu0 %v7210_v15  ;;  %v7225_v15 = vld [vmem:[%s8378_s16 + $0x2e0] ss:$24 sps:$4 sm:$0xff]   ;;  %v836_v28 = vmul.f32 %v8577_v18, %v793_v13 }
 0x134   : > { %1672 = vmatprep.subr.bf16.mxu0 %v7215_v23  ;;  %v7418_v1 = vpop.eup %7417  ;;  %v8668_v20 = vpack.c.bf16 %v837_v10, %v835_v8  ;;  %v7852_v23 = vld [vmem:[#allocation2 + $0x28] sm:$0xff]  ;;  %v7245_v8 = vld [vmem:[%s8378_s16 + $0x1c4] ss:$24 sps:$4 sm:$0xff]  }
 0x135   : > { %v7420_v11 = vpop.eup %7419  ;;  %v798_v24 = vmul.f32 %v7852_v23, %v7418_v1  ;;  %v8681_v56 = vpack.c.bf16 %v836_v28, %v834_v27  ;;  %v797_v36 = vmul.f32 %v7854_v61, %v7418_v1 }
 0x136   : > { %1491 = vmatmul.mubr.bf16.gmra.mxu0 %v8633_v26  ;;  %1604 = vmatmul.mubr.bf16.gmra.mxu1 %v8633_v26  ;;  %v796_v22 = vmul.f32 %v7851_v21, %v7420_v11 }
 0x137   : > { %1673 = vmatpush1.bf16.msra.mxu0 %v7213_v29  ;;  %1500 = vmatprep.mubr.bf16.mxu0 %v8636_v53  ;;  %v841_v30 = vmul.f32 %v8572_v14, %v798_v24  ;;  %v840_v50 = vmul.f32 %v8577_v18, %v797_v36 }
 0x138   : > { %1674 = vmatprep.subr.bf16.mxu0 %v7218_v55  ;;  %1613 = vmatprep.mubr.bf16.mxu1 %v8636_v53  ;;  %v7422_v49 = vpop.eup %7421  ;;  %v839_v29 = vmul.f32 %v8572_v14, %v796_v22  ;;  %v7853_v55 = vld [vmem:[#allocation2 + $0xa8] sm:$0xff] }
 0x139   : > { %v7424_v31 = vpop.eup %7423  ;;  %v795_v33 = vmul.f32 %v7853_v55, %v7420_v11  ;;  %v802_v42 = vmul.f32 %v7855_v41, %v7422_v49  ;;  %v801_v57 = vmul.f32 %v7857_v54, %v7422_v49  ;;  %v7243_v11 = vld [vmem:[%s8378_s16 + $0x1c0] ss:$24 sps:$4 sm:$0xff]  }
 0x13a   : > { %v800_v40 = vmul.f32 %v7424_v31, %v8511_v19  ;;  %v799_v52 = vmul.f32 %v7856_v51, %v7424_v31 }
 0x13b   : > { %1675 = vmatpush1.bf16.msra.mxu0 %v7216_v39  ;;  %v859_v39 = vpack.c.bf16 %v841_v30, %v839_v29  ;;  %v845_v2 = vmul.f32 %v8572_v14, %v802_v42  ;;  %v844_v1 = vmul.f32 %v8577_v18, %v801_v57 }
 0x13c   : > { %1676 = vmatprep.subr.bf16.mxu0 %v7221_v4  ;;  %v838_v4 = vmul.f32 %v8577_v18, %v795_v33  ;;  %v843_v19 = vmul.f32 %v8572_v14, %v800_v40  ;;  %v842_v14 = vmul.f32 %v8577_v18, %v799_v52 }
 0x13e   : > { %1501 = vmatmul.mubr.bf16.gmra.mxu0 %v8649_v44  ;;  %1614 = vmatmul.mubr.bf16.gmra.mxu1 %v8649_v44  ;;  %v861_v59 = vpack.c.bf16 %v845_v2, %v843_v19  ;;  %v860_v10 = vpack.c.bf16 %v844_v1, %v842_v14 }
 0x13f   : > { %1677 = vmatpush1.bf16.msra.mxu0 %v7219_v46  ;;  %1510 = vmatprep.mubr.bf16.mxu0 %v8652_v47  ;;  %v858_v46 = vpack.c.bf16 %v840_v50, %v838_v4 }
 0x140   : > { %1678 = vmatprep.subr.bf16.mxu0 %v7224_v58  ;;  %1623 = vmatprep.mubr.bf16.mxu1 %v8652_v47  ;;  %v7237_v58 = vld [vmem:[%s8378_s16 + $0x220] ss:$24 sps:$4 sm:$0xff]  }
 0x143   : > { %1679 = vmatpush1.bf16.msra.mxu0 %v7222_v7  ;;  %v7240_v7 = vld [vmem:[%s8378_s16 + $0x1f0] ss:$24 sps:$4 sm:$0xff]  }
 0x144   : > { %1680 = vmatprep.subr.bf16.mxu0 %v7227_v62  ;;  %v7248_v62 = vld [vmem:[%s8378_s16 + $0x194] ss:$24 sps:$4 sm:$0xff]  }
 0x146   : > { %1511 = vmatmul.mubr.bf16.gmra.mxu0 %v8665_v3  ;;  %1624 = vmatmul.mubr.bf16.gmra.mxu1 %v8665_v3 }
 0x147   : > { %1681 = vmatpush2.bf16.msra.mxu0 %v7225_v15  ;;  %1520 = vmatprep.mubr.bf16.mxu0 %v8668_v20 }
 0x148   : > { %1682 = vmatprep.subr.bf16.mxu0 %v7230_v25  ;;  %1633 = vmatprep.mubr.bf16.mxu1 %v8668_v20 }
 0x14b   : > { %1683 = vmatpush2.bf16.msra.mxu0 %v7228_v48 }
 0x14c   : > { %1684 = vmatprep.subr.bf16.mxu0 %v7233_v32 }
 0x14e   : > { %1521 = vmatmul.mubr.bf16.gmra.mxu0 %v8681_v56  ;;  %1634 = vmatmul.mubr.bf16.gmra.mxu1 %v8681_v56 }
 0x14f   : > { %1685 = vmatpush2.bf16.msra.mxu0 %v7231_v37  ;;  %1530 = vmatprep.mubr.bf16.mxu0 %v859_v39 }
 0x150   : > { %1686 = vmatprep.subr.bf16.mxu0 %v7236_v43  ;;  %1643 = vmatprep.mubr.bf16.mxu1 %v859_v39 }
 0x153   : > { %1687 = vmatpush2.bf16.msra.mxu0 %v7234_v60 }
 0x154   : > { %1688 = vmatprep.subr.bf16.mxu0 %v7239_v45 }
 0x156   : > { %1531 = vmatmul.mubr.bf16.gmra.mxu0 %v858_v46  ;;  %1644 = vmatmul.mubr.bf16.gmra.mxu1 %v858_v46 }
 0x157   : > { %1689 = vmatpush2.bf16.msra.mxu0 %v7237_v58  ;;  %1540 = vmatprep.mubr.bf16.mxu0 %v861_v59 }
 0x158   : > { %1690 = vmatprep.subr.bf16.mxu0 %v7242_v63  ;;  %1653 = vmatprep.mubr.bf16.mxu1 %v861_v59 }
 0x15b   : > { %1691 = vmatpush2.bf16.msra.mxu0 %v7240_v7 }
 0x15c   : > { %1692 = vmatprep.subr.bf16.mxu0 %v7245_v8 }
 0x15e   : > { %1541 = vmatmul.mubr.bf16.gmra.mxu0 %v860_v10  ;;  %1654 = vmatmul.mubr.bf16.gmra.mxu1 %v860_v10 }
 0x15f   : > { %1693 = vmatpush2.bf16.msra.mxu0 %v7243_v11  ;;  %1696 = vmatprep.mubr.bf16.mxu0 %v8589_v34 }
 0x160   : > { %1694 = vmatprep.subr.bf16.mxu0 %v7248_v62 }
 0x163   : > { %1695 = vmatpush2.bf16.msra.mxu0 %v7246_v12 }
 0x166   : > { %1697 = vmatmul.mubr.bf16.vlgmr.msra.gmra.mxu0 %v8591_v35 }
 0x167   : > { %1706 = vmatprep.mubr.bf16.mxu0 %v8595_v38 }
 0x16e   : > { %1707 = vmatmul.mubr.bf16.gmra.mxu0 %v8620_v9 }
 0x16f   : > { %1716 = vmatprep.mubr.bf16.mxu0 %v8616_v5 }
 0x176   : > { %1717 = vmatmul.mubr.bf16.gmra.mxu0 %v8633_v26 }
 0x177   : > { %1726 = vmatprep.mubr.bf16.mxu0 %v8636_v53 }
 0x17e   : > { %1727 = vmatmul.mubr.bf16.gmra.mxu0 %v8649_v44 }
 0x17f   : > { %1736 = vmatprep.mubr.bf16.mxu0 %v8652_v47 }
 0x186   : > { %1737 = vmatmul.mubr.bf16.gmra.mxu0 %v8665_v3 }
 0x187   : > { %1746 = vmatprep.mubr.bf16.mxu0 %v8668_v20 }
 0x18e   : > { %1747 = vmatmul.mubr.bf16.gmra.mxu0 %v8681_v56 }
 0x18f   : > { %1756 = vmatprep.mubr.bf16.mxu0 %v859_v39 }
 0x196   : > { %1757 = vmatmul.mubr.bf16.gmra.mxu0 %v858_v46 }
 0x197   : > { %1766 = vmatprep.mubr.bf16.mxu0 %v861_v59 }
 0x19e   : > { %1767 = vmatmul.mubr.bf16.gmra.mxu0 %v860_v10 }
 0x1e6   : > { %v1472_v18 = vpop.f32.mrf.mxu0  ;;  %v1585_v34 = vpop.f32.mrf.mxu1 }
 0x1e8   : > { %v1474_v35 = vpop.f32.mrf.mxu0  ;;  %v8715_v38 = vpop.f32.mrf.mxu1 }
 0x1ea   : > { %v1476_v5 = vpop.f32.mrf.mxu0  ;;  %v1589_v9 = vpop.f32.mrf.mxu1 }
 0x1eb   : > { %v1777_v26 = vpack.c.bf16 %v1476_v5, %v1472_v18  ;;  %v8717_v53 = vpack.c.bf16 %v1589_v9, %v1585_v34 }
 0x1ec   : > { %v1478_v44 = vpop.f32.mrf.mxu0  ;;  %v8719_v47 = vpop.f32.mrf.mxu1 }
 0x1ed   : > { %v1778_v3 = vpack.c.bf16 %v1478_v44, %v1474_v35  ;;  %6813 = vmatprep.mubr.bf16.mxu1 %v1777_v26 }
 0x1ee   : > { %v8721_v16 = vpop.f32.mrf.mxu0  ;;  %v1595_v17 = vpop.f32.mrf.mxu1 }
 0x1ef   : > { %6877 = vmatprep.mubr.bf16.mxu0 %v1778_v3 }
 0x1f0   : > { %v8723_v13 = vpop.f32.mrf.mxu0  ;;  %v8725_v15 = vpop.f32.mrf.mxu1 }
 0x1f2   : > { %v8727_v20 = vpop.f32.mrf.mxu0  ;;  %v1599_v21 = vpop.f32.mrf.mxu1 }
 0x1f3   : > { %v8731_v23 = vpack.c.bf16 %v1599_v21, %v1595_v17 }
 0x1f4   : > { %v8733_v24 = vpop.f32.mrf.mxu0  ;;  %v8735_v25 = vpop.f32.mrf.mxu1 }
 0x1f6   : > { %v8737_v27 = vpop.f32.mrf.mxu0  ;;  %v1605_v28 = vpop.f32.mrf.mxu1 }
 0x1f8   : > { %v8739_v49 = vpop.f32.mrf.mxu0  ;;  %v8741_v48 = vpop.f32.mrf.mxu1 }
 0x1fa   : > { %v8743_v29 = vpop.f32.mrf.mxu0  ;;  %v1609_v30 = vpop.f32.mrf.mxu1 }
 0x1fb   : > { %v8747_v32 = vpack.c.bf16 %v1609_v30, %v1605_v28 }
 0x1fc   : > { %v8749_v56 = vpop.f32.mrf.mxu0  ;;  %v8751_v55 = vpop.f32.mrf.mxu1 }
 0x1fe   : > { %v8753_v33 = vpop.f32.mrf.mxu0  ;;  %v8755_v61 = vpop.f32.mrf.mxu1 }
 0x200   : > { %v8757_v36 = vpop.f32.mrf.mxu0  ;;  %v8759_v37 = vpop.f32.mrf.mxu1 }
 0x202   : > { %v8761_v39 = vpop.f32.mrf.mxu0  ;;  %v8763_v40 = vpop.f32.mrf.mxu1 }
 0x204   : > { %v8767_v42 = vpop.f32.mrf.mxu0  ;;  %v8769_v43 = vpop.f32.mrf.mxu1 }
 0x206   : > { %v8771_v4 = vpop.f32.mrf.mxu0  ;;  %v1625_v50 = vpop.f32.mrf.mxu1 }
 0x208   : > { %v8773_v60 = vpop.f32.mrf.mxu0  ;;  %v1627_v19 = vpop.f32.mrf.mxu1 }
 0x20a   : > { %v8775_v2 = vpop.f32.mrf.mxu0  ;;  %v1629_v45 = vpop.f32.mrf.mxu1 }
 0x20c   : > { %v8779_v51 = vpop.f32.mrf.mxu0  ;;  %v1631_v52 = vpop.f32.mrf.mxu1 }
 0x20e   : > { %v8781_v54 = vpop.f32.mrf.mxu0  ;;  %v1635_v57 = vpop.f32.mrf.mxu1 }
 0x210   : > { %v8783_v58 = vpop.f32.mrf.mxu0  ;;  %v1637_v59 = vpop.f32.mrf.mxu1 }
 0x212   : > { %v8785_v63 = vpop.f32.mrf.mxu0  ;;  %v1639_v14 = vpop.f32.mrf.mxu1 }
 0x214   : > { %v8789_v7 = vpop.f32.mrf.mxu0  ;;  %v1641_v8 = vpop.f32.mrf.mxu1 }
 0x216   : > { %v8791_v10 = vpop.f32.mrf.mxu0  ;;  %v1645_v11 = vpop.f32.mrf.mxu1 }
 0x217   : > { %10891 = vst [vmem:[#allocation25_spill] sm:$0xff] %v8791_v10 }
 0x218   : > { %v8793_v62 = vpop.f32.mrf.mxu0  ;;  %v1647_v12 = vpop.f32.mrf.mxu1 }
 0x21a   : > { %v8795_v18 = vpop.f32.mrf.mxu0  ;;  %v1649_v34 = vpop.f32.mrf.mxu1 }
 0x21b   : > { %v1815_v35 = vpack.c.bf16 %v1649_v34, %v1645_v11  ;;  %v1810_v11 = vpack.c.bf16 %v1641_v8, %v1637_v59 }
 0x21c   : > { %v8799_v5 = vpop.f32.mrf.mxu0  ;;  %v1651_v9 = vpop.f32.mrf.mxu1 }
 0x21d   : > { %v1816_v0 = vpack.c.bf16 %v1651_v9, %v1647_v12 }
 0x21e   : > { %v8801_v26 = vpop.f32.mrf.mxu0  ;;  %v1655_v44 = vpop.f32.mrf.mxu1 }
 0x220   : > { %v8803_v3 = vpop.f32.mrf.mxu0  ;;  %v1657_v17 = vpop.f32.mrf.mxu1 }
 0x221   : > { %10892 = vst [vmem:[#allocation26_spill] sm:$0xff] %v8803_v3 }
 0x222   : > { %v8805_v21 = vpop.f32.mrf.mxu0  ;;  %v1659_v28 = vpop.f32.mrf.mxu1 }
 0x223   : > { %v1821_v1 = vpack.c.bf16 %v1659_v28, %v1655_v44  ;;  %v1809_v44 = vpack.c.bf16 %v1639_v14, %v1635_v57 }
 0x224   : > { %v8809_v46 = vpop.f32.mrf.mxu0  ;;  %v1661_v41 = vpop.f32.mrf.mxu1 }
 0x225   : > { %v1822_v31 = vpack.c.bf16 %v1661_v41, %v1657_v17  ;;  %6797 = vmatprep.subr.bf16.mxu1 %v1821_v1  ;;  %v1786_v17 = vpack.c.bf16 %v8735_v25, %v8725_v15 }
 0x226   : > { %v1698_v22 = vpop.f32.mrf.mxu0  ;;  %6798 = vmatpush3.bf16.xpose.msra.mxu1 %v1821_v1 }
 0x227   : > { %6799 = vmatprep.subr.bf16.mxu1 %v1815_v35  ;;  %6861 = vmatprep.subr.bf16.mxu0 %v1822_v31 }
 0x228   : > { %v8811_v6 = vpop.f32.mrf.mxu0  ;;  %6862 = vmatpush3.bf16.xpose.msra.mxu0 %v1822_v31  ;;  %v1803_v31 = vpack.c.bf16 %v1629_v45, %v1625_v50  ;;  %v1798_v50 = vpack.c.bf16 %v8769_v43, %v8759_v37 }
 0x229   : > { %6863 = vmatprep.subr.bf16.mxu0 %v1816_v0 }
 0x22a   : > { %v1702_v3 = vpop.f32.mrf.mxu0 }
 0x22b   : > { %v8813_v10 = vpack.c.bf16 %v1702_v3, %v1698_v22  ;;  %v1804_v22 = vpack.c.bf16 %v1631_v52, %v1627_v19  ;;  %v1792_v3 = vpack.c.bf16 %v8751_v55, %v8741_v48 }
 0x22c   : > { %v8815_v30 = vpop.f32.mrf.mxu0 }
 0x22e   : > { %v1708_v28 = vpop.f32.mrf.mxu0  ;;  %6800 = vmatpush3.bf16.xpose.msra.mxu1 %v1815_v35 }
 0x22f   : > { %6801 = vmatprep.subr.bf16.mxu1 %v1809_v44 }
 0x230   : > { %v8817_v41 = vpop.f32.mrf.mxu0  ;;  %6864 = vmatpush3.bf16.xpose.msra.mxu0 %v1816_v0  ;;  %v1797_v0 = vpack.c.bf16 %v8763_v40, %v8755_v61 }
 0x231   : > { %6865 = vmatprep.subr.bf16.mxu0 %v1810_v11 }
 0x232   : > { %v1712_v1 = vpop.f32.mrf.mxu0 }
 0x233   : > { %v8819_v12 = vpack.c.bf16 %v1712_v1, %v1708_v28 }
 0x234   : > { %v8821_v34 = vpop.f32.mrf.mxu0 }
 0x236   : > { %v8823_v9 = vpop.f32.mrf.mxu0  ;;  %6802 = vmatpush3.bf16.xpose.msra.mxu1 %v1809_v44 }
 0x237   : > { %6803 = vmatprep.subr.bf16.mxu1 %v1803_v31 }
 0x238   : > { %v8825_v57 = vpop.f32.mrf.mxu0  ;;  %6866 = vmatpush3.bf16.xpose.msra.mxu0 %v1810_v11  ;;  %v1780_v11 = vpack.c.bf16 %v8719_v47, %v8715_v38  ;;  %v10893_v47 = vpack.c.bf16 %v8727_v20, %v8721_v16  ;;  %v10895_v20 = vpack.c.bf16 %v8761_v39, %v8753_v33  ;;  %v10897_v33 = vpack.c.bf16 %v8785_v63, %v8781_v54  ;;  %v10898_v39 = vld [vmem:[#allocation25_spill] sm:$0xff] }
 0x239   : > { %6867 = vmatprep.subr.bf16.mxu0 %v1804_v22 }
 0x23a   : > { %v8827_v59 = vpop.f32.mrf.mxu0 }
 0x23c   : > { %v8829_v14 = vpop.f32.mrf.mxu0 }
 0x23e   : > { %v8833_v8 = vpop.f32.mrf.mxu0  ;;  %6804 = vmatpush3.bf16.xpose.msra.mxu1 %v1803_v31 }
 0x23f   : > { %6805 = vmatprep.subr.bf16.mxu1 %v1797_v0 }
 0x240   : > { %v8837_v19 = vpop.f32.mrf.mxu0  ;;  %6868 = vmatpush3.bf16.xpose.msra.mxu0 %v1804_v22 }
 0x241   : > { %6869 = vmatprep.subr.bf16.mxu0 %v1798_v50 }
 0x242   : > { %v1732_v45 = vpop.f32.mrf.mxu0 }
 0x244   : > { %v8839_v52 = vpop.f32.mrf.mxu0 }
 0x246   : > { %v1738_v35 = vpop.f32.mrf.mxu0  ;;  %6806 = vmatpush3.bf16.xpose.msra.mxu1 %v1797_v0 }
 0x247   : > { %6807 = vmatprep.subr.bf16.mxu1 %v8747_v32 }
 0x248   : > { %v8844_v61 = vpop.f32.mrf.mxu0  ;;  %6870 = vmatpush3.bf16.xpose.msra.mxu0 %v1798_v50  ;;  %v1790_v50 = vpack.c.bf16 %v8749_v56, %v8739_v49  ;;  %v1799_v49 = vpack.c.bf16 %v1732_v45, %v8833_v8  ;;  %v1793_v56 = vpack.c.bf16 %v8827_v59, %v8823_v9  ;;  %v8942_v59 = vld [vmem:[%s10759_s0 + $0x18] sm:$0xff] }
 0x249   : > { %6871 = vmatprep.subr.bf16.mxu0 %v1792_v3 }
 0x24a   : > { %v1742_v37 = vpop.f32.mrf.mxu0 }
 0x24b   : > { %v1805_v16 = vpack.c.bf16 %v1742_v37, %v1738_v35  ;;  %v8949_v35 = vld [vmem:[%s10759_s0 + $0x20] sm:$0xff] }
 0x24c   : > { %v8846_v40 = vpop.f32.mrf.mxu0 }
 0x24e   : > { %v1748_v43 = vpop.f32.mrf.mxu0  ;;  %6808 = vmatpush3.bf16.xpose.msra.mxu1 %v8747_v32 }
 0x24f   : > { %6809 = vmatprep.subr.bf16.mxu1 %v8731_v23 }
 0x250   : > { %v8852_v44 = vpop.f32.mrf.mxu0  ;;  %6872 = vmatpush3.bf16.xpose.msra.mxu0 %v1792_v3  ;;  %v10894_v3 = vpack.c.bf16 %v8743_v29, %v8737_v27  ;;  %v10896_v27 = vpack.c.bf16 %v8775_v2, %v8771_v4  ;;  %v1808_v29 = vpack.c.bf16 %v8789_v7, %v8783_v58  ;;  %v10900_v4 = vld [vmem:[#allocation26_spill] sm:$0xff]  ;;  %v10901_v2 = vpack.c.bf16 %v8805_v21, %v8801_v26  ;;  %v8930_v26 = vld [vmem:[%s10759_s0 + $0x8] sm:$0xff] }
 0x251   : > { %6873 = vmatprep.subr.bf16.mxu0 %v1786_v17 }
 0x252   : > { %v1752_v48 = vpop.f32.mrf.mxu0 }
 0x254   : > { %v8854_v55 = vpop.f32.mrf.mxu0 }
 0x256   : > { %v1758_v28 = vpop.f32.mrf.mxu0  ;;  %6810 = vmatpush3.bf16.xpose.msra.mxu1 %v8731_v23  ;;  %v1784_v23 = vpack.c.bf16 %v8733_v24, %v8723_v13  ;;  %v1796_v13 = vpack.c.bf16 %v8767_v42, %v8757_v36  ;;  %v1802_v24 = vpack.c.bf16 %v8779_v51, %v8773_v60  ;;  %v1814_v36 = vpack.c.bf16 %v8799_v5, %v8793_v62 }
 0x257   : > { %6811 = vmatprep.subr.bf16.mxu1 %v8717_v53  ;;  %v10899_v42 = vpack.c.bf16 %v8795_v18, %v10898_v39  ;;  %v1820_v60 = vpack.c.bf16 %v8809_v46, %v10900_v4  ;;  %v8913_v46 = vld [vmem:[%s10759_s0] sm:$0xff]  ;;  %v8923_v18 = vld [vmem:[%s10759_s0 + $0x10] sm:$0xff] }
 0x258   : > { %v8860_v32 = vpop.f32.mrf.mxu0  ;;  %6874 = vmatpush3.bf16.xpose.msra.mxu0 %v1786_v17  ;;  %v1837_v39 = vld [vmem:[%s10759_s0 + $0x60] sm:$0xff] }
 0x259   : > { %6875 = vmatprep.subr.bf16.mxu0 %v1780_v11 }
 0x25a   : > { %v1762_v15 = vpop.f32.mrf.mxu0 }
 0x25b   : > { %v1817_v38 = vpack.c.bf16 %v1762_v15, %v1758_v28  ;;  %v1830_v15 = vld [vmem:[%s10759_s0 + $0x28] sm:$0xff] }
 0x25c   : > { %v8862_v25 = vpop.f32.mrf.mxu0 }
 0x25e   : > { %v1768_v1 = vpop.f32.mrf.mxu0  ;;  %6812 = vmatpush3.bf16.xpose.msra.mxu1 %v8717_v53  ;;  %v1811_v53 = vpack.c.bf16 %v1752_v48, %v1748_v43  ;;  %v8962_v48 = vld [vmem:[%s10759_s0 + $0x30] sm:$0xff] }
 0x260   : > { %v1770_v31 = vpop.f32.mrf.mxu0  ;;  %6876 = vmatpush3.bf16.xpose.msra.mxu0 %v1780_v11 }
 0x262   : > { %v1772_v22 = vpop.f32.mrf.mxu0 }
 0x263   : > { %v1823_v0 = vpack.c.bf16 %v1772_v22, %v1768_v1 }
 0x264   : > { %v1774_v51 = vpop.f32.mrf.mxu0 }
 0x265   : > { %6814 = vmatmul.mubr.bf16.vlgmr.msra.gmra.mxu1 %v10893_v47  ;;  %6829 = vmatprep.subr.bf16.mxu1 %v1823_v0  ;;  %v8906_v54 = vpack.c.bf16 %v1774_v51, %v1770_v31  ;;  %v1833_v47 = vld [vmem:[%s10759_s0 + $0x40] sm:$0xff]  ;;  %v1839_v51 = vld [vmem:[%s10759_s0 + $0x70] sm:$0xff] }
 0x266   : > { %6817 = vmatprep.mubr.bf16.mxu1 %v10894_v3  ;;  %6830 = vmatpush3.bf16.msra.mxu1 %v1823_v0 }
 0x267   : > { %6831 = vmatprep.subr.bf16.mxu1 %v1817_v38  ;;  %6878 = vmatmul.mubr.bf16.vlgmr.msra.gmra.mxu0 %v1784_v23  ;;  %v1832_v23 = vld [vmem:[%s10759_s0 + $0x38] sm:$0xff] }
 0x268   : > { %6881 = vmatprep.mubr.bf16.mxu0 %v1790_v50 }
 0x26a   : > { %6832 = vmatpush3.bf16.msra.mxu1 %v1817_v38 }
 0x26b   : > { %6833 = vmatprep.subr.bf16.mxu1 %v1811_v53 }
 0x26d   : > { %6818 = vmatmul.mubr.bf16.gmra.mxu1 %v10895_v20 }
 0x26e   : > { %6821 = vmatprep.mubr.bf16.mxu1 %v10896_v27  ;;  %6834 = vmatpush3.bf16.msra.mxu1 %v1811_v53 }
 0x26f   : > { %6835 = vmatprep.subr.bf16.mxu1 %v1805_v16  ;;  %6882 = vmatmul.mubr.bf16.gmra.mxu0 %v1796_v13 }
 0x270   : > { %6885 = vmatprep.mubr.bf16.mxu0 %v1802_v24  ;;  %v1834_v24 = vld [vmem:[%s10759_s0 + $0x48] sm:$0xff] }
 0x272   : > { %6836 = vmatpush3.bf16.msra.mxu1 %v1805_v16  ;;  %v1835_v16 = vld [vmem:[%s10759_s0 + $0x50] sm:$0xff] }
 0x273   : > { %6837 = vmatprep.subr.bf16.mxu1 %v1799_v49 }
 0x275   : > { %6822 = vmatmul.mubr.bf16.gmra.mxu1 %v10897_v33  ;;  %v1836_v33 = vld [vmem:[%s10759_s0 + $0x58] sm:$0xff] }
 0x276   : > { %6825 = vmatprep.mubr.bf16.mxu1 %v10899_v42  ;;  %6838 = vmatpush3.bf16.msra.mxu1 %v1799_v49 }
 0x277   : > { %6839 = vmatprep.subr.bf16.mxu1 %v1793_v56  ;;  %6886 = vmatmul.mubr.bf16.gmra.mxu0 %v1808_v29 }
 0x278   : > { %6889 = vmatprep.mubr.bf16.mxu0 %v1814_v36 }
 0x27a   : > { %6840 = vmatpush3.bf16.msra.mxu1 %v1793_v56 }
 0x27b   : > { %6841 = vmatprep.subr.bf16.mxu1 %v8819_v12 }
 0x27d   : > { %6826 = vmatmul.mubr.bf16.gmra.mxu1 %v10901_v2 }
 0x27e   : > { %6842 = vmatpush3.bf16.msra.mxu1 %v8819_v12 }
 0x27f   : > { %6843 = vmatprep.subr.bf16.mxu1 %v8813_v10  ;;  %6890 = vmatmul.mubr.bf16.gmra.mxu0 %v1820_v60 }
 0x282   : > { %6844 = vmatpush3.bf16.msra.mxu1 %v8813_v10 }
 0x283   : > { %6893 = vmatprep.subr.bf16.mxu1 %v8906_v54 }
 0x325   : > { %v6815_v58 = vpop.f32.mrf.mxu1 }
 0x326   : > { %v8934_v12 = vadd.f32 %v6815_v58, %v8923_v18 }
 0x327   : > { %v1875_v63 = vpop.f32.mrf.mxu1  ;;  %v8915_v7 = vpop.f32.mrf.mxu0 }
 0x328   : > { %v8918_v62 = vadd.f32 %v1875_v63, %v8913_v46  ;;  %v1838_v63 = vld [vmem:[%s10759_s0 + $0x68] sm:$0xff] }
 0x329   : > { %v6816_v10 = vpop.f32.mrf.mxu1  ;;  %v8925_v5 = vpop.f32.mrf.mxu0 }
 0x32a   : > { %1938 = vmax.xlane.f32.xlu0 %v8918_v62  ;;  %v8954_v43 = vadd.f32 %v6816_v10, %v8942_v59 }
 0x32b   : > { %v1878_v21 = vpop.f32.mrf.mxu1  ;;  %v8944_v8 = vpop.f32.mrf.mxu0 }
 0x32c   : > { %v8937_v9 = vadd.f32 %v1878_v21, %v8930_v26 }
 0x32d   : > { %v6819_v45 = vpop.f32.mrf.mxu1  ;;  %v2224_v28 = vpop.f32.mrf.mxu0 }
 0x32e   : > { %1940 = vmax.xlane.f32.xlu1 %v8937_v9  ;;  %1942 = vmax.xlane.f32.xlu0 %v8934_v12  ;;  %v8970_v31 = vadd.f32 %v6819_v45, %v8962_v48 }
 0x32f   : > { %v1891_v37 = vpop.f32.mrf.mxu1  ;;  %v6883_v0 = vpop.f32.mrf.mxu0 }
 0x330   : > { %v8957_v17 = vadd.f32 %v1891_v37, %v8949_v35 }
 0x331   : > { %v6820_v11 = vpop.f32.mrf.mxu1  ;;  %v2237_v13 = vpop.f32.mrf.mxu0 }
 0x332   : > { %1944 = vmax.xlane.f32.xlu1 %v8954_v43  ;;  %1946 = vmax.xlane.f32.xlu0 %v8957_v17  ;;  %v8982_v3 = vadd.f32 %v6820_v11, %v1832_v23  ;;  %v1840_v11 = vld [vmem:[%s10759_s0 + $0x78] sm:$0xff] }
 0x333   : > { %v1894_v1 = vpop.f32.mrf.mxu1  ;;  %v6884_v56 = vpop.f32.mrf.mxu0 }
 0x334   : > { %v8972_v22 = vadd.f32 %v1894_v1, %v1830_v15  ;;  %v9029_v1 = vadd.f32 %v8925_v5, %v8913_v46  ;;  %v9046_v46 = vadd.f32 %v8944_v8, %v8942_v59  ;;  %v9049_v5 = vadd.f32 %v2237_v13, %v8949_v35 }
 0x335   : > { %v6823_v38 = vpop.f32.mrf.mxu1  ;;  %v2240_v2 = vpop.f32.mrf.mxu0  ;;  %v9060_v59 = vadd.f32 %v6884_v56, %v1832_v23 }
 0x336   : > { %1948 = vmax.xlane.f32.xlu1 %v8972_v22  ;;  %1950 = vmax.xlane.f32.xlu0 %v8970_v31  ;;  %v8994_v49 = vadd.f32 %v6823_v38, %v1835_v16 }
 0x337   : > { %v1907_v50 = vpop.f32.mrf.mxu1  ;;  %v6887_v37 = vpop.f32.mrf.mxu0 }
 0x338   : > { %v8984_v53 = vadd.f32 %v1907_v50, %v1833_v47 }
 0x339   : > { %v6824_v20 = vpop.f32.mrf.mxu1  ;;  %v2253_v50 = vpop.f32.mrf.mxu0 }
 0x33a   : > { %1952 = vmax.xlane.f32.xlu1 %v8982_v3  ;;  %1954 = vmax.xlane.f32.xlu0 %v8984_v53  ;;  %v9006_v4 = vadd.f32 %v6824_v20, %v1836_v33  ;;  %v9037_v20 = vadd.f32 %v8915_v7, %v8923_v18  ;;  %v9054_v7 = vadd.f32 %v6883_v0, %v8962_v48 }
 0x33b   : > { %v1910_v27 = vpop.f32.mrf.mxu1  ;;  %v9056_v18 = vadd.f32 %v2240_v2, %v1830_v15  ;;  %v9062_v8 = vadd.f32 %v2253_v50, %v1833_v47 }
 0x33c   : > { %v8996_v29 = vadd.f32 %v1910_v27, %v1834_v24  ;;  %v9040_v27 = vadd.f32 %v2224_v28, %v8930_v26  ;;  %v9066_v28 = vadd.f32 %v6887_v37, %v1835_v16 }
 0x33d   : > { %v6827_v36 = vpop.f32.mrf.mxu1 }
 0x33e   : > { %1956 = vmax.xlane.f32.xlu1 %v8996_v29  ;;  %1958 = vmax.xlane.f32.xlu0 %v8994_v49  ;;  %v9018_v21 = vadd.f32 %v6827_v36, %v1839_v51  ;;  %v6888_v36 = vpop.f32.mrf.mxu0 }
 0x33f   : > { %v1923_v42 = vpop.f32.mrf.mxu1  ;;  %v9072_v0 = vadd.f32 %v6888_v36, %v1836_v33 }
 0x340   : > { %v9008_v60 = vadd.f32 %v1923_v42, %v1837_v39  ;;  %v2256_v42 = vpop.f32.mrf.mxu0 }
 0x341   : > { %v6828_v58 = vpop.f32.mrf.mxu1  ;;  %v9068_v48 = vadd.f32 %v2256_v42, %v1834_v24 }
 0x342   : > { %1960 = vmax.xlane.f32.xlu1 %v9006_v4  ;;  %1962 = vmax.xlane.f32.xlu0 %v9008_v60  ;;  %v9031_v38 = vadd.f32 %v6828_v58, %v1840_v11  ;;  %v6891_v26 = vpop.f32.mrf.mxu0 }
 0x343   : > { %v1926_v10 = vpop.f32.mrf.mxu1  ;;  %v9078_v13 = vadd.f32 %v6891_v26, %v1839_v51 }
 0x344   : > { %v9020_v45 = vadd.f32 %v1926_v10, %v1838_v63  ;;  %v2269_v35 = vpop.f32.mrf.mxu0 }
 0x345   : > { %v9074_v23 = vadd.f32 %v2269_v35, %v1837_v39 }
 0x346   : > { %1964 = vmax.xlane.f32.xlu1 %v9020_v45  ;;  %1966 = vmax.xlane.f32.xlu0 %v9018_v21  ;;  %v6892_v15 = vpop.f32.mrf.mxu0 }
 0x347   : > { %v9084_v24 = vadd.f32 %v6892_v15, %v1840_v11 }
 0x348   : > { %v2272_v47 = vpop.f32.mrf.mxu0 }
 0x349   : > { %v9080_v16 = vadd.f32 %v2272_v47, %v1838_v63 }
 0x34a   : > { %1968 = vmax.xlane.f32.xlu1 %v9031_v38  ;;  %2284 = vmax.xlane.f32.xlu0 %v9029_v1 }
 0x34e   : > { %2286 = vmax.xlane.f32.xlu1 %v9040_v27  ;;  %2288 = vmax.xlane.f32.xlu0 %v9037_v20 }
 0x352   : > { %2290 = vmax.xlane.f32.xlu1 %v9046_v46  ;;  %2292 = vmax.xlane.f32.xlu0 %v9049_v5 }
 0x356   : > { %2294 = vmax.xlane.f32.xlu1 %v9056_v18  ;;  %2296 = vmax.xlane.f32.xlu0 %v9054_v7 }
 0x35a   : > { %2298 = vmax.xlane.f32.xlu1 %v9060_v59  ;;  %2300 = vmax.xlane.f32.xlu0 %v9062_v8 }
 0x35e   : > { %2302 = vmax.xlane.f32.xlu1 %v9068_v48  ;;  %2304 = vmax.xlane.f32.xlu0 %v9066_v28 }
 0x362   : > { %2306 = vmax.xlane.f32.xlu1 %v9072_v0  ;;  %2308 = vmax.xlane.f32.xlu0 %v9074_v23 }
 0x366   : > { %2310 = vmax.xlane.f32.xlu1 %v9080_v16  ;;  %2312 = vmax.xlane.f32.xlu0 %v9078_v13 }
 0x36a   : > { %2314 = vmax.xlane.f32.xlu1 %v9084_v24 }
 0x3b3   : > { %v1939_v56 = vpop.xlane.xlu0 %1938 }
 0x3b4   : > { %v1970_v33 = vsub.f32 %v8918_v62, %v1939_v56 }
 0x3b6   : > { %v1986_v39 = vmul.f32 1.442695, %v1970_v33 }
 0x3b7   : > { %v1941_v2 = vpop.xlane.xlu1 %1940  ;;  %v1943_v58 = vpop.xlane.xlu0 %1942 }
 0x3b8   : > { %v1971_v10 = vsub.f32 %v8937_v9, %v1941_v2  ;;  %v1972_v51 = vsub.f32 %v8934_v12, %v1943_v58  ;;  %7425 = vpow2.f32 %v1986_v39 }
 0x3ba   : > { %v1988_v63 = vmul.f32 1.442695, %v1971_v10  ;;  %v1990_v37 = vmul.f32 1.442695, %v1972_v51 }
 0x3bb   : > { %v1945_v50 = vpop.xlane.xlu1 %1944  ;;  %v1947_v36 = vpop.xlane.xlu0 %1946 }
 0x3bc   : > { %7427 = vpow2.f32 %v1988_v63  ;;  %v1973_v11 = vsub.f32 %v8954_v43, %v1945_v50  ;;  %v1974_v42 = vsub.f32 %v8957_v17, %v1947_v36 }
 0x3bd   : > { %7429 = vpow2.f32 %v1990_v37 }
 0x3be   : > { %v1992_v26 = vmul.f32 1.442695, %v1973_v11  ;;  %v1994_v62 = vmul.f32 1.442695, %v1974_v42 }
 0x3bf   : > { %v1949_v35 = vpop.xlane.xlu1 %1948  ;;  %v1951_v15 = vpop.xlane.xlu0 %1950 }
 0x3c0   : > { %7431 = vpow2.f32 %v1992_v26  ;;  %v1975_v9 = vsub.f32 %v8972_v22, %v1949_v35  ;;  %v1976_v12 = vsub.f32 %v8970_v31, %v1951_v15 }
 0x3c1   : > { %7433 = vpow2.f32 %v1994_v62 }
 0x3c2   : > { %v1996_v47 = vmul.f32 1.442695, %v1975_v9  ;;  %v1998_v56 = vmul.f32 1.442695, %v1976_v12 }
 0x3c3   : > { %v1953_v33 = vpop.xlane.xlu1 %1952  ;;  %v1955_v39 = vpop.xlane.xlu0 %1954 }
 0x3c4   : > { %7435 = vpow2.f32 %v1996_v47  ;;  %v1977_v43 = vsub.f32 %v8982_v3, %v1953_v33  ;;  %v1978_v17 = vsub.f32 %v8984_v53, %v1955_v39 }
 0x3c5   : > { %7437 = vpow2.f32 %v1998_v56  ;;  %v9096_v63 = vpop.eup %7425  ;;  %v1818_v56 = vpack.c.bf16 %v8862_v25, %v8860_v32  ;;  %v1812_v25 = vpack.c.bf16 %v8854_v55, %v8852_v44  ;;  %v1806_v44 = vpack.c.bf16 %v8846_v40, %v8844_v61 }
 0x3c6   : > { %v2000_v2 = vmul.f32 1.442695, %v1977_v43  ;;  %v2002_v58 = vmul.f32 1.442695, %v1978_v17  ;;  %v1800_v61 = vpack.c.bf16 %v8839_v52, %v8837_v19  ;;  %v1794_v19 = vpack.c.bf16 %v8829_v14, %v8825_v57 }
 0x3c7   : > { %v1957_v10 = vpop.xlane.xlu1 %1956  ;;  %v1959_v51 = vpop.xlane.xlu0 %1958  ;;  %v1788_v57 = vpack.c.bf16 %v8821_v34, %v8817_v41  ;;  %v1782_v34 = vpack.c.bf16 %v8815_v30, %v8811_v6 }
 0x3c8   : > { %7439 = vpow2.f32 %v2000_v2  ;;  %v1979_v31 = vsub.f32 %v8996_v29, %v1957_v10  ;;  %v1980_v22 = vsub.f32 %v8994_v49, %v1959_v51 }
 0x3c9   : > { %v9100_v37 = vpop.eup %7427  ;;  %7441 = vpow2.f32 %v2002_v58 }
 0x3ca   : > { %v2004_v50 = vmul.f32 1.442695, %v1979_v31  ;;  %v2050_v3 = vpack.c.bf16 %v9100_v37, %v9096_v63  ;;  %v2006_v53 = vmul.f32 1.442695, %v1980_v22  ;;  %v9104_v42 = vpop.eup %7429 }
 0x3cb   : > { %v1961_v36 = vpop.xlane.xlu1 %1960  ;;  %v1963_v11 = vpop.xlane.xlu0 %1962 }
 0x3cc   : > { %7443 = vpow2.f32 %v2004_v50  ;;  %v1981_v26 = vsub.f32 %v9006_v4, %v1961_v36  ;;  %v1982_v62 = vsub.f32 %v9008_v60, %v1963_v11  ;;  %6845 = vmatprep.mubr.bf16.mxu1 %v2050_v3 }
 0x3cd   : > { %v9108_v29 = vpop.eup %7431  ;;  %7445 = vpow2.f32 %v2006_v53 }
 0x3ce   : > { %v2008_v49 = vmul.f32 1.442695, %v1981_v26  ;;  %v2051_v35 = vpack.c.bf16 %v9108_v29, %v9104_v42  ;;  %v2010_v15 = vmul.f32 1.442695, %v1982_v62  ;;  %v9112_v47 = vpop.eup %7433 }
 0x3cf   : > { %v1965_v9 = vpop.xlane.xlu1 %1964  ;;  %v1967_v12 = vpop.xlane.xlu0 %1966 }
 0x3d0   : > { %7447 = vpow2.f32 %v2008_v49  ;;  %v1983_v4 = vsub.f32 %v9020_v45, %v1965_v9  ;;  %v1984_v60 = vsub.f32 %v9018_v21, %v1967_v12  ;;  %6846 = vmatmul.mubr.bf16.vlgmr.msra.gmra.mxu1 %v2051_v35 }
 0x3d1   : > { %v9118_v33 = vpop.eup %7435  ;;  %6894 = vmatpush3.bf16.msra.mxu1 %v8906_v54  ;;  %7449 = vpow2.f32 %v2010_v15 }
 0x3d2   : > { %v2012_v39 = vmul.f32 1.442695, %v1983_v4  ;;  %6895 = vmatprep.subr.bf16.mxu1 %v1818_v56  ;;  %v2052_v43 = vpack.c.bf16 %v9118_v33, %v9112_v47  ;;  %v2014_v17 = vmul.f32 1.442695, %v1984_v60  ;;  %v9123_v32 = vpop.eup %7437 }
 0x3d3   : > { %v1969_v2 = vpop.xlane.xlu1 %1968  ;;  %v2285_v58 = vpop.xlane.xlu0 %2284 }
 0x3d4   : > { %7451 = vpow2.f32 %v2012_v39  ;;  %v1985_v21 = vsub.f32 %v9031_v38, %v1969_v2  ;;  %v2316_v45 = vsub.f32 %v9029_v1, %v2285_v58  ;;  %6849 = vmatprep.mubr.bf16.mxu1 %v2052_v43 }
 0x3d5   : > { %v9129_v54 = vpop.eup %7439  ;;  %6896 = vmatpush3.bf16.msra.mxu1 %v1818_v56  ;;  %7453 = vpow2.f32 %v2014_v17 }
 0x3d6   : > { %v2016_v10 = vmul.f32 1.442695, %v1985_v21  ;;  %v2332_v51 = vmul.f32 1.442695, %v2316_v45  ;;  %6897 = vmatprep.subr.bf16.mxu1 %v1812_v25  ;;  %v2053_v31 = vpack.c.bf16 %v9129_v54, %v9123_v32  ;;  %v9133_v3 = vpop.eup %7441 }
 0x3d7   : > { %v2287_v22 = vpop.xlane.xlu1 %2286  ;;  %v2289_v50 = vpop.xlane.xlu0 %2288 }
 0x3d8   : > { %7455 = vpow2.f32 %v2016_v10  ;;  %v2317_v55 = vsub.f32 %v9040_v27, %v2287_v22  ;;  %v2318_v1 = vsub.f32 %v9037_v20, %v2289_v50  ;;  %6850 = vmatmul.mubr.bf16.gmra.mxu1 %v2053_v31 }
 0x3d9   : > { %v9139_v38 = vpop.eup %7443  ;;  %7457 = vpow2.f32 %v2332_v51  ;;  %6898 = vmatpush3.bf16.msra.mxu1 %v1812_v25 }
 0x3da   : > { %v2334_v53 = vmul.f32 1.442695, %v2317_v55  ;;  %6899 = vmatprep.subr.bf16.mxu1 %v1806_v44  ;;  %v2054_v36 = vpack.c.bf16 %v9139_v38, %v9133_v3  ;;  %v2336_v11 = vmul.f32 1.442695, %v2318_v1  ;;  %v9143_v49 = vpop.eup %7445 }
 0x3db   : > { %v2291_v26 = vpop.xlane.xlu1 %2290  ;;  %v2293_v62 = vpop.xlane.xlu0 %2292 }
 0x3dc   : > { %7459 = vpow2.f32 %v2334_v53  ;;  %v2319_v40 = vsub.f32 %v9046_v46, %v2291_v26  ;;  %v2320_v20 = vsub.f32 %v9049_v5, %v2293_v62  ;;  %6853 = vmatprep.mubr.bf16.mxu1 %v2054_v36 }
 0x3dd   : > { %v9149_v27 = vpop.eup %7447  ;;  %6900 = vmatpush3.bf16.msra.mxu1 %v1806_v44  ;;  %7461 = vpow2.f32 %v2336_v11 }
 0x3de   : > { %v2338_v35 = vmul.f32 1.442695, %v2319_v40  ;;  %6901 = vmatprep.subr.bf16.mxu1 %v1800_v61  ;;  %v2055_v15 = vpack.c.bf16 %v9149_v27, %v9143_v49  ;;  %v2340_v9 = vmul.f32 1.442695, %v2320_v20  ;;  %v9153_v4 = vpop.eup %7449 }
 0x3df   : > { %v2295_v12 = vpop.xlane.xlu1 %2294  ;;  %v2297_v56 = vpop.xlane.xlu0 %2296 }
 0x3e0   : > { %7463 = vpow2.f32 %v2338_v35  ;;  %v2321_v52 = vsub.f32 %v9056_v18, %v2295_v12  ;;  %v2322_v46 = vsub.f32 %v9054_v7, %v2297_v56  ;;  %6854 = vmatmul.mubr.bf16.gmra.mxu1 %v2055_v15 }
 0x3e1   : > { %v9159_v5 = vpop.eup %7451  ;;  %6902 = vmatpush3.bf16.msra.mxu1 %v1800_v61  ;;  %7465 = vpow2.f32 %v2340_v9 }
 0x3e2   : > { %v2342_v60 = vmul.f32 1.442695, %v2321_v52  ;;  %6903 = vmatprep.subr.bf16.mxu1 %v1794_v19  ;;  %v2056_v39 = vpack.c.bf16 %v9159_v5, %v9153_v4  ;;  %v2344_v43 = vmul.f32 1.442695, %v2322_v46  ;;  %v9163_v58 = vpop.eup %7453  ;;  %v7249_v46 = vld [vmem:[%s8415_s21 + $0x70] ss:$8 sps:$4 sm:$0xff]  }
 0x3e3   : > { %v2299_v17 = vpop.xlane.xlu1 %2298  ;;  %v2301_v2 = vpop.xlane.xlu0 %2300 }
 0x3e4   : > { %7467 = vpow2.f32 %v2342_v60  ;;  %v2323_v14 = vsub.f32 %v9060_v59, %v2299_v17  ;;  %v2324_v7 = vsub.f32 %v9062_v8, %v2301_v2  ;;  %6857 = vmatprep.mubr.bf16.mxu1 %v2056_v39  ;;  %v7254_v39 = vld [vmem:[%s8415_s21 + $0x64] ss:$8 sps:$4 sm:$0xff]   ;;  %v7252_v17 = vld [vmem:[%s8415_s21 + $0x60] ss:$8 sps:$4 sm:$0xff]  }
 0x3e5   : > { %v9169_v18 = vpop.eup %7455  ;;  %6904 = vmatpush3.bf16.msra.mxu1 %v1794_v19  ;;  %7469 = vpow2.f32 %v2344_v43 }
 0x3e6   : > { %v7458_v25 = vpop.eup %7457  ;;  %v2346_v21 = vmul.f32 1.442695, %v2323_v14  ;;  %6905 = vmatprep.subr.bf16.mxu1 %v1788_v57  ;;  %v2057_v45 = vpack.c.bf16 %v9169_v18, %v9163_v58  ;;  %v2348_v10 = vmul.f32 1.442695, %v2324_v7 }
 0x3e7   : > { %2364 = vadd.xlane.f32.xlu0 %v7458_v25  ;;  %v2303_v51 = vpop.xlane.xlu1 %2302  ;;  %v2305_v41 = vpop.xlane.xlu0 %2304 }
 0x3e8   : > { %7471 = vpow2.f32 %v2346_v21  ;;  %v2325_v59 = vsub.f32 %v9068_v48, %v2303_v51  ;;  %v2326_v8 = vsub.f32 %v9066_v28, %v2305_v41  ;;  %6858 = vmatmul.mubr.bf16.gmra.mxu1 %v2057_v45  ;;  %v7260_v21 = vld [vmem:[%s8415_s21 + $0x44] ss:$8 sps:$4 sm:$0xff]   ;;  %v7258_v45 = vld [vmem:[%s8415_s21 + $0x40] ss:$8 sps:$4 sm:$0xff]   ;;  %v7269_v41 = vld [vmem:[%s8415_s21 + $0x14] ss:$8 sps:$4 sm:$0xff]  }
 0x3e9   : > { %v7460_v31 = vpop.eup %7459  ;;  %6906 = vmatpush3.bf16.msra.mxu1 %v1788_v57  ;;  %7473 = vpow2.f32 %v2348_v10  ;;  %v7257_v57 = vld [vmem:[%s8415_s21 + $0x54] ss:$8 sps:$4 sm:$0xff]   ;;  %v7261_v10 = vld [vmem:[%s8415_s21 + $0x30] ss:$8 sps:$4 sm:$0xff]   ;;  %v7264_v51 = vld [vmem:[%s8415_s21 + $0x20] ss:$8 sps:$4 sm:$0xff]  }
 0x3ea   : > { %v2350_v22 = vmul.f32 1.442695, %v2325_v59  ;;  %6907 = vmatprep.subr.bf16.mxu1 %v1782_v34  ;;  %2366 = vadd.xlane.f32.xlu1 %v7460_v31  ;;  %v2396_v50 = vpack.c.bf16 %v7460_v31, %v7458_v25  ;;  %v2352_v44 = vmul.f32 1.442695, %v2326_v8  ;;  %v7462_v53 = vpop.eup %7461  ;;  %v7275_v59 = vld [vmem:[%s8415_s21 + $0xf4] ss:$8 sps:$4 sm:$0xff]  }
 0x3eb   : > { %2018 = vadd.xlane.f32.xlu0 %v9096_v63  ;;  %v2307_v55 = vpop.xlane.xlu1 %2306  ;;  %v2309_v1 = vpop.xlane.xlu0 %2308  ;;  %v7276_v8 = vld [vmem:[%s8415_s21 + $0xe0] ss:$8 sps:$4 sm:$0xff]   ;;  %v7279_v31 = vld [vmem:[%s8415_s21 + $0xd0] ss:$8 sps:$4 sm:$0xff]  }
 0x3ec   : > { %7475 = vpow2.f32 %v2350_v22  ;;  %v2327_v6 = vsub.f32 %v9072_v0, %v2307_v55  ;;  %v2328_v30 = vsub.f32 %v9074_v23, %v2309_v1  ;;  %6909 = vmatprep.mubr.bf16.mxu1 %v2396_v50  ;;  %v7282_v22 = vld [vmem:[%s8415_s21 + $0xc0] ss:$8 sps:$4 sm:$0xff]   ;;  %v7287_v50 = vld [vmem:[%s8415_s21 + $0xb4] ss:$8 sps:$4 sm:$0xff]   ;;  %v7290_v55 = vld [vmem:[%s8415_s21 + $0xa4] ss:$8 sps:$4 sm:$0xff]  }
 0x3ed   : > { %v7464_v28 = vpop.eup %7463  ;;  %6908 = vmatpush3.bf16.msra.mxu1 %v1782_v34  ;;  %7477 = vpow2.f32 %v2352_v44  ;;  %v7270_v34 = vld [vmem:[%s8415_s21] ss:$8 sps:$4 sm:$0xff]   ;;  %v7285_v44 = vld [vmem:[%s8415_s21 + $0xb0] ss:$8 sps:$4 sm:$0xff]   ;;  %v7293_v1 = vld [vmem:[%s8415_s21 + $0x94] ss:$8 sps:$4 sm:$0xff]  }
 0x3ee   : > { %v2354_v48 = vmul.f32 1.442695, %v2327_v6  ;;  %2020 = vadd.xlane.f32.xlu1 %v9100_v37  ;;  %v2397_v36 = vpack.c.bf16 %v7464_v28, %v7462_v53  ;;  %v2356_v11 = vmul.f32 1.442695, %v2328_v30  ;;  %v7466_v62 = vpop.eup %7465  ;;  %v7294_v6 = vld [vmem:[%s8415_s21 + $0x80] ss:$8 sps:$4 sm:$0xff]  }
 0x3ef   : > { %2368 = vadd.xlane.f32.xlu0 %v7462_v53  ;;  %v2311_v26 = vpop.xlane.xlu1 %2310  ;;  %v2313_v63 = vpop.xlane.xlu0 %2312  ;;  %v7291_v53 = vld [vmem:[%s8415_s21 + $0x90] ss:$8 sps:$4 sm:$0xff]  }
 0x3f0   : > { %7479 = vpow2.f32 %v2354_v48  ;;  %v2329_v61 = vsub.f32 %v9080_v16, %v2311_v26  ;;  %v2330_v0 = vsub.f32 %v9078_v13, %v2313_v63  ;;  %6910 = vmatmul.mubr.bf16.vlgmr.msra.gmra.mxu1 %v2397_v36 }
 0x3f1   : > { %v7468_v23 = vpop.eup %7467  ;;  %7481 = vpow2.f32 %v2356_v11 }
 0x3f2   : > { %v2358_v40 = vmul.f32 1.442695, %v2329_v61  ;;  %2370 = vadd.xlane.f32.xlu1 %v7464_v28  ;;  %v2398_v20 = vpack.c.bf16 %v7468_v23, %v7466_v62  ;;  %v2360_v35 = vmul.f32 1.442695, %v2330_v0  ;;  %v7470_v15 = vpop.eup %7469 }
 0x3f3   : > { %2022 = vadd.xlane.f32.xlu0 %v9104_v42  ;;  %v2315_v37 = vpop.xlane.xlu1 %2314 }
 0x3f4   : > { %7483 = vpow2.f32 %v2358_v40  ;;  %v2331_v9 = vsub.f32 %v9084_v24, %v2315_v37  ;;  %6913 = vmatprep.mubr.bf16.mxu1 %v2398_v20  ;;  %v7251_v24 = vld [vmem:[%s8415_s21 + $0x74] ss:$8 sps:$4 sm:$0xff]  }
 0x3f5   : > { %v7472_v12 = vpop.eup %7471  ;;  %7485 = vpow2.f32 %v2360_v35  ;;  %2741 = vmatprep.subr.bf16.mxu0 %v7251_v24 }
 0x3f6   : > { %v2362_v16 = vmul.f32 1.442695, %v2331_v9  ;;  %2024 = vadd.xlane.f32.xlu1 %v9108_v29  ;;  %v2399_v13 = vpack.c.bf16 %v7472_v12, %v7470_v15  ;;  %v7474_v56 = vpop.eup %7473  ;;  %2742 = vmatpush1.bf16.msra.mxu0 %v7249_v46 }
 0x3f7   : > { %2372 = vadd.xlane.f32.xlu0 %v7466_v62  ;;  %2743 = vmatprep.subr.bf16.mxu0 %v7254_v39 }
 0x3f8   : > { %7487 = vpow2.f32 %v2362_v16  ;;  %6914 = vmatmul.mubr.bf16.gmra.mxu1 %v2399_v13 }
 0x3f9   : > { %v7476_v42 = vpop.eup %7475 }
 0x3fa   : > { %2374 = vadd.xlane.f32.xlu1 %v7468_v23  ;;  %v2400_v19 = vpack.c.bf16 %v7476_v42, %v7474_v56  ;;  %v7478_v52 = vpop.eup %7477  ;;  %2744 = vmatpush1.bf16.msra.mxu0 %v7252_v17 }
 0x3fb   : > { %2026 = vadd.xlane.f32.xlu0 %v9112_v47  ;;  %2745 = vmatprep.subr.bf16.mxu0 %v7257_v57 }
 0x3fc   : > { %6917 = vmatprep.mubr.bf16.mxu1 %v2400_v19 }
 0x3fd   : > { %v7480_v60 = vpop.eup %7479 }
 0x3fe   : > { %2028 = vadd.xlane.f32.xlu1 %v9118_v33  ;;  %v2401_v29 = vpack.c.bf16 %v7480_v60, %v7478_v52  ;;  %v7482_v43 = vpop.eup %7481  ;;  %v7255_v33 = vld [vmem:[%s8415_s21 + $0x50] ss:$8 sps:$4 sm:$0xff]  }
 0x3ff   : > { %2376 = vadd.xlane.f32.xlu0 %v7470_v15  ;;  %2746 = vmatpush1.bf16.msra.mxu0 %v7255_v33 }
 0x400   : > { %6918 = vmatmul.mubr.bf16.gmra.mxu1 %v2401_v29  ;;  %2747 = vmatprep.subr.bf16.mxu0 %v7260_v21 }
 0x401   : > { %v7484_v2 = vpop.eup %7483 }
 0x402   : > { %2378 = vadd.xlane.f32.xlu1 %v7472_v12  ;;  %v2402_v47 = vpack.c.bf16 %v7484_v2, %v7482_v43  ;;  %v7486_v14 = vpop.eup %7485 }
 0x403   : > { %2030 = vadd.xlane.f32.xlu0 %v9123_v32  ;;  %2748 = vmatpush1.bf16.msra.mxu0 %v7258_v45  ;;  %v7263_v32 = vld [vmem:[%s8415_s21 + $0x34] ss:$8 sps:$4 sm:$0xff]  }
 0x404   : > { %6921 = vmatprep.mubr.bf16.mxu1 %v2402_v47  ;;  %2749 = vmatprep.subr.bf16.mxu0 %v7263_v32 }
 0x405   : > { %v7488_v7 = vpop.eup %7487 }
 0x406   : > { %2032 = vadd.xlane.f32.xlu1 %v9129_v54  ;;  %v2403_v25 = vpack.c.bf16 %v7488_v7, %v7486_v14  ;;  %v7266_v54 = vld [vmem:[%s8415_s21 + $0x24] ss:$8 sps:$4 sm:$0xff]  }
 0x407   : > { %2380 = vadd.xlane.f32.xlu0 %v7474_v56  ;;  %2750 = vmatpush1.bf16.msra.mxu0 %v7261_v10 }
 0x408   : > { %6922 = vmatmul.mubr.bf16.gmra.mxu1 %v2403_v25  ;;  %2751 = vmatprep.subr.bf16.mxu0 %v7266_v54 }
 0x40a   : > { %2382 = vadd.xlane.f32.xlu1 %v7476_v42 }
 0x40b   : > { %2034 = vadd.xlane.f32.xlu0 %v9133_v3  ;;  %2752 = vmatpush1.bf16.msra.mxu0 %v7264_v51  ;;  %v7267_v3 = vld [vmem:[%s8415_s21 + $0x10] ss:$8 sps:$4 sm:$0xff]  }
 0x40c   : > { %2753 = vmatprep.subr.bf16.mxu0 %v7269_v41 }
 0x40e   : > { %2036 = vadd.xlane.f32.xlu1 %v9139_v38  ;;  %v7272_v38 = vld [vmem:[%s8415_s21 + $0x4] ss:$8 sps:$4 sm:$0xff]  }
 0x40f   : > { %2384 = vadd.xlane.f32.xlu0 %v7478_v52  ;;  %2754 = vmatpush1.bf16.msra.mxu0 %v7267_v3 }
 0x410   : > { %2755 = vmatprep.subr.bf16.mxu0 %v7272_v38 }
 0x412   : > { %2386 = vadd.xlane.f32.xlu1 %v7480_v60 }
 0x413   : > { %2038 = vadd.xlane.f32.xlu0 %v9143_v49  ;;  %2756 = vmatpush1.bf16.msra.mxu0 %v7270_v34  ;;  %v7273_v49 = vld [vmem:[%s8415_s21 + $0xf0] ss:$8 sps:$4 sm:$0xff]  }
 0x414   : > { %2757 = vmatprep.subr.bf16.mxu0 %v7275_v59 }
 0x416   : > { %2040 = vadd.xlane.f32.xlu1 %v9149_v27  ;;  %v7278_v27 = vld [vmem:[%s8415_s21 + $0xe4] ss:$8 sps:$4 sm:$0xff]  }
 0x417   : > { %2388 = vadd.xlane.f32.xlu0 %v7482_v43  ;;  %2758 = vmatpush2.bf16.msra.mxu0 %v7273_v49 }
 0x418   : > { %2759 = vmatprep.subr.bf16.mxu0 %v7278_v27 }
 0x41a   : > { %2390 = vadd.xlane.f32.xlu1 %v7484_v2 }
 0x41b   : > { %2042 = vadd.xlane.f32.xlu0 %v9153_v4  ;;  %2760 = vmatpush2.bf16.msra.mxu0 %v7276_v8  ;;  %v7281_v4 = vld [vmem:[%s8415_s21 + $0xd4] ss:$8 sps:$4 sm:$0xff]  }
 0x41c   : > { %2761 = vmatprep.subr.bf16.mxu0 %v7281_v4 }
 0x41e   : > { %2044 = vadd.xlane.f32.xlu1 %v9159_v5  ;;  %v7284_v5 = vld [vmem:[%s8415_s21 + $0xc4] ss:$8 sps:$4 sm:$0xff]  }
 0x41f   : > { %2392 = vadd.xlane.f32.xlu0 %v7486_v14  ;;  %2762 = vmatpush2.bf16.msra.mxu0 %v7279_v31 }
 0x420   : > { %2763 = vmatprep.subr.bf16.mxu0 %v7284_v5 }
 0x422   : > { %2394 = vadd.xlane.f32.xlu1 %v7488_v7 }
 0x423   : > { %2046 = vadd.xlane.f32.xlu0 %v9163_v58  ;;  %2764 = vmatpush2.bf16.msra.mxu0 %v7282_v22  ;;  %v7288_v58 = vld [vmem:[%s8415_s21 + $0xa0] ss:$8 sps:$4 sm:$0xff]  }
 0x424   : > { %2765 = vmatprep.subr.bf16.mxu0 %v7287_v50 }
 0x426   : > { %2048 = vadd.xlane.f32.xlu1 %v9169_v18  ;;  %v7296_v18 = vld [vmem:[%s8415_s21 + $0x84] ss:$8 sps:$4 sm:$0xff]  }
 0x427   : > { %2766 = vmatpush2.bf16.msra.mxu0 %v7285_v44 }
 0x428   : > { %2767 = vmatprep.subr.bf16.mxu0 %v7290_v55 }
 0x42b   : > { %2768 = vmatpush2.bf16.msra.mxu0 %v7288_v58 }
 0x42c   : > { %2769 = vmatprep.subr.bf16.mxu0 %v7293_v1 }
 0x42f   : > { %2770 = vmatpush2.bf16.msra.mxu0 %v7291_v53 }
 0x430   : > { %2771 = vmatprep.subr.bf16.mxu0 %v7296_v18 }
 0x433   : > { %2772 = vmatpush2.bf16.msra.mxu0 %v7294_v6 }
 0x470   : > { %v2365_v30 = vpop.xlane.xlu0 %2364 }
 0x471   : > { %7489 = vrcp.f32 %v2365_v30 }
 0x473   : > { %v2367_v28 = vpop.xlane.xlu1 %2366 }
 0x474   : > { %v2019_v48 = vpop.xlane.xlu0 %2018  ;;  %7491 = vrcp.f32 %v2367_v28 }
 0x477   : > { %v2021_v36 = vpop.xlane.xlu1 %2020 }
 0x478   : > { %v2369_v11 = vpop.xlane.xlu0 %2368  ;;  %7493 = vrcp.f32 %v2021_v36 }
 0x47b   : > { %v2371_v26 = vpop.xlane.xlu1 %2370 }
 0x47c   : > { %v2023_v63 = vpop.xlane.xlu0 %2022  ;;  %7495 = vrcp.f32 %v2371_v26 }
 0x47d   : > { %7497 = vrcp.f32 %v2019_v48 }
 0x47e   : > { %7499 = vrcp.f32 %v2369_v11  ;;  %v7490_v27 = vpop.eup %7489 }
 0x47f   : > { %v2025_v62 = vpop.xlane.xlu1 %2024 }
 0x480   : > { %v2373_v61 = vpop.xlane.xlu0 %2372 }
 0x481   : > { %v7492_v8 = vpop.eup %7491 }
 0x483   : > { %v2375_v0 = vpop.xlane.xlu1 %2374 }
 0x484   : > { %v9230_v23 = vpop.xlane.xlu0 %2026 }
 0x485   : > { %v7494_v31 = vpop.eup %7493 }
 0x487   : > { %v2029_v40 = vpop.xlane.xlu1 %2028 }
 0x488   : > { %v9232_v20 = vpop.xlane.xlu0 %2376 }
 0x489   : > { %v7496_v5 = vpop.eup %7495 }
 0x48a   : > { %v7498_v44 = vpop.eup %7497 }
 0x48b   : > { %v9234_v35 = vpop.xlane.xlu1 %2378  ;;  %v7500_v53 = vpop.eup %7499 }
 0x48c   : > { %v9236_v37 = vpop.xlane.xlu0 %2030 }
 0x48f   : > { %v9238_v15 = vpop.xlane.xlu1 %2032 }
 0x490   : > { %v9240_v9 = vpop.xlane.xlu0 %2380  ;;  %v9242_v12 = vpop.f32.mrf.mxu1 }
 0x492   : > { %v2092_v16 = vpop.f32.mrf.mxu1 }
 0x493   : > { %v9244_v13 = vpop.xlane.xlu1 %2382  ;;  %v2171_v18 = vmul.f32 %v7498_v44, %v2092_v16 }
 0x494   : > { %v9246_v56 = vpop.xlane.xlu0 %2034  ;;  %v9248_v42 = vpop.f32.mrf.mxu1 }
 0x496   : > { %v2095_v19 = vpop.f32.mrf.mxu1 }
 0x497   : > { %v9250_v24 = vpop.xlane.xlu1 %2036  ;;  %v2172_v22 = vmul.f32 %v7494_v31, %v2095_v19 }
 0x498   : > { %v9252_v52 = vpop.xlane.xlu0 %2384  ;;  %v9254_v46 = vpop.f32.mrf.mxu1 }
 0x499   : > { %v2533_v48 = vpack.c.bf16 %v2172_v22, %v2171_v18 }
 0x49a   : > { %v9256_v60 = vpop.f32.mrf.mxu1 }
 0x49b   : > { %v9258_v29 = vpop.xlane.xlu1 %2386 }
 0x49c   : > { %v9260_v39 = vpop.xlane.xlu0 %2038  ;;  %v9262_v43 = vpop.f32.mrf.mxu1 }
 0x49e   : > { %v9264_v17 = vpop.f32.mrf.mxu1 }
 0x49f   : > { %v9266_v2 = vpop.xlane.xlu1 %2040 }
 0x4a0   : > { %v9268_v47 = vpop.xlane.xlu0 %2388  ;;  %v9270_v57 = vpop.f32.mrf.mxu1 }
 0x4a2   : > { %v9272_v14 = vpop.f32.mrf.mxu1 }
 0x4a3   : > { %v9274_v33 = vpop.xlane.xlu1 %2390 }
 0x4a4   : > { %v9276_v7 = vpop.xlane.xlu0 %2042  ;;  %v9278_v25 = vpop.f32.mrf.mxu1 }
 0x4a6   : > { %v9280_v21 = vpop.f32.mrf.mxu1 }
 0x4a7   : > { %v9282_v45 = vpop.xlane.xlu1 %2044 }
 0x4a8   : > { %v9284_v32 = vpop.xlane.xlu0 %2392  ;;  %v6859_v10 = vpop.f32.mrf.mxu1 }
 0x4aa   : > { %v9286_v54 = vpop.f32.mrf.mxu1 }
 0x4ab   : > { %v9288_v51 = vpop.xlane.xlu1 %2394 }
 0x4ac   : > { %v2047_v41 = vpop.xlane.xlu0 %2046  ;;  %v6860_v3 = vpop.f32.mrf.mxu1 }
 0x4ad   : > { %7501 = vrcp.f32 %v2047_v41 }
 0x4ae   : > { %v9290_v38 = vpop.f32.mrf.mxu1  ;;  %7503 = vrcp.f32 %v2025_v62 }
 0x4af   : > { %v2049_v34 = vpop.xlane.xlu1 %2048 }
 0x4b0   : > { %7505 = vrcp.f32 %v2049_v34  ;;  %v6911_v59 = vpop.f32.mrf.mxu1 }
 0x4b1   : > { %7507 = vrcp.f32 %v2375_v0  ;;  %v2519_v30 = vmul.f32 %v7500_v53, %v6911_v59 }
 0x4b2   : > { %7509 = vrcp.f32 %v2023_v63  ;;  %v2438_v49 = vpop.f32.mrf.mxu1 }
 0x4b3   : > { %7511 = vrcp.f32 %v2373_v61  ;;  %v2517_v55 = vmul.f32 %v7490_v27, %v2438_v49 }
 0x4b4   : > { %v6912_v4 = vpop.f32.mrf.mxu1  ;;  %7513 = vrcp.f32 %v2029_v40 }
 0x4b5   : > { %v2520_v58 = vmul.f32 %v7496_v5, %v6912_v4  ;;  %7515 = vrcp.f32 %v9234_v35 }
 0x4b6   : > { %v2441_v50 = vpop.f32.mrf.mxu1  ;;  %7517 = vrcp.f32 %v9230_v23 }
 0x4b7   : > { %v2518_v1 = vmul.f32 %v7492_v8, %v2441_v50  ;;  %7519 = vrcp.f32 %v9232_v20  ;;  %v2536_v26 = vpack.c.bf16 %v2520_v58, %v2519_v30 }
 0x4b8   : > { %v6915_v6 = vpop.f32.mrf.mxu1  ;;  %7521 = vrcp.f32 %v9238_v15 }
 0x4b9   : > { %v2534_v28 = vpack.c.bf16 %v2518_v1, %v2517_v55  ;;  %7523 = vrcp.f32 %v9236_v37 }
 0x4ba   : > { %v2454_v36 = vpop.f32.mrf.mxu1  ;;  %v7502_v11 = vpop.eup %7501  ;;  %7525 = vrcp.f32 %v9244_v13 }
 0x4bb   : > { %2773 = vmatprep.mubr.bf16.mxu0 %v2534_v28  ;;  %v7504_v63 = vpop.eup %7503  ;;  %v9297_v16 = vmul.f32 %v7502_v11, %v6859_v10  ;;  %7527 = vrcp.f32 %v9240_v9 }
 0x4bc   : > { %v6916_v62 = vpop.f32.mrf.mxu1  ;;  %2774 = vmatmul.mubr.bf16.vlgmr.msra.gmra.mxu0 %v2533_v48  ;;  %v2174_v40 = vmul.f32 %v7504_v63, %v9248_v42  ;;  %7529 = vrcp.f32 %v9250_v24 }
 0x4bd   : > { %v7506_v61 = vpop.eup %7505  ;;  %2783 = vmatprep.mubr.bf16.mxu0 %v2536_v26  ;;  %7531 = vrcp.f32 %v9246_v56 }
 0x4be   : > { %v7508_v0 = vpop.eup %7507  ;;  %v2457_v35 = vpop.f32.mrf.mxu1  ;;  %v9299_v23 = vmul.f32 %v7506_v61, %v6860_v3  ;;  %7533 = vrcp.f32 %v9258_v29 }
 0x4bf   : > { %v7510_v19 = vpop.eup %7509  ;;  %v2522_v41 = vmul.f32 %v7508_v0, %v2457_v35  ;;  %7535 = vrcp.f32 %v9252_v52 }
 0x4c0   : > { %v7512_v20 = vpop.eup %7511  ;;  %v2173_v34 = vmul.f32 %v7510_v19, %v9242_v12  ;;  %v6919_v59 = vpop.f32.mrf.mxu1  ;;  %v2547_v49 = vpack.c.bf16 %v9299_v23, %v9297_v16  ;;  %7537 = vrcp.f32 %v9266_v2  ;;  %v3150_v23 = vld [vmem:[%s8420_s22 + $0x160] sm:$0xff] }
 0x4c1   : > { %v2521_v15 = vmul.f32 %v7512_v20, %v2454_v36  ;;  %v7514_v27 = vpop.eup %7513  ;;  %7539 = vrcp.f32 %v9260_v39 }
 0x4c2   : > { %v2535_v42 = vpack.c.bf16 %v2174_v40, %v2173_v34  ;;  %v2470_v3 = vpop.f32.mrf.mxu1  ;;  %v7516_v8 = vpop.eup %7515  ;;  %v2176_v37 = vmul.f32 %v7514_v27, %v9264_v17  ;;  %7541 = vrcp.f32 %v9274_v33  ;;  %v3167_v27 = vld [vmem:[%s8420_s22 + $0x1e8] sm:$0xff] }
 0x4c3   : > { %v2538_v10 = vpack.c.bf16 %v2522_v41, %v2521_v15  ;;  %v7518_v12 = vpop.eup %7517  ;;  %v2524_v4 = vmul.f32 %v7516_v8, %v6916_v62  ;;  %7543 = vrcp.f32 %v9268_v47  ;;  %v3154_v8 = vld [vmem:[%s8420_s22 + $0x180] sm:$0xff] }
 0x4c4   : > { %2784 = vmatmul.mubr.bf16.gmra.mxu0 %v2535_v42  ;;  %v7520_v31 = vpop.eup %7519  ;;  %v2175_v13 = vmul.f32 %v7518_v12, %v9256_v60  ;;  %v6920_v5 = vpop.f32.mrf.mxu1  ;;  %7545 = vrcp.f32 %v9282_v45  ;;  %v3162_v42 = vld [vmem:[%s8420_s22 + $0x1c0] sm:$0xff] }
 0x4c5   : > { %2793 = vmatprep.mubr.bf16.mxu0 %v2538_v10  ;;  %v2523_v9 = vmul.f32 %v7520_v31, %v6915_v6  ;;  %v7522_v50 = vpop.eup %7521  ;;  %7547 = vrcp.f32 %v9276_v7  ;;  %v3163_v10 = vld [vmem:[%s8420_s22 + $0x1c8] sm:$0xff] }
 0x4c6   : > { %v2537_v22 = vpack.c.bf16 %v2176_v37, %v2175_v13  ;;  %v2473_v55 = vpop.f32.mrf.mxu1  ;;  %v7524_v24 = vpop.eup %7523  ;;  %v2178_v58 = vmul.f32 %v7522_v50, %v9262_v43  ;;  %7549 = vrcp.f32 %v9288_v51  ;;  %v3158_v37 = vld [vmem:[%s8420_s22 + $0x1a0] sm:$0xff]  ;;  %v6492_v12 = vcombine.low %v3163_v10, %v3167_v27  ;;  %v3155_v13 = vld [vmem:[%s8420_s22 + $0x188] sm:$0xff] }
 0x4c7   : > { %v2540_v44 = vpack.c.bf16 %v2524_v4, %v2523_v9  ;;  %v7526_v17 = vpop.eup %7525  ;;  %v2177_v1 = vmul.f32 %v7524_v24, %v9254_v46  ;;  %7551 = vrcp.f32 %v9284_v32  ;;  %v6493_v4 = vcombine.high %v3163_v10, %v3167_v27  ;;  %v3146_v9 = vld [vmem:[%s8420_s22 + $0x140] sm:$0xff] }
 0x4c8   : > { %v2526_v56 = vmul.f32 %v7526_v17, %v2473_v55  ;;  %v7528_v60 = vpop.eup %7527  ;;  %v6923_v29 = vpop.f32.mrf.mxu1  ;;  %v6483_v31 = vcombine.high %v3154_v8, %v3158_v37  ;;  %v6482_v50 = vcombine.low %v3154_v8, %v3158_v37  ;;  %v6475_v55 = vcombine.high %v3146_v9, %v3150_v23  ;;  %v3138_v17 = vld [vmem:[%s8420_s22 + $0x100] sm:$0xff] }
 0x4c9   : > { %v2525_v52 = vmul.f32 %v7528_v60, %v2470_v3  ;;  %v2539_v53 = vpack.c.bf16 %v2178_v58, %v2177_v1  ;;  %v7530_v18 = vpop.eup %7529  ;;  %3987 = vmatprep.subr.bf16.mxu0 %v6493_v4  ;;  %v3142_v58 = vld [vmem:[%s8420_s22 + $0x120] sm:$0xff]  ;;  %v3143_v60 = vld [vmem:[%s8420_s22 + $0x128] sm:$0xff]  ;;  %v6474_v1 = vcombine.low %v3146_v9, %v3150_v23  ;;  %v7858_v4 = vld [vmem:[#allocation2 + $0xb0] sm:$0xff] }
 0x4ca   : > { %v2486_v30 = vpop.f32.mrf.mxu1  ;;  %v7532_v43 = vpop.eup %7531  ;;  %v2180_v28 = vmul.f32 %v7530_v18, %v9280_v21  ;;  %3988 = vmatpush1.bf16.msra.mxu0 %v6492_v12  ;;  %v3130_v18 = vld [vmem:[%s8420_s22 + $0xc0] sm:$0xff]  ;;  %v7860_v23 = vld [vmem:[#allocation2 + $0xd8] sm:$0xff] }
 0x4cb   : > { %v2542_v6 = vpack.c.bf16 %v2526_v56, %v2525_v52  ;;  %v7534_v2 = vpop.eup %7533  ;;  %v2179_v48 = vmul.f32 %v7532_v43, %v9272_v14  ;;  %v3139_v56 = vld [vmem:[%s8420_s22 + $0x108] sm:$0xff]  ;;  %v6467_v52 = vcombine.high %v3138_v17, %v3142_v58 }
 0x4cc   : > { %2794 = vmatmul.mubr.bf16.gmra.mxu0 %v2537_v22  ;;  %v2528_v46 = vmul.f32 %v7534_v2, %v6920_v5  ;;  %v7536_v39 = vpop.eup %7535  ;;  %v6924_v33 = vpop.f32.mrf.mxu1  ;;  %v3159_v5 = vld [vmem:[%s8420_s22 + $0x1a8] sm:$0xff]  ;;  %v6466_v2 = vcombine.low %v3138_v17, %v3142_v58 }
 0x4cd   : > { %2803 = vmatprep.mubr.bf16.mxu0 %v2540_v44  ;;  %v2527_v47 = vmul.f32 %v7536_v39, %v6919_v59  ;;  %v2541_v36 = vpack.c.bf16 %v2180_v28, %v2179_v48  ;;  %v7538_v11 = vpop.eup %7537  ;;  %v6485_v16 = vcombine.high %v3155_v13, %v3159_v5  ;;  %v3151_v22 = vld [vmem:[%s8420_s22 + $0x168] sm:$0xff]  ;;  %v6484_v44 = vcombine.low %v3155_v13, %v3159_v5  ;;  %v3122_v48 = vld [vmem:[%s8420_s22 + $0x80] sm:$0xff] }
 0x4ce   : > { %v2489_v63 = vpop.f32.mrf.mxu1  ;;  %v7540_v21 = vpop.eup %7539  ;;  %v2182_v62 = vmul.f32 %v7538_v11, %v9278_v25  ;;  %v3135_v43 = vld [vmem:[%s8420_s22 + $0xe8] sm:$0xff]  ;;  %v6468_v28 = vcombine.low %v3139_v56, %v3143_v60  ;;  %v7859_v5 = vld [vmem:[#allocation2] sm:$0xff] }
 0x4cf   : > { %v2544_v26 = vpack.c.bf16 %v2528_v46, %v2527_v47  ;;  %v7542_v45 = vpop.eup %7541  ;;  %v2181_v7 = vmul.f32 %v7540_v21, %v9270_v57  ;;  %3989 = vmatprep.subr.bf16.mxu0 %v6485_v16  ;;  %v3123_v47 = vld [vmem:[%s8420_s22 + $0x88] sm:$0xff] }
 0x4d0   : > { %v2530_v61 = vmul.f32 %v7542_v45, %v2489_v63  ;;  %v7544_v14 = vpop.eup %7543  ;;  %3990 = vmatpush1.bf16.msra.mxu0 %v6484_v44  ;;  %v3114_v45 = vld [vmem:[%s8420_s22 + $0x40] sm:$0xff] }
 0x4d1   : > { %v2529_v0 = vmul.f32 %v7544_v14, %v2486_v30  ;;  %v2543_v40 = vpack.c.bf16 %v2182_v62, %v2181_v7  ;;  %v7546_v51 = vpop.eup %7545  ;;  %v3131_v30 = vld [vmem:[%s8420_s22 + $0xc8] sm:$0xff]  ;;  %v3118_v62 = vld [vmem:[%s8420_s22 + $0x60] sm:$0xff] }
 0x4d2   : > { %v7548_v32 = vpop.eup %7547  ;;  %v2184_v41 = vmul.f32 %v7546_v51, %v9290_v38  ;;  %v3166_v38 = vld [vmem:[%s8420_s22 + $0x1e0] sm:$0xff]  ;;  %v6461_v39 = vcombine.high %v3131_v30, %v3135_v43  ;;  %v3119_v14 = vld [vmem:[%s8420_s22 + $0x68] sm:$0xff] }
 0x4d3   : > { %v2546_v35 = vpack.c.bf16 %v2530_v61, %v2529_v0  ;;  %v7550_v19 = vpop.eup %7549  ;;  %v2183_v57 = vmul.f32 %v7548_v32, %v9286_v54  ;;  %v6490_v3 = vcombine.low %v3162_v42, %v3166_v38  ;;  %v6491_v54 = vcombine.high %v3162_v42, %v3166_v38  ;;  %v3115_v61 = vld [vmem:[%s8420_s22 + $0x48] sm:$0xff]  ;;  %v3110_v32 = vld [vmem:[%s8420_s22 + $0x20] sm:$0xff] }
 0x4d4   : > { %2804 = vmatmul.mubr.bf16.gmra.mxu0 %v2539_v53  ;;  %v2532_v25 = vmul.f32 %v7550_v19, %v6924_v33  ;;  %v7552_v20 = vpop.eup %7551  ;;  %v6469_v53 = vcombine.high %v3139_v56, %v3143_v60  ;;  %v3126_v33 = vld [vmem:[%s8420_s22 + $0xa0] sm:$0xff]  ;;  %v6445_v51 = vcombine.high %v3115_v61, %v3119_v14  ;;  %v3107_v19 = vld [vmem:[%s8420_s22 + $0x8] sm:$0xff]  ;;  %v7862_v56 = vld [vmem:[#allocation2 + $0x50] sm:$0xff] }
 0x4d5   : > { %2813 = vmatprep.mubr.bf16.mxu0 %v2542_v6  ;;  %v2531_v34 = vmul.f32 %v7552_v20, %v6923_v29  ;;  %v2545_v59 = vpack.c.bf16 %v2184_v41, %v2183_v57  ;;  %3874 = vmatprep.subr.bf16.mxu1 %v6491_v54  ;;  %v3134_v6 = vld [vmem:[%s8420_s22 + $0xe0] sm:$0xff]  ;;  %v6451_v63 = vcombine.high %v3122_v48, %v3126_v33  ;;  %v3111_v41 = vld [vmem:[%s8420_s22 + $0x28] sm:$0xff] }
 0x4d6   : > { %3875 = vmatpush1.bf16.msra.mxu1 %v6490_v3  ;;  %v6459_v46 = vcombine.high %v3130_v18, %v3134_v6  ;;  %v6458_v11 = vcombine.low %v3130_v18, %v3134_v6  ;;  %v6450_v7 = vcombine.low %v3122_v48, %v3126_v33  ;;  %v6444_v20 = vcombine.low %v3115_v61, %v3119_v14  ;;  %v3227_v42 = vld [vmem:[%s8420_s22 + $0x3c8] sm:$0xff]  ;;  %v3222_v61 = vld [vmem:[%s8420_s22 + $0x3a0] sm:$0xff] }
 0x4d7   : > { %v2548_v15 = vpack.c.bf16 %v2532_v25, %v2531_v34  ;;  %3876 = vmatprep.subr.bf16.mxu1 %v6483_v31  ;;  %v6442_v25 = vcombine.low %v3114_v45, %v3118_v62  ;;  %v6437_v34 = vcombine.high %v3107_v19, %v3111_v41  ;;  %v3231_v38 = vld [vmem:[%s8420_s22 + $0x3e8] sm:$0xff]  ;;  %v6436_v3 = vcombine.low %v3107_v19, %v3111_v41 }
 0x4d8   : > { %v6557_v27 = vcombine.high %v3227_v42, %v3231_v38  ;;  %v6556_v37 = vcombine.low %v3227_v42, %v3231_v38  ;;  %v7865_v48 = vld [vmem:[#allocation2 + $0x48] sm:$0xff]  ;;  %v3210_v42 = vld [vmem:[%s8420_s22 + $0x340] sm:$0xff] }
 0x4d9   : > { %v3219_v14 = vld [vmem:[%s8420_s22 + $0x388] sm:$0xff]  ;;  %v3214_v38 = vld [vmem:[%s8420_s22 + $0x360] sm:$0xff] }
 0x4da   : > { %3877 = vmatpush1.bf16.msra.mxu1 %v6482_v50 }
 0x4db   : > { %3878 = vmatprep.subr.bf16.mxu1 %v6475_v55  ;;  %v7861_v55 = vld [vmem:[#allocation2 + $0x18] sm:$0xff] }
 0x4dc   : > { %2814 = vmatmul.mubr.bf16.gmra.mxu0 %v2541_v36  ;;  %v3127_v36 = vld [vmem:[%s8420_s22 + $0xa8] sm:$0xff] }
 0x4dd   : > { %2823 = vmatprep.mubr.bf16.mxu0 %v2544_v26  ;;  %v6460_v26 = vcombine.low %v3131_v30, %v3135_v43  ;;  %v6453_v21 = vcombine.high %v3123_v47, %v3127_v36  ;;  %v6452_v0 = vcombine.low %v3123_v47, %v3127_v36  ;;  %v7864_v43 = vld [vmem:[#allocation2 + $0x30] sm:$0xff] }
 0x4de   : > { %3879 = vmatpush1.bf16.msra.mxu1 %v6474_v1 }
 0x4df   : > { %3880 = vmatprep.subr.bf16.mxu1 %v6467_v52 }
 0x4e2   : > { %3881 = vmatpush1.bf16.msra.mxu1 %v6466_v2 }
 0x4e3   : > { %3882 = vmatprep.subr.bf16.mxu1 %v6459_v46 }
 0x4e4   : > { %2824 = vmatmul.mubr.bf16.gmra.mxu0 %v2543_v40  ;;  %v6443_v40 = vcombine.high %v3114_v45, %v3118_v62  ;;  %v3218_v62 = vld [vmem:[%s8420_s22 + $0x380] sm:$0xff] }
 0x4e5   : > { %2833 = vmatprep.mubr.bf16.mxu0 %v2546_v35  ;;  %v3106_v35 = vld [vmem:[%s8420_s22] sm:$0xff]  ;;  %v6546_v19 = vcombine.low %v3218_v62, %v3222_v61 }
 0x4e6   : > { %3883 = vmatpush1.bf16.msra.mxu1 %v6458_v11  ;;  %v6435_v57 = vcombine.high %v3106_v35, %v3110_v32  ;;  %v6434_v10 = vcombine.low %v3106_v35, %v3110_v32  ;;  %v7866_v11 = vld [vmem:[#allocation2 + $0x80] sm:$0xff]  ;;  %v3223_v35 = vld [vmem:[%s8420_s22 + $0x3a8] sm:$0xff] }
 0x4e7   : > { %3884 = vmatprep.subr.bf16.mxu1 %v6451_v63  ;;  %v6548_v41 = vcombine.low %v3219_v14, %v3223_v35 }
 0x4ea   : > { %3885 = vmatpush1.bf16.msra.mxu1 %v6450_v7  ;;  %v7867_v7 = vld [vmem:[#allocation2 + $0x88] sm:$0xff] }
 0x4eb   : > { %3886 = vmatprep.subr.bf16.mxu1 %v6443_v40 }
 0x4ec   : > { %2834 = vmatmul.mubr.bf16.gmra.mxu0 %v2545_v59  ;;  %v3226_v59 = vld [vmem:[%s8420_s22 + $0x3c0] sm:$0xff] }
 0x4ed   : > { %2843 = vmatprep.mubr.bf16.mxu0 %v2548_v15  ;;  %v3230_v15 = vld [vmem:[%s8420_s22 + $0x3e0] sm:$0xff] }
 0x4ee   : > { %3887 = vmatpush1.bf16.msra.mxu1 %v6442_v25  ;;  %v6555_v54 = vcombine.high %v3226_v59, %v3230_v15  ;;  %v6554_v8 = vcombine.low %v3226_v59, %v3230_v15  ;;  %v6549_v25 = vcombine.high %v3219_v14, %v3223_v35 }
 0x4ef   : > { %3888 = vmatprep.subr.bf16.mxu1 %v6435_v57 }
 0x4f2   : > { %3889 = vmatpush1.bf16.msra.mxu1 %v6434_v10  ;;  %v3211_v10 = vld [vmem:[%s8420_s22 + $0x348] sm:$0xff] }
 0x4f3   : > { %3890 = vmatprep.subr.bf16.mxu1 %v6555_v54 }
 0x4f4   : > { %2844 = vmatmul.mubr.bf16.gmra.mxu0 %v2547_v49  ;;  %v3147_v49 = vld [vmem:[%s8420_s22 + $0x148] sm:$0xff] }
 0x4f5   : > { %v6477_v24 = vcombine.high %v3147_v49, %v3151_v22  ;;  %v6476_v29 = vcombine.low %v3147_v49, %v3151_v22 }
 0x4f6   : > { %3891 = vmatpush2.bf16.msra.mxu1 %v6554_v8  ;;  %v6539_v8 = vcombine.high %v3210_v42, %v3214_v38 }
 0x4f7   : > { %3991 = vmatprep.subr.bf16.mxu0 %v6477_v24 }
 0x4f8   : > { %3992 = vmatpush1.bf16.msra.mxu0 %v6476_v29 }
 0x4f9   : > { %3993 = vmatprep.subr.bf16.mxu0 %v6469_v53  ;;  %v7863_v53 = vld [vmem:[#allocation2 + $0x68] sm:$0xff] }
 0x4fc   : > { %3994 = vmatpush1.bf16.msra.mxu0 %v6468_v28 }
 0x4fd   : > { %3995 = vmatprep.subr.bf16.mxu0 %v6461_v39 }
 0x500   : > { %3996 = vmatpush1.bf16.msra.mxu0 %v6460_v26 }
 0x501   : > { %3997 = vmatprep.subr.bf16.mxu0 %v6453_v21 }
 0x504   : > { %3998 = vmatpush1.bf16.msra.mxu0 %v6452_v0 }
 0x505   : > { %3999 = vmatprep.subr.bf16.mxu0 %v6445_v51  ;;  %v6547_v51 = vcombine.high %v3218_v62, %v3222_v61 }
 0x507   : > { %3892 = vmatprep.subr.bf16.mxu1 %v6547_v51 }
 0x508   : > { %4000 = vmatpush1.bf16.msra.mxu0 %v6444_v20  ;;  %v7868_v20 = vld [vmem:[#allocation2 + $0xe8] sm:$0xff]  ;;  %3893 = vmatpush2.bf16.msra.mxu1 %v6546_v19  ;;  %v7874_v19 = vld [vmem:[#allocation2 + $0x38] sm:$0xff] }
 0x509   : > { %4001 = vmatprep.subr.bf16.mxu0 %v6437_v34  ;;  %3894 = vmatprep.subr.bf16.mxu1 %v6539_v8  ;;  %v3191_v8 = vld [vmem:[%s8420_s22 + $0x2a8] sm:$0xff] }
 0x50c   : > { %4002 = vmatpush1.bf16.msra.mxu0 %v6436_v3  ;;  %v7869_v3 = vld [vmem:[#allocation2 + $0xb8] sm:$0xff] }
 0x50d   : > { %4003 = vmatprep.subr.bf16.mxu0 %v6557_v27 }
 0x510   : > { %4004 = vmatpush2.bf16.msra.mxu0 %v6556_v37  ;;  %v3215_v37 = vld [vmem:[%s8420_s22 + $0x368] sm:$0xff] }
 0x511   : > { %4005 = vmatprep.subr.bf16.mxu0 %v6549_v25 }
 0x514   : > { %4006 = vmatpush2.bf16.msra.mxu0 %v6548_v41 }
 0x57c   : > { %v2775_v12 = vpop.f32.mrf.mxu0 }
 0x57d   : > { %v9368_v31 = vadd.f32 %v7858_v4, %v2775_v12  ;;  %v6538_v4 = vcombine.low %v3210_v42, %v3214_v38  ;;  %v3187_v42 = vld [vmem:[%s8420_s22 + $0x288] sm:$0xff]  ;;  %v7875_v38 = vld [vmem:[#allocation2 + $0x58] sm:$0xff] }
 0x57e   : > { %v2777_v13 = vpop.f32.mrf.mxu0 }
 0x57f   : > { %10902 = vst [vmem:[#allocation25_spill] sm:$0xff] %v9368_v31  ;;  %v9370_v9 = vadd.f32 %v7859_v5, %v2777_v13  ;;  %v2887_v22 = vmul.f32 %v9368_v31, %v9368_v31  ;;  %v6540_v13 = vcombine.low %v3211_v10, %v3215_v37  ;;  %v6541_v5 = vcombine.high %v3211_v10, %v3215_v37 }
 0x580   : > { %v2779_v16 = vpop.f32.mrf.mxu0  ;;  %3895 = vmatpush2.bf16.msra.mxu1 %v6538_v4  ;;  %v6516_v4 = vcombine.low %v3187_v42, %v3191_v8 }
 0x581   : > { %10903 = vst [vmem:[#allocation26_spill] sm:$0xff] %v9370_v9  ;;  %v9372_v49 = vadd.f32 %v7860_v23, %v2779_v16  ;;  %v2888_v50 = vmul.f32 %v9370_v9, %v9370_v9  ;;  %v7870_v16 = vld [vmem:[#allocation2 + $0x60] sm:$0xff]  ;;  %4007 = vmatprep.subr.bf16.mxu0 %v6541_v5 }
 0x582   : > { %v2781_v44 = vpop.f32.mrf.mxu0  ;;  %4008 = vmatpush2.bf16.msra.mxu0 %v6540_v13  ;;  %v6517_v13 = vcombine.high %v3187_v42, %v3191_v8  ;;  %v7876_v5 = vld [vmem:[#allocation2 + $0x40] sm:$0xff]  ;;  %v9493_v8 = vld [vmem:[%s8420_s22 + $0x1d8] sm:$0xff] }
 0x583   : > { %10904 = vst [vmem:[#allocation27_spill] sm:$0xff] %v9372_v49  ;;  %v9378_v24 = vadd.f32 %v7861_v55, %v2781_v44  ;;  %v2919_v17 = vadd.f32 %v2888_v50, %v2887_v22  ;;  %v2889_v1 = vmul.f32 %v9372_v49, %v9372_v49  ;;  %v3202_v55 = vld [vmem:[%s8420_s22 + $0x300] sm:$0xff] }
 0x584   : > { %v2785_v58 = vpop.f32.mrf.mxu0 }
 0x585   : > { %10905 = vst [vmem:[#allocation28_spill] sm:$0xff] %v9378_v24  ;;  %v9380_v60 = vadd.f32 %v7862_v56, %v2785_v58  ;;  %2920 = vadd.xlane.f32.xlu0 %v2919_v17  ;;  %v2890_v29 = vmul.f32 %v9378_v24, %v9378_v24  ;;  %v3206_v17 = vld [vmem:[%s8420_s22 + $0x320] sm:$0xff]  ;;  %v3203_v58 = vld [vmem:[%s8420_s22 + $0x308] sm:$0xff]  ;;  %v7871_v56 = vld [vmem:[#allocation2 + $0xf0] sm:$0xff] }
 0x586   : > { %v2787_v52 = vpop.f32.mrf.mxu0 }
 0x587   : > { %10906 = vst [vmem:[#allocation29_spill] sm:$0xff] %v9380_v60  ;;  %v9386_v18 = vadd.f32 %v7863_v53, %v2787_v52  ;;  %v2922_v6 = vadd.f32 %v2890_v29, %v2889_v1  ;;  %v2891_v28 = vmul.f32 %v9380_v60, %v9380_v60  ;;  %v6531_v52 = vcombine.high %v3202_v55, %v3206_v17  ;;  %v3207_v53 = vld [vmem:[%s8420_s22 + $0x328] sm:$0xff] }
 0x588   : > { %v2789_v30 = vpop.f32.mrf.mxu0 }
 0x589   : > { %10907 = vst [vmem:[#allocation30_spill] sm:$0xff] %v9386_v18  ;;  %v9388_v2 = vadd.f32 %v7864_v43, %v2789_v30  ;;  %2923 = vadd.xlane.f32.xlu1 %v2922_v6  ;;  %v2892_v46 = vmul.f32 %v9386_v18, %v9386_v18  ;;  %v6530_v30 = vcombine.low %v3202_v55, %v3206_v17  ;;  %v3178_v55 = vld [vmem:[%s8420_s22 + $0x240] sm:$0xff] }
 0x58a   : > { %v2791_v39 = vpop.f32.mrf.mxu0  ;;  %v6532_v43 = vcombine.low %v3203_v58, %v3207_v53  ;;  %3896 = vmatprep.subr.bf16.mxu1 %v6531_v52  ;;  %v3182_v17 = vld [vmem:[%s8420_s22 + $0x260] sm:$0xff] }
 0x58b   : > { %10908 = vst [vmem:[#allocation31_spill] sm:$0xff] %v9388_v2  ;;  %v9394_v33 = vadd.f32 %v7865_v48, %v2791_v39  ;;  %v2925_v47 = vadd.f32 %v2892_v46, %v2891_v28  ;;  %v2893_v63 = vmul.f32 %v9388_v2, %v9388_v2  ;;  %v6533_v28 = vcombine.high %v3203_v58, %v3207_v53  ;;  %v7872_v46 = vld [vmem:[#allocation2 + $0x8] sm:$0xff] }
 0x58c   : > { %v2795_v36 = vpop.f32.mrf.mxu0  ;;  %3897 = vmatpush2.bf16.msra.mxu1 %v6530_v30  ;;  %v3179_v58 = vld [vmem:[%s8420_s22 + $0x248] sm:$0xff]  ;;  %v6507_v53 = vcombine.high %v3178_v55, %v3182_v17 }
 0x58d   : > { %10909 = vst [vmem:[#allocation32_spill] sm:$0xff] %v9394_v33  ;;  %v9396_v26 = vadd.f32 %v7866_v11, %v2795_v36  ;;  %2926 = vadd.xlane.f32.xlu0 %v2925_v47  ;;  %v2894_v21 = vmul.f32 %v9394_v33, %v9394_v33  ;;  %4009 = vmatprep.subr.bf16.mxu0 %v6533_v28  ;;  %v3194_v11 = vld [vmem:[%s8420_s22 + $0x2c0] sm:$0xff] }
 0x58e   : > { %v2797_v45 = vpop.f32.mrf.mxu0  ;;  %4010 = vmatpush2.bf16.msra.mxu0 %v6532_v43  ;;  %v6506_v43 = vcombine.low %v3178_v55, %v3182_v17  ;;  %v7882_v17 = vld [vmem:[#allocation2 + $0xa8] sm:$0xff] }
 0x58f   : > { %10910 = vst [vmem:[#allocation33_spill] sm:$0xff] %v9396_v26  ;;  %v9405_v0 = vadd.f32 %v7867_v7, %v2797_v45  ;;  %v2928_v40 = vadd.f32 %v2894_v21, %v2893_v63  ;;  %v2895_v34 = vmul.f32 %v9396_v26, %v9396_v26  ;;  %v3198_v63 = vld [vmem:[%s8420_s22 + $0x2e0] sm:$0xff]  ;;  %v3195_v21 = vld [vmem:[%s8420_s22 + $0x2c8] sm:$0xff]  ;;  %v7873_v45 = vld [vmem:[#allocation2 + $0x78] sm:$0xff] }
 0x590   : > { %v2799_v32 = vpop.f32.mrf.mxu0  ;;  %v6523_v14 = vcombine.high %v3194_v11, %v3198_v63  ;;  %v3199_v7 = vld [vmem:[%s8420_s22 + $0x2e8] sm:$0xff]  ;;  %v6522_v51 = vcombine.low %v3194_v11, %v3198_v63 }
 0x591   : > { %10911 = vst [vmem:[#allocation34_spill] sm:$0xff] %v9405_v0  ;;  %v9408_v57 = vadd.f32 %v7868_v20, %v2799_v32  ;;  %2929 = vadd.xlane.f32.xlu1 %v2928_v40  ;;  %v2896_v59 = vmul.f32 %v9405_v0, %v9405_v0  ;;  %v6524_v35 = vcombine.low %v3195_v21, %v3199_v7 }
 0x592   : > { %v2801_v15 = vpop.f32.mrf.mxu0  ;;  %v6525_v32 = vcombine.high %v3195_v21, %v3199_v7  ;;  %3898 = vmatprep.subr.bf16.mxu1 %v6523_v14  ;;  %v3170_v21 = vld [vmem:[%s8420_s22 + $0x200] sm:$0xff]  ;;  %v7879_v14 = vld [vmem:[#allocation2 + $0x90] sm:$0xff] }
 0x593   : > { %10912 = vst [vmem:[#allocation35_spill] sm:$0xff] %v9408_v57  ;;  %v9417_v54 = vadd.f32 %v7869_v3, %v2801_v15  ;;  %v2931_v27 = vadd.f32 %v2896_v59, %v2895_v34  ;;  %v2897_v22 = vmul.f32 %v9408_v57, %v9408_v57  ;;  %3899 = vmatpush2.bf16.msra.mxu1 %v6522_v51  ;;  %v3186_v59 = vld [vmem:[%s8420_s22 + $0x280] sm:$0xff] }
 0x594   : > { %v2805_v12 = vpop.f32.mrf.mxu0  ;;  %4011 = vmatprep.subr.bf16.mxu0 %v6525_v32  ;;  %v3190_v15 = vld [vmem:[%s8420_s22 + $0x2a0] sm:$0xff] }
 0x595   : > { %10913 = vst [vmem:[#allocation36_spill] sm:$0xff] %v9417_v54  ;;  %v9420_v23 = vadd.f32 %v7870_v16, %v2805_v12  ;;  %2932 = vadd.xlane.f32.xlu0 %v2931_v27  ;;  %v2898_v50 = vmul.f32 %v9417_v54, %v9417_v54  ;;  %4012 = vmatpush2.bf16.msra.mxu0 %v6524_v35  ;;  %v3175_v35 = vld [vmem:[%s8420_s22 + $0x228] sm:$0xff] }
 0x596   : > { %v2807_v44 = vpop.f32.mrf.mxu0  ;;  %v6515_v27 = vcombine.high %v3186_v59, %v3190_v15  ;;  %v6514_v12 = vcombine.low %v3186_v59, %v3190_v15  ;;  %4013 = vmatprep.subr.bf16.mxu0 %v6517_v13 }
 0x597   : > { %10914 = vst [vmem:[#allocation37_spill] sm:$0xff] %v9420_v23  ;;  %v9429_v1 = vadd.f32 %v7871_v56, %v2807_v44  ;;  %v2934_v29 = vadd.f32 %v2898_v50, %v2897_v22  ;;  %v2899_v48 = vmul.f32 %v9420_v23, %v9420_v23  ;;  %v7877_v56 = vld [vmem:[#allocation2 + $0xc8] sm:$0xff] }
 0x598   : > { %v2809_v6 = vpop.f32.mrf.mxu0  ;;  %3900 = vmatprep.subr.bf16.mxu1 %v6515_v27  ;;  %v9490_v27 = vld [vmem:[%s8420_s22 + $0x1f0] sm:$0xff] }
 0x599   : > { %10915 = vst [vmem:[#allocation38_spill] sm:$0xff] %v9429_v1  ;;  %v9432_v39 = vadd.f32 %v7872_v46, %v2809_v6  ;;  %2935 = vadd.xlane.f32.xlu1 %v2934_v29  ;;  %v2900_v47 = vmul.f32 %v9429_v1, %v9429_v1  ;;  %3901 = vmatpush2.bf16.msra.mxu1 %v6514_v12  ;;  %v3183_v6 = vld [vmem:[%s8420_s22 + $0x268] sm:$0xff] }
 0x59a   : > { %v2811_v36 = vpop.f32.mrf.mxu0  ;;  %4014 = vmatpush2.bf16.msra.mxu0 %v6516_v4  ;;  %v6508_v28 = vcombine.low %v3179_v58, %v3183_v6  ;;  %v6509_v46 = vcombine.high %v3179_v58, %v3183_v6  ;;  %3902 = vmatprep.subr.bf16.mxu1 %v6507_v53  ;;  %v7883_v6 = vld [vmem:[#allocation2 + $0xd0] sm:$0xff] }
 0x59b   : > { %10916 = vst [vmem:[#allocation39_spill] sm:$0xff] %v9432_v39  ;;  %v9441_v62 = vadd.f32 %v7873_v45, %v2811_v36  ;;  %v2937_v61 = vadd.f32 %v2900_v47, %v2899_v48  ;;  %v2901_v25 = vmul.f32 %v9432_v39, %v9432_v39  ;;  %v7878_v48 = vld [vmem:[#allocation2 + $0xe0] sm:$0xff] }
 0x59c   : > { %v2815_v40 = vpop.f32.mrf.mxu0  ;;  %4015 = vmatprep.subr.bf16.mxu0 %v6509_v46  ;;  %v3174_v45 = vld [vmem:[%s8420_s22 + $0x220] sm:$0xff]  ;;  %v7884_v46 = vld [vmem:[#allocation2 + $0x10] sm:$0xff] }
 0x59d   : > { %10917 = vst [vmem:[#allocation40_spill] sm:$0xff] %v9441_v62  ;;  %v9444_v41 = vadd.f32 %v7874_v19, %v2815_v40  ;;  %2938 = vadd.xlane.f32.xlu0 %v2937_v61  ;;  %v2902_v20 = vmul.f32 %v9441_v62, %v9441_v62  ;;  %3903 = vmatpush2.bf16.msra.mxu1 %v6506_v43  ;;  %v3171_v61 = vld [vmem:[%s8420_s22 + $0x208] sm:$0xff] }
 0x59e   : > { %v2817_v34 = vpop.f32.mrf.mxu0  ;;  %4016 = vmatpush2.bf16.msra.mxu0 %v6508_v28  ;;  %v6499_v51 = vcombine.high %v3170_v21, %v3174_v45  ;;  %v6498_v19 = vcombine.low %v3170_v21, %v3174_v45  ;;  %v7885_v21 = vld [vmem:[#allocation2 + $0x28] sm:$0xff] }
 0x59f   : > { %10918 = vst [vmem:[#allocation41_spill] sm:$0xff] %v9444_v41  ;;  %v9453_v10 = vadd.f32 %v7875_v38, %v2817_v34  ;;  %v2940_v3 = vadd.f32 %v2902_v20, %v2901_v25  ;;  %v2903_v22 = vmul.f32 %v9444_v41, %v9444_v41  ;;  %v6500_v25 = vcombine.low %v3171_v61, %v3175_v35  ;;  %v7880_v34 = vld [vmem:[#allocation2 + $0x70] sm:$0xff] }
 0x5a0   : > { %v2819_v37 = vpop.f32.mrf.mxu0  ;;  %v6501_v20 = vcombine.high %v3171_v61, %v3175_v35  ;;  %3904 = vmatprep.subr.bf16.mxu1 %v6499_v51 }
 0x5a1   : > { %10919 = vst [vmem:[#allocation42_spill] sm:$0xff] %v9453_v10  ;;  %v9456_v16 = vadd.f32 %v7876_v5, %v2819_v37  ;;  %2941 = vadd.xlane.f32.xlu1 %v2940_v3  ;;  %v2904_v50 = vmul.f32 %v9453_v10, %v9453_v10  ;;  %3905 = vmatpush2.bf16.msra.mxu1 %v6498_v19  ;;  %v9487_v3 = vld [vmem:[%s8420_s22 + $0x1d0] sm:$0xff]  ;;  %v7881_v37 = vld [vmem:[#allocation2 + $0xc0] sm:$0xff]  ;;  %v9500_v5 = vld [vmem:[%s8420_s22 + $0x1f8] sm:$0xff] }
 0x5a2   : > { %v2821_v44 = vpop.f32.mrf.mxu0  ;;  %4017 = vmatprep.subr.bf16.mxu0 %v6501_v20  ;;  %v6495_v13 = vcombine.high %v9487_v3, %v9490_v27  ;;  %v6497_v55 = vcombine.high %v9493_v8, %v9500_v5 }
 0x5a3   : > { %10920 = vst [vmem:[#allocation43_spill] sm:$0xff] %v9456_v16  ;;  %v9465_v29 = vadd.f32 %v7877_v56, %v2821_v44  ;;  %v2943_v52 = vadd.f32 %v2904_v50, %v2903_v22  ;;  %v2905_v36 = vmul.f32 %v9456_v16, %v9456_v16  ;;  %4018 = vmatpush2.bf16.msra.mxu0 %v6500_v25  ;;  %v7887_v25 = vld [vmem:[#allocation2 + $0xf8] sm:$0xff] }
 0x5a4   : > { %v2825_v30 = vpop.f32.mrf.mxu0  ;;  %v6494_v50 = vcombine.low %v9487_v3, %v9490_v27  ;;  %v6496_v44 = vcombine.low %v9493_v8, %v9500_v5  ;;  %4100 = vmatprep.subr.bf16.mxu1 %v6495_v13  ;;  %4213 = vmatprep.subr.bf16.mxu0 %v6497_v55  ;;  %v3140_v27 = vld [vmem:[%s8420_s22 + $0x110] sm:$0xff] }
 0x5a5   : > { %10921 = vst [vmem:[#allocation44_spill] sm:$0xff] %v9465_v29  ;;  %v9468_v47 = vadd.f32 %v7878_v48, %v2825_v30  ;;  %2944 = vadd.xlane.f32.xlu0 %v2943_v52  ;;  %v2906_v11 = vmul.f32 %v9465_v29, %v9465_v29 }
 0x5a6   : > { %v2827_v63 = vpop.f32.mrf.mxu0 }
 0x5a7   : > { %10922 = vst [vmem:[#allocation45_spill] sm:$0xff] %v9468_v47  ;;  %v9477_v7 = vadd.f32 %v7879_v14, %v2827_v63  ;;  %v2946_v40 = vadd.f32 %v2906_v11, %v2905_v36  ;;  %v2907_v15 = vmul.f32 %v9468_v47, %v9468_v47 }
 0x5a8   : > { %v2829_v32 = vpop.f32.mrf.mxu0 }
 0x5a9   : > { %10923 = vst [vmem:[#allocation46_spill] sm:$0xff] %v9477_v7  ;;  %v9480_v59 = vadd.f32 %v7880_v34, %v2829_v32  ;;  %2947 = vadd.xlane.f32.xlu1 %v2946_v40  ;;  %v2908_v42 = vmul.f32 %v9477_v7, %v9477_v7  ;;  %v7886_v40 = vld [vmem:[#allocation2 + $0xa0] sm:$0xff] }
 0x5aa   : > { %v2831_v38 = vpop.f32.mrf.mxu0 }
 0x5ab   : > { %10924 = vst [vmem:[#allocation47_spill] sm:$0xff] %v9480_v59  ;;  %v9495_v12 = vadd.f32 %v7881_v37, %v2831_v38  ;;  %v2949_v4 = vadd.f32 %v2908_v42, %v2907_v15  ;;  %v2909_v56 = vmul.f32 %v9480_v59, %v9480_v59  ;;  %v7888_v42 = vld [vmem:[#allocation2 + $0x20] sm:$0xff] }
 0x5ac   : > { %v2835_v22 = vpop.f32.mrf.mxu0 }
 0x5ad   : > { %10925 = vst [vmem:[#allocation48_spill] sm:$0xff] %v9495_v12  ;;  %v9508_v58 = vadd.f32 %v7882_v17, %v2835_v22  ;;  %2950 = vadd.xlane.f32.xlu0 %v2949_v4  ;;  %v2910_v52 = vmul.f32 %v9495_v12, %v9495_v12  ;;  %v7889_v22 = vld [vmem:[#allocation2 + $0x98] sm:$0xff] }
 0x5ae   : > { %v2837_v53 = vpop.f32.mrf.mxu0 }
 0x5af   : > { %10926 = vst [vmem:[#allocation49_spill] sm:$0xff] %v9508_v58  ;;  %v9514_v30 = vadd.f32 %v7883_v6, %v2837_v53  ;;  %v2952_v43 = vadd.f32 %v2910_v52, %v2909_v56  ;;  %v2911_v36 = vmul.f32 %v9508_v58, %v9508_v58 }
 0x5b0   : > { %v2839_v28 = vpop.f32.mrf.mxu0 }
 0x5b1   : > { %10927 = vst [vmem:[#allocation50_spill] sm:$0xff] %v9514_v30  ;;  %v9516_v48 = vadd.f32 %v7884_v46, %v2839_v28  ;;  %2953 = vadd.xlane.f32.xlu1 %v2952_v43  ;;  %v2912_v11 = vmul.f32 %v9514_v30, %v9514_v30 }
 0x5b2   : > { %v2841_v63 = vpop.f32.mrf.mxu0 }
 0x5b3   : > { %10928 = vst [vmem:[#allocation51_spill] sm:$0xff] %v9516_v48  ;;  %v9522_v45 = vadd.f32 %v7885_v21, %v2841_v63  ;;  %v2955_v61 = vadd.f32 %v2912_v11, %v2911_v36  ;;  %v2913_v35 = vmul.f32 %v9516_v48, %v9516_v48 }
 0x5b4   : > { %v2845_v14 = vpop.f32.mrf.mxu0 }
 0x5b5   : > { %10929 = vst [vmem:[#allocation52_spill] sm:$0xff] %v9522_v45  ;;  %v9524_v51 = vadd.f32 %v7886_v40, %v2845_v14  ;;  %2956 = vadd.xlane.f32.xlu0 %v2955_v61  ;;  %v2914_v32 = vmul.f32 %v9522_v45, %v9522_v45 }
 0x5b6   : > { %v2847_v19 = vpop.f32.mrf.mxu0 }
 0x5b7   : > { %10930 = vst [vmem:[#allocation53_spill] sm:$0xff] %v9524_v51  ;;  %v9530_v20 = vadd.f32 %v7887_v25, %v2847_v19  ;;  %v2958_v34 = vadd.f32 %v2914_v32, %v2913_v35  ;;  %v2915_v37 = vmul.f32 %v9524_v51, %v9524_v51  ;;  %v2886_v19 = vld [vmem:[%s8410_s9] sm:$0x3]  ;;  %s11062_s9 = sld [smem:[#allocation107_spill]] (!%p6690_p1) }
 0x5b8   : > { %v2849_v15 = vpop.f32.mrf.mxu0 }
 0x5b9   : > { %10931 = vst [vmem:[#allocation54_spill] sm:$0xff] %v9530_v20  ;;  %v9532_v38 = vadd.f32 %v7888_v42, %v2849_v15  ;;  %2959 = vadd.xlane.f32.xlu1 %v2958_v34  ;;  %v2916_v4 = vmul.f32 %v9530_v20, %v9530_v20  ;;  %v10934_v42 = vld [vmem:[#allocation24_spill] sm:$0xff] }
 0x5ba   : > { %v2851_v13 = vpop.f32.mrf.mxu0 }
 0x5bb   : > { %10932 = vst [vmem:[#allocation55_spill] sm:$0xff] %v9532_v38  ;;  %v9538_v55 = vadd.f32 %v7889_v22, %v2851_v13  ;;  %v2961_v17 = vadd.f32 %v2916_v4, %v2915_v37  ;;  %v2917_v56 = vmul.f32 %v9532_v38, %v9532_v38  ;;  %v9546_v37 = vrot.slane %v2886_v19, %v10934_v42 }
 0x5bd   : > { %10933 = vst [vmem:[#allocation56_spill] sm:$0xff] %v9538_v55  ;;  %2962 = vadd.xlane.f32.xlu0 %v2961_v17  ;;  %v2918_v52 = vmul.f32 %v9538_v55, %v9538_v55  ;;  %v10935_v17 = vld [vmem:[#allocation23_spill] sm:$0xff] }
 0x5bf   : > { %v2964_v53 = vadd.f32 %v2918_v52, %v2917_v56  ;;  %v9551_v56 = vrot.slane %v2886_v19, %v10935_v17 }
 0x5c1   : > { %2965 = vadd.xlane.f32.xlu1 %v2964_v53 }
 0x60e   : > { %v2921_v6 = vpop.xlane.xlu0 %2920 }
 0x60f   : > { %v2967_v43 = vmul.f32 0.00390625, %v2921_v6 }
 0x611   : > { %v2983_v28 = vadd.f32 1e-06, %v2967_v43 }
 0x612   : > { %v2924_v46 = vpop.xlane.xlu1 %2923 }
 0x613   : > { %7553 = vrsqrt.f32 %v2983_v28  ;;  %v2968_v36 = vmul.f32 0.00390625, %v2924_v46 }
 0x615   : > { %v2984_v11 = vadd.f32 1e-06, %v2968_v36 }
 0x616   : > { %v2927_v63 = vpop.xlane.xlu0 %2926 }
 0x617   : > { %7555 = vrsqrt.f32 %v2984_v11  ;;  %v2969_v21 = vmul.f32 0.00390625, %v2927_v63  ;;  %v3156_v63 = vld [vmem:[%s8420_s22 + $0x190] sm:$0xff] }
 0x619   : > { %v2985_v61 = vadd.f32 1e-06, %v2969_v21 }
 0x61a   : > { %v2930_v14 = vpop.xlane.xlu1 %2929 }
 0x61b   : > { %7557 = vrsqrt.f32 %v2985_v61  ;;  %v2970_v40 = vmul.f32 0.00390625, %v2930_v14 }
 0x61d   : > { %v2986_v35 = vadd.f32 1e-06, %v2970_v40  ;;  %v3160_v40 = vld [vmem:[%s8420_s22 + $0x1b0] sm:$0xff] }
 0x61e   : > { %v2933_v32 = vpop.xlane.xlu0 %2932 }
 0x61f   : > { %7559 = vrsqrt.f32 %v2986_v35  ;;  %v2971_v25 = vmul.f32 0.00390625, %v2933_v32  ;;  %v3157_v35 = vld [vmem:[%s8420_s22 + $0x198] sm:$0xff] }
 0x620   : > { %v7554_v34 = vpop.eup %7553  ;;  %v3161_v32 = vld [vmem:[%s8420_s22 + $0x1b8] sm:$0xff] }
 0x621   : > { %v2987_v15 = vadd.f32 1e-06, %v2971_v25  ;;  %v3015_v4 = vmul.f32 %v7554_v34, %v9368_v31  ;;  %v3016_v22 = vmul.f32 %v7554_v34, %v9370_v9 }
 0x622   : > { %v2936_v13 = vpop.xlane.xlu1 %2935 }
 0x623   : > { %7561 = vrsqrt.f32 %v2987_v15  ;;  %v2972_v52 = vmul.f32 0.00390625, %v2936_v13  ;;  %v3059_v36 = vmul.f32 %v9551_v56, %v3016_v22  ;;  %v3058_v11 = vmul.f32 %v9546_v37, %v3015_v4 }
 0x624   : > { %v7556_v53 = vpop.eup %7555  ;;  %v6487_v4 = vcombine.high %v3156_v63, %v3160_v40  ;;  %v6489_v13 = vcombine.high %v3157_v35, %v3161_v32 }
 0x625   : > { %v3017_v6 = vmul.f32 %v7556_v53, %v9372_v49  ;;  %v2988_v43 = vadd.f32 1e-06, %v2972_v52  ;;  %v3018_v28 = vmul.f32 %v7556_v53, %v9378_v24  ;;  %v3148_v52 = vld [vmem:[%s8420_s22 + $0x150] sm:$0xff] }
 0x626   : > { %v2939_v46 = vpop.xlane.xlu0 %2938  ;;  %v3152_v53 = vld [vmem:[%s8420_s22 + $0x170] sm:$0xff] }
 0x627   : > { %7563 = vrsqrt.f32 %v2988_v43  ;;  %v2973_v21 = vmul.f32 0.00390625, %v2939_v46  ;;  %v3061_v61 = vmul.f32 %v9551_v56, %v3018_v28  ;;  %v3060_v14 = vmul.f32 %v9546_v37, %v3017_v6  ;;  %v3149_v43 = vld [vmem:[%s8420_s22 + $0x158] sm:$0xff] }
 0x628   : > { %v7558_v19 = vpop.eup %7557  ;;  %v3153_v28 = vld [vmem:[%s8420_s22 + $0x178] sm:$0xff] }
 0x629   : > { %v2989_v25 = vadd.f32 1e-06, %v2973_v21  ;;  %v9563_v34 = vpack.c.bf16 %v3061_v61, %v3059_v36  ;;  %v9565_v15 = vpack.c.bf16 %v3060_v14, %v3058_v11  ;;  %v3020_v22 = vmul.f32 %v7558_v19, %v9386_v18 }
 0x62a   : > { %v2942_v42 = vpop.xlane.xlu1 %2941  ;;  %v3019_v17 = vmul.f32 %v7558_v19, %v9380_v60  ;;  %v6486_v36 = vcombine.low %v3156_v63, %v3160_v40  ;;  %v6488_v11 = vcombine.low %v3157_v35, %v3161_v32  ;;  %v6479_v19 = vcombine.high %v3148_v52, %v3152_v53  ;;  %v3141_v35 = vld [vmem:[%s8420_s22 + $0x118] sm:$0xff] }
 0x62b   : > { %7565 = vrsqrt.f32 %v2989_v25  ;;  %v2974_v6 = vmul.f32 0.00390625, %v2942_v42  ;;  %3906 = vmatprep.mubr.bf16.mxu1 %v9563_v34  ;;  %4019 = vmatprep.mubr.bf16.mxu0 %v9563_v34  ;;  %v3063_v63 = vmul.f32 %v9551_v56, %v3020_v22  ;;  %v6481_v3 = vcombine.high %v3149_v43, %v3153_v28  ;;  %v3145_v32 = vld [vmem:[%s8420_s22 + $0x138] sm:$0xff] }
 0x62c   : > { %v7560_v46 = vpop.eup %7559  ;;  %3907 = vmatmul.mubr.bf16.vlgmr.msra.gmra.mxu1 %v9565_v15  ;;  %4020 = vmatmul.mubr.bf16.vlgmr.msra.gmra.mxu0 %v9565_v15  ;;  %v3062_v40 = vmul.f32 %v9546_v37, %v3019_v17 }
 0x62d   : > { %v2990_v21 = vadd.f32 1e-06, %v2974_v6  ;;  %4101 = vmatpush1.bf16.msra.mxu1 %v6494_v50  ;;  %4214 = vmatpush1.bf16.msra.mxu0 %v6496_v44  ;;  %v3022_v61 = vmul.f32 %v7560_v46, %v9394_v33  ;;  %v3021_v14 = vmul.f32 %v7560_v46, %v9388_v2  ;;  %v3144_v50 = vld [vmem:[%s8420_s22 + $0x130] sm:$0xff] }
 0x62e   : > { %v2945_v25 = vpop.xlane.xlu0 %2944  ;;  %4102 = vmatprep.subr.bf16.mxu1 %v6487_v4  ;;  %4215 = vmatprep.subr.bf16.mxu0 %v6489_v13  ;;  %v6478_v4 = vcombine.low %v3148_v52, %v3152_v53  ;;  %v6480_v13 = vcombine.low %v3149_v43, %v3153_v28  ;;  %v6471_v46 = vcombine.high %v3140_v27, %v3144_v50  ;;  %v3132_v52 = vld [vmem:[%s8420_s22 + $0xd0] sm:$0xff]  ;;  %v3133_v28 = vld [vmem:[%s8420_s22 + $0xd8] sm:$0xff] }
 0x62f   : > { %7567 = vrsqrt.f32 %v2990_v21  ;;  %v2975_v8 = vmul.f32 0.00390625, %v2945_v25  ;;  %v3065_v5 = vmul.f32 %v9551_v56, %v3022_v61  ;;  %v3064_v44 = vmul.f32 %v9546_v37, %v3021_v14  ;;  %v3136_v53 = vld [vmem:[%s8420_s22 + $0xf0] sm:$0xff] }
 0x630   : > { %v7562_v42 = vpop.eup %7561  ;;  %v6473_v61 = vcombine.high %v3141_v35, %v3145_v32 }
 0x631   : > { %v2991_v6 = vadd.f32 1e-06, %v2975_v8  ;;  %4103 = vmatpush1.bf16.msra.mxu1 %v6486_v36  ;;  %4216 = vmatpush1.bf16.msra.mxu0 %v6488_v11  ;;  %v9593_v22 = vpack.c.bf16 %v3065_v5, %v3063_v63  ;;  %v9595_v17 = vpack.c.bf16 %v3064_v44, %v3062_v40  ;;  %v3024_v14 = vmul.f32 %v7562_v42, %v9405_v0  ;;  %v3137_v36 = vld [vmem:[%s8420_s22 + $0xf8] sm:$0xff] }
 0x632   : > { %v2948_v21 = vpop.xlane.xlu1 %2947  ;;  %4104 = vmatprep.subr.bf16.mxu1 %v6479_v19  ;;  %4217 = vmatprep.subr.bf16.mxu0 %v6481_v3  ;;  %v3023_v25 = vmul.f32 %v7562_v42, %v9396_v26  ;;  %v6470_v19 = vcombine.low %v3140_v27, %v3144_v50  ;;  %v6472_v63 = vcombine.low %v3141_v35, %v3145_v32  ;;  %v3124_v27 = vld [vmem:[%s8420_s22 + $0x90] sm:$0xff] }
 0x633   : > { %7569 = vrsqrt.f32 %v2991_v6  ;;  %v2976_v43 = vmul.f32 0.00390625, %v2948_v21  ;;  %3916 = vmatprep.mubr.bf16.mxu1 %v9593_v22  ;;  %4029 = vmatprep.mubr.bf16.mxu0 %v9593_v22  ;;  %v6463_v5 = vcombine.high %v3132_v52, %v3136_v53  ;;  %v3067_v42 = vmul.f32 %v9551_v56, %v3024_v14  ;;  %v3128_v50 = vld [vmem:[%s8420_s22 + $0xb0] sm:$0xff] }
 0x634   : > { %v7564_v11 = vpop.eup %7563  ;;  %3917 = vmatmul.mubr.bf16.gmra.mxu1 %v9595_v17  ;;  %4030 = vmatmul.mubr.bf16.gmra.mxu0 %v9595_v17  ;;  %v3066_v6 = vmul.f32 %v9546_v37, %v3023_v25  ;;  %v6465_v21 = vcombine.high %v3133_v28, %v3137_v36 }
 0x635   : > { %v2992_v40 = vadd.f32 1e-06, %v2976_v43  ;;  %4105 = vmatpush1.bf16.msra.mxu1 %v6478_v4  ;;  %4218 = vmatpush1.bf16.msra.mxu0 %v6480_v13  ;;  %v3026_v3 = vmul.f32 %v7564_v11, %v9417_v54  ;;  %v3025_v8 = vmul.f32 %v7564_v11, %v9408_v57  ;;  %v3125_v13 = vld [vmem:[%s8420_s22 + $0x98] sm:$0xff] }
 0x636   : > { %v2951_v44 = vpop.xlane.xlu0 %2950  ;;  %4106 = vmatprep.subr.bf16.mxu1 %v6471_v46  ;;  %4219 = vmatprep.subr.bf16.mxu0 %v6473_v61  ;;  %v3129_v43 = vld [vmem:[%s8420_s22 + $0xb8] sm:$0xff]  ;;  %v6462_v46 = vcombine.low %v3132_v52, %v3136_v53  ;;  %v6464_v61 = vcombine.low %v3133_v28, %v3137_v36  ;;  %v3116_v52 = vld [vmem:[%s8420_s22 + $0x50] sm:$0xff] }
 0x637   : > { %7571 = vrsqrt.f32 %v2992_v40  ;;  %v2977_v35 = vmul.f32 0.00390625, %v2951_v44  ;;  %v3069_v32 = vmul.f32 %v9551_v56, %v3026_v3  ;;  %v3068_v4 = vmul.f32 %v9546_v37, %v3025_v8  ;;  %v3120_v53 = vld [vmem:[%s8420_s22 + $0x70] sm:$0xff]  ;;  %v3117_v36 = vld [vmem:[%s8420_s22 + $0x58] sm:$0xff] }
 0x638   : > { %v7566_v11 = vpop.eup %7565  ;;  %v6455_v40 = vcombine.high %v3124_v27, %v3128_v50  ;;  %v6457_v8 = vcombine.high %v3125_v13, %v3129_v43 }
 0x639   : > { %v2993_v54 = vadd.f32 1e-06, %v2977_v35  ;;  %4107 = vmatpush1.bf16.msra.mxu1 %v6470_v19  ;;  %4220 = vmatpush1.bf16.msra.mxu0 %v6472_v63  ;;  %v9617_v14 = vpack.c.bf16 %v3069_v32, %v3067_v42  ;;  %v9619_v25 = vpack.c.bf16 %v3068_v4, %v3066_v6  ;;  %v3028_v44 = vmul.f32 %v7566_v11, %v9429_v1  ;;  %v3121_v19 = vld [vmem:[%s8420_s22 + $0x78] sm:$0xff] }
 0x63a   : > { %v2954_v3 = vpop.xlane.xlu1 %2953  ;;  %4108 = vmatprep.subr.bf16.mxu1 %v6463_v5  ;;  %4221 = vmatprep.subr.bf16.mxu0 %v6465_v21  ;;  %v3027_v57 = vmul.f32 %v7566_v11, %v9420_v23  ;;  %v6454_v5 = vcombine.low %v3124_v27, %v3128_v50  ;;  %v6456_v42 = vcombine.low %v3125_v13, %v3129_v43  ;;  %v3108_v27 = vld [vmem:[%s8420_s22 + $0x10] sm:$0xff] }
 0x63b   : > { %7573 = vrsqrt.f32 %v2993_v54  ;;  %v2978_v28 = vmul.f32 0.00390625, %v2954_v3  ;;  %3926 = vmatprep.mubr.bf16.mxu1 %v9617_v14  ;;  %4039 = vmatprep.mubr.bf16.mxu0 %v9617_v14  ;;  %v6447_v35 = vcombine.high %v3116_v52, %v3120_v53  ;;  %v3071_v4 = vmul.f32 %v9551_v56, %v3028_v44  ;;  %v3112_v50 = vld [vmem:[%s8420_s22 + $0x30] sm:$0xff] }
 0x63c   : > { %v7568_v63 = vpop.eup %7567  ;;  %3927 = vmatmul.mubr.bf16.gmra.mxu1 %v9619_v25  ;;  %4040 = vmatmul.mubr.bf16.gmra.mxu0 %v9619_v25  ;;  %v3070_v11 = vmul.f32 %v9546_v37, %v3027_v57  ;;  %v6449_v3 = vcombine.high %v3117_v36, %v3121_v19 }
 0x63d   : > { %v2994_v6 = vadd.f32 1e-06, %v2978_v28  ;;  %4109 = vmatpush1.bf16.msra.mxu1 %v6462_v46  ;;  %4222 = vmatpush1.bf16.msra.mxu0 %v6464_v61  ;;  %v3030_v54 = vmul.f32 %v7568_v63, %v9441_v62  ;;  %v3029_v21 = vmul.f32 %v7568_v63, %v9432_v39  ;;  %v3109_v61 = vld [vmem:[%s8420_s22 + $0x18] sm:$0xff] }
 0x63e   : > { %v2957_v32 = vpop.xlane.xlu0 %2956  ;;  %4110 = vmatprep.subr.bf16.mxu1 %v6455_v40  ;;  %4223 = vmatprep.subr.bf16.mxu0 %v6457_v8  ;;  %v3113_v28 = vld [vmem:[%s8420_s22 + $0x38] sm:$0xff]  ;;  %v6446_v40 = vcombine.low %v3116_v52, %v3120_v53  ;;  %v6448_v8 = vcombine.low %v3117_v36, %v3121_v19  ;;  %v3228_v52 = vld [vmem:[%s8420_s22 + $0x3d0] sm:$0xff] }
 0x63f   : > { %7575 = vrsqrt.f32 %v2994_v6  ;;  %v2979_v13 = vmul.f32 0.00390625, %v2957_v32  ;;  %v3073_v43 = vmul.f32 %v9551_v56, %v3030_v54  ;;  %v3072_v46 = vmul.f32 %v9546_v37, %v3029_v21  ;;  %v3232_v53 = vld [vmem:[%s8420_s22 + $0x3f0] sm:$0xff]  ;;  %v3229_v19 = vld [vmem:[%s8420_s22 + $0x3d8] sm:$0xff] }
 0x640   : > { %v7570_v63 = vpop.eup %7569  ;;  %v6439_v6 = vcombine.high %v3108_v27, %v3112_v50  ;;  %v6441_v21 = vcombine.high %v3109_v61, %v3113_v28 }
 0x641   : > { %v2995_v62 = vadd.f32 1e-06, %v2979_v13  ;;  %4111 = vmatpush1.bf16.msra.mxu1 %v6454_v5  ;;  %4224 = vmatpush1.bf16.msra.mxu0 %v6456_v42  ;;  %v9641_v57 = vpack.c.bf16 %v3073_v43, %v3071_v4  ;;  %v9643_v44 = vpack.c.bf16 %v3072_v46, %v3070_v11  ;;  %v3032_v32 = vmul.f32 %v7570_v63, %v9453_v10  ;;  %v3233_v5 = vld [vmem:[%s8420_s22 + $0x3f8] sm:$0xff] }
 0x642   : > { %v2960_v54 = vpop.xlane.xlu1 %2959  ;;  %4112 = vmatprep.subr.bf16.mxu1 %v6447_v35  ;;  %4225 = vmatprep.subr.bf16.mxu0 %v6449_v3  ;;  %v3031_v39 = vmul.f32 %v7570_v63, %v9444_v41  ;;  %v6438_v35 = vcombine.low %v3108_v27, %v3112_v50  ;;  %v6440_v4 = vcombine.low %v3109_v61, %v3113_v28  ;;  %v3220_v50 = vld [vmem:[%s8420_s22 + $0x390] sm:$0xff] }
 0x643   : > { %7577 = vrsqrt.f32 %v2995_v62  ;;  %v2980_v36 = vmul.f32 0.00390625, %v2960_v54  ;;  %3936 = vmatprep.mubr.bf16.mxu1 %v9641_v57  ;;  %4049 = vmatprep.mubr.bf16.mxu0 %v9641_v57  ;;  %v6559_v13 = vcombine.high %v3228_v52, %v3232_v53  ;;  %v3075_v46 = vmul.f32 %v9551_v56, %v3032_v32  ;;  %v3221_v54 = vld [vmem:[%s8420_s22 + $0x398] sm:$0xff] }
 0x644   : > { %v7572_v42 = vpop.eup %7571  ;;  %3937 = vmatmul.mubr.bf16.gmra.mxu1 %v9643_v44  ;;  %4050 = vmatmul.mubr.bf16.gmra.mxu0 %v9643_v44  ;;  %v3074_v63 = vmul.f32 %v9546_v37, %v3031_v39  ;;  %v6561_v27 = vcombine.high %v3229_v19, %v3233_v5  ;;  %v6560_v32 = vcombine.low %v3229_v19, %v3233_v5 }
 0x645   : > { %v2996_v11 = vadd.f32 1e-06, %v2980_v36  ;;  %4113 = vmatpush1.bf16.msra.mxu1 %v6446_v40  ;;  %4226 = vmatpush1.bf16.msra.mxu0 %v6448_v8  ;;  %v3034_v62 = vmul.f32 %v7572_v42, %v9465_v29  ;;  %v3033_v3 = vmul.f32 %v7572_v42, %v9456_v16  ;;  %v3224_v8 = vld [vmem:[%s8420_s22 + $0x3b0] sm:$0xff]  ;;  %v3225_v36 = vld [vmem:[%s8420_s22 + $0x3b8] sm:$0xff]  ;;  %v6558_v29 = vcombine.low %v3228_v52, %v3232_v53 }
 0x646   : > { %v2963_v43 = vpop.xlane.xlu0 %2962  ;;  %4114 = vmatprep.subr.bf16.mxu1 %v6439_v6  ;;  %4227 = vmatprep.subr.bf16.mxu0 %v6441_v21  ;;  %v3212_v16 = vld [vmem:[%s8420_s22 + $0x350] sm:$0xff]  ;;  %v6550_v5 = vcombine.low %v3220_v50, %v3224_v8 }
 0x647   : > { %7579 = vrsqrt.f32 %v2996_v11  ;;  %v2981_v61 = vmul.f32 0.00390625, %v2963_v43  ;;  %v3077_v28 = vmul.f32 %v9551_v56, %v3034_v62  ;;  %v3076_v40 = vmul.f32 %v9546_v37, %v3033_v3 }
 0x648   : > { %v7574_v42 = vpop.eup %7573  ;;  %v6551_v62 = vcombine.high %v3220_v50, %v3224_v8  ;;  %v6553_v3 = vcombine.high %v3221_v54, %v3225_v36 }
 0x649   : > { %v2997_v6 = vadd.f32 1e-06, %v2981_v61  ;;  %4115 = vmatpush1.bf16.msra.mxu1 %v6438_v35  ;;  %4228 = vmatpush1.bf16.msra.mxu0 %v6440_v4  ;;  %v9665_v21 = vpack.c.bf16 %v3077_v28, %v3075_v46  ;;  %v9667_v39 = vpack.c.bf16 %v3076_v40, %v3074_v63  ;;  %v3036_v43 = vmul.f32 %v7574_v42, %v9477_v7  ;;  %v3216_v35 = vld [vmem:[%s8420_s22 + $0x370] sm:$0xff]  ;;  %v3213_v4 = vld [vmem:[%s8420_s22 + $0x358] sm:$0xff] }
 0x64a   : > { %v2966_v11 = vpop.xlane.xlu1 %2965  ;;  %4116 = vmatprep.subr.bf16.mxu1 %v6559_v13  ;;  %4229 = vmatprep.subr.bf16.mxu0 %v6561_v27  ;;  %v3035_v53 = vmul.f32 %v7574_v42, %v9468_v47  ;;  %v3217_v46 = vld [vmem:[%s8420_s22 + $0x378] sm:$0xff]  ;;  %v6552_v63 = vcombine.low %v3221_v54, %v3225_v36  ;;  %v6543_v40 = vcombine.high %v3212_v16, %v3216_v35  ;;  %v3208_v54 = vld [vmem:[%s8420_s22 + $0x330] sm:$0xff] }
 0x64b   : > { %7581 = vrsqrt.f32 %v2997_v6  ;;  %v2982_v52 = vmul.f32 0.00390625, %v2966_v11  ;;  %3946 = vmatprep.mubr.bf16.mxu1 %v9665_v21  ;;  %4059 = vmatprep.mubr.bf16.mxu0 %v9665_v21  ;;  %v3079_v28 = vmul.f32 %v9551_v56, %v3036_v43  ;;  %v6545_v42 = vcombine.high %v3213_v4, %v3217_v46  ;;  %v3204_v6 = vld [vmem:[%s8420_s22 + $0x310] sm:$0xff]  ;;  %v3205_v36 = vld [vmem:[%s8420_s22 + $0x318] sm:$0xff] }
 0x64c   : > { %v7576_v19 = vpop.eup %7575  ;;  %3947 = vmatmul.mubr.bf16.gmra.mxu1 %v9667_v39  ;;  %4060 = vmatmul.mubr.bf16.gmra.mxu0 %v9667_v39 }
 0x64d   : > { %v2998_v13 = vadd.f32 1e-06, %v2982_v52  ;;  %4117 = vmatpush2.bf16.msra.mxu1 %v6558_v29  ;;  %4230 = vmatpush2.bf16.msra.mxu0 %v6560_v32  ;;  %v3038_v27 = vmul.f32 %v7576_v19, %v9495_v12  ;;  %v3037_v61 = vmul.f32 %v7576_v19, %v9480_v59  ;;  %v3078_v29 = vmul.f32 %v9546_v37, %v3035_v53  ;;  %v3209_v32 = vld [vmem:[%s8420_s22 + $0x338] sm:$0xff] }
 0x64e   : > { %4118 = vmatprep.subr.bf16.mxu1 %v6551_v62  ;;  %4231 = vmatprep.subr.bf16.mxu0 %v6553_v3  ;;  %v6542_v62 = vcombine.low %v3212_v16, %v3216_v35  ;;  %v6544_v52 = vcombine.low %v3213_v4, %v3217_v46  ;;  %v6535_v53 = vcombine.high %v3204_v6, %v3208_v54 }
 0x64f   : > { %7583 = vrsqrt.f32 %v2998_v13  ;;  %v3081_v50 = vmul.f32 %v9551_v56, %v3038_v27  ;;  %v3080_v8 = vmul.f32 %v9546_v37, %v3037_v61  ;;  %v6537_v19 = vcombine.high %v3205_v36, %v3209_v32  ;;  %v3196_v13 = vld [vmem:[%s8420_s22 + $0x2d0] sm:$0xff]  ;;  %v3201_v27 = vld [vmem:[%s8420_s22 + $0x2f8] sm:$0xff] }
 0x650   : > { %v7578_v11 = vpop.eup %7577  ;;  %v6534_v4 = vcombine.low %v3204_v6, %v3208_v54  ;;  %v6536_v46 = vcombine.low %v3205_v36, %v3209_v32  ;;  %v3189_v36 = vld [vmem:[%s8420_s22 + $0x298] sm:$0xff] }
 0x651   : > { %4119 = vmatpush2.bf16.msra.mxu1 %v6550_v5  ;;  %4232 = vmatpush2.bf16.msra.mxu0 %v6552_v63  ;;  %v9689_v3 = vpack.c.bf16 %v3081_v50, %v3079_v28  ;;  %v9691_v43 = vpack.c.bf16 %v3080_v8, %v3078_v29  ;;  %v3040_v16 = vmul.f32 %v7578_v11, %v9514_v30  ;;  %v3200_v5 = vld [vmem:[%s8420_s22 + $0x2f0] sm:$0xff]  ;;  %v3197_v63 = vld [vmem:[%s8420_s22 + $0x2d8] sm:$0xff] }
 0x652   : > { %4120 = vmatprep.subr.bf16.mxu1 %v6543_v40  ;;  %4233 = vmatprep.subr.bf16.mxu0 %v6545_v42  ;;  %v3039_v35 = vmul.f32 %v7578_v11, %v9508_v58  ;;  %v6527_v42 = vcombine.high %v3196_v13, %v3200_v5  ;;  %v6529_v50 = vcombine.high %v3197_v63, %v3201_v27  ;;  %v3188_v29 = vld [vmem:[%s8420_s22 + $0x290] sm:$0xff]  ;;  %v3193_v32 = vld [vmem:[%s8420_s22 + $0x2b8] sm:$0xff] }
 0x653   : > { %3956 = vmatprep.mubr.bf16.mxu1 %v9689_v3  ;;  %4069 = vmatprep.mubr.bf16.mxu0 %v9689_v3  ;;  %v3083_v8 = vmul.f32 %v9551_v56, %v3040_v16  ;;  %v6528_v16 = vcombine.low %v3197_v63, %v3201_v27  ;;  %v6520_v27 = vcombine.low %v3189_v36, %v3193_v32 }
 0x654   : > { %v7580_v61 = vpop.eup %7579  ;;  %3957 = vmatmul.mubr.bf16.gmra.mxu1 %v9691_v43  ;;  %4070 = vmatmul.mubr.bf16.gmra.mxu0 %v9691_v43  ;;  %v3082_v6 = vmul.f32 %v9546_v37, %v3039_v35 }
 0x655   : > { %4121 = vmatpush2.bf16.msra.mxu1 %v6542_v62  ;;  %4234 = vmatpush2.bf16.msra.mxu0 %v6544_v52  ;;  %v3042_v28 = vmul.f32 %v7580_v61, %v9522_v45  ;;  %v3041_v40 = vmul.f32 %v7580_v61, %v9516_v48  ;;  %v3192_v62 = vld [vmem:[%s8420_s22 + $0x2b0] sm:$0xff]  ;;  %v6526_v61 = vcombine.low %v3196_v13, %v3200_v5 }
 0x656   : > { %4122 = vmatprep.subr.bf16.mxu1 %v6535_v53  ;;  %4235 = vmatprep.subr.bf16.mxu0 %v6537_v19  ;;  %v6519_v35 = vcombine.high %v3188_v29, %v3192_v62  ;;  %v6518_v63 = vcombine.low %v3188_v29, %v3192_v62  ;;  %v3172_v62 = vld [vmem:[%s8420_s22 + $0x210] sm:$0xff] }
 0x657   : > { %v3085_v11 = vmul.f32 %v9551_v56, %v3042_v28  ;;  %v3084_v54 = vmul.f32 %v9546_v37, %v3041_v40  ;;  %v6521_v28 = vcombine.high %v3189_v36, %v3193_v32  ;;  %v3180_v40 = vld [vmem:[%s8420_s22 + $0x250] sm:$0xff]  ;;  %v3177_v36 = vld [vmem:[%s8420_s22 + $0x238] sm:$0xff] }
 0x658   : > { %v7582_v52 = vpop.eup %7581 }
 0x659   : > { %4123 = vmatpush2.bf16.msra.mxu1 %v6534_v4  ;;  %4236 = vmatpush2.bf16.msra.mxu0 %v6536_v46  ;;  %v9713_v53 = vpack.c.bf16 %v3085_v11, %v3083_v8  ;;  %v9715_v19 = vpack.c.bf16 %v3084_v54, %v3082_v6  ;;  %v3044_v13 = vmul.f32 %v7582_v52, %v9530_v20  ;;  %v3184_v4 = vld [vmem:[%s8420_s22 + $0x270] sm:$0xff]  ;;  %v3181_v46 = vld [vmem:[%s8420_s22 + $0x258] sm:$0xff] }
 0x65a   : > { %4124 = vmatprep.subr.bf16.mxu1 %v6527_v42  ;;  %4237 = vmatprep.subr.bf16.mxu0 %v6529_v50  ;;  %v3043_v5 = vmul.f32 %v7582_v52, %v9524_v51  ;;  %v3185_v8 = vld [vmem:[%s8420_s22 + $0x278] sm:$0xff]  ;;  %v6511_v6 = vcombine.high %v3180_v40, %v3184_v4 }
 0x65b   : > { %3966 = vmatprep.mubr.bf16.mxu1 %v9713_v53  ;;  %4079 = vmatprep.mubr.bf16.mxu0 %v9713_v53  ;;  %v6513_v54 = vcombine.high %v3181_v46, %v3185_v8  ;;  %v3087_v52 = vmul.f32 %v9551_v56, %v3044_v13  ;;  %v7297_v13 = vld [vmem:[%s8384_s10 + $0x70] ss:$8 sps:$4 sm:$0xff]  }
 0x65c   : > { %v7584_v11 = vpop.eup %7583  ;;  %3967 = vmatmul.mubr.bf16.gmra.mxu1 %v9715_v19  ;;  %4080 = vmatmul.mubr.bf16.gmra.mxu0 %v9715_v19  ;;  %v3086_v51 = vmul.f32 %v9546_v37, %v3043_v5  ;;  %v9761_v5 = vld [vmem:[%s8384_s10 + $0x170] ss:$8 sps:$4 sm:$0xff]  }
 0x65d   : > { %4125 = vmatpush2.bf16.msra.mxu1 %v6526_v61  ;;  %4238 = vmatpush2.bf16.msra.mxu0 %v6528_v16  ;;  %v3046_v42 = vmul.f32 %v7584_v11, %v9538_v55  ;;  %v3045_v50 = vmul.f32 %v7584_v11, %v9532_v38  ;;  %v3176_v61 = vld [vmem:[%s8420_s22 + $0x230] sm:$0xff]  ;;  %v3173_v16 = vld [vmem:[%s8420_s22 + $0x218] sm:$0xff]  ;;  %v6512_v11 = vcombine.low %v3181_v46, %v3185_v8  ;;  %v9804_v46 = vld [vmem:[%s8384_s10 + $0x140] ss:$8 sps:$4 sm:$0xff]  }
 0x65e   : > { %4126 = vmatprep.subr.bf16.mxu1 %v6519_v35  ;;  %4239 = vmatprep.subr.bf16.mxu0 %v6521_v28  ;;  %v6510_v28 = vcombine.low %v3180_v40, %v3184_v4  ;;  %v9757_v40 = vld [vmem:[%s8384_s10 + $0x174] ss:$8 sps:$4 sm:$0xff]   ;;  %v7315_v4 = vld [vmem:[%s8384_s10 + $0x40] ss:$8 sps:$4 sm:$0xff]   ;;  %10938 = vst [vmem:[#allocation59_spill] sm:$0xff] %v9804_v46 }
 0x65f   : > { %v3089_v20 = vmul.f32 %v9551_v56, %v3046_v42  ;;  %v3088_v29 = vmul.f32 %v9546_v37, %v3045_v50  ;;  %v6503_v56 = vcombine.high %v3172_v62, %v3176_v61  ;;  %v6505_v37 = vcombine.high %v3173_v16, %v3177_v36  ;;  %v7323_v8 = vld [vmem:[%s8384_s10 + $0x34] ss:$8 sps:$4 sm:$0xff]   ;;  %v9817_v42 = vld [vmem:[%s8384_s10 + $0x130] ss:$8 sps:$4 sm:$0xff]   ;;  %v7327_v50 = vld [vmem:[%s8384_s10 + $0x20] ss:$8 sps:$4 sm:$0xff]  }
 0x660   : > { %10940 = vst [vmem:[#allocation61_spill] sm:$0xff] %v9817_v42 }
 0x661   : > { %4127 = vmatpush2.bf16.msra.mxu1 %v6518_v63  ;;  %4240 = vmatpush2.bf16.msra.mxu0 %v6520_v27  ;;  %v9737_v32 = vpack.c.bf16 %v3089_v20, %v3087_v52  ;;  %v9739_v35 = vpack.c.bf16 %v3088_v29, %v3086_v51  ;;  %v6502_v20 = vcombine.low %v3172_v62, %v3176_v61  ;;  %v9812_v63 = vld [vmem:[%s8384_s10 + $0x134] ss:$8 sps:$4 sm:$0xff]   ;;  %v7321_v27 = vld [vmem:[%s8384_s10 + $0x30] ss:$8 sps:$4 sm:$0xff]   ;;  %v7341_v62 = vld [vmem:[%s8384_s10 + $0x4] ss:$8 sps:$4 sm:$0xff]  }
 0x662   : > { %4128 = vmatprep.subr.bf16.mxu1 %v6511_v6  ;;  %4241 = vmatprep.subr.bf16.mxu0 %v6513_v54  ;;  %v6504_v51 = vcombine.low %v3173_v16, %v3177_v36  ;;  %10939 = vst [vmem:[#allocation60_spill] sm:$0xff] %v9812_v63  ;;  %v7330_v6 = vld [vmem:[%s8384_s10 + $0x120] ss:$8 sps:$4 sm:$0xff]   ;;  %v7338_v54 = vld [vmem:[%s8384_s10 + $0x114] ss:$8 sps:$4 sm:$0xff]  }
 0x663   : > { %3976 = vmatprep.mubr.bf16.mxu1 %v9737_v32  ;;  %4089 = vmatprep.mubr.bf16.mxu0 %v9737_v32  ;;  %v7333_v52 = vld [vmem:[%s8384_s10 + $0x10] ss:$8 sps:$4 sm:$0xff]   ;;  %v7344_v61 = vld [vmem:[%s8384_s10 + $0x104] ss:$8 sps:$4 sm:$0xff]   ;;  %v7339_v16 = vld [vmem:[%s8384_s10] ss:$8 sps:$4 sm:$0xff]  }
 0x664   : > { %3977 = vmatmul.mubr.bf16.gmra.mxu1 %v9739_v35  ;;  %4090 = vmatmul.mubr.bf16.gmra.mxu0 %v9739_v35  ;;  %v7336_v29 = vld [vmem:[%s8384_s10 + $0x110] ss:$8 sps:$4 sm:$0xff]   ;;  %v7342_v36 = vld [vmem:[%s8384_s10 + $0x100] ss:$8 sps:$4 sm:$0xff]  }
 0x665   : > { %4129 = vmatpush2.bf16.msra.mxu1 %v6510_v28  ;;  %4132 = vmatprep.mubr.bf16.mxu1 %v9563_v34  ;;  %v7345_v28 = vld [vmem:[%s8384_s10 + $0xf0] ss:$8 sps:$4 sm:$0xff]  }
 0x666   : > { %4242 = vmatpush2.bf16.msra.mxu0 %v6512_v11  ;;  %4245 = vmatprep.mubr.bf16.mxu0 %v9563_v34  ;;  %v7299_v34 = vld [vmem:[%s8384_s10 + $0x74] ss:$8 sps:$4 sm:$0xff]   ;;  %v7348_v11 = vld [vmem:[%s8384_s10 + $0x1f0] ss:$8 sps:$4 sm:$0xff]  }
 0x667   : > { %4130 = vmatprep.subr.bf16.mxu1 %v6503_v56  ;;  %4243 = vmatprep.subr.bf16.mxu0 %v6505_v37  ;;  %v7353_v56 = vld [vmem:[%s8384_s10 + $0xe4] ss:$8 sps:$4 sm:$0xff]  }
 0x668   : > { %v7356_v37 = vld [vmem:[%s8384_s10 + $0x1e4] ss:$8 sps:$4 sm:$0xff]  }
 0x669   : > { %4131 = vmatpush2.bf16.msra.mxu1 %v6502_v20  ;;  %v7351_v20 = vld [vmem:[%s8384_s10 + $0xe0] ss:$8 sps:$4 sm:$0xff]  }
 0x66a   : > { %4244 = vmatpush2.bf16.msra.mxu0 %v6504_v51  ;;  %5254 = vmatprep.subr.bf16.mxu1 %v7299_v34  ;;  %v7354_v51 = vld [vmem:[%s8384_s10 + $0x1e0] ss:$8 sps:$4 sm:$0xff]   ;;  %v7359_v34 = vld [vmem:[%s8384_s10 + $0xd4] ss:$8 sps:$4 sm:$0xff]  }
 0x66b   : > { %5367 = vmatprep.subr.bf16.mxu0 %v9757_v40 }
 0x66c   : > { %4133 = vmatmul.mubr.bf16.vlgmr.msra.gmra.mxu1 %v9565_v15 }
 0x66d   : > { %4246 = vmatmul.mubr.bf16.vlgmr.msra.gmra.mxu0 %v9565_v15  ;;  %4142 = vmatprep.mubr.bf16.mxu1 %v9593_v22  ;;  %v7305_v15 = vld [vmem:[%s8384_s10 + $0x64] ss:$8 sps:$4 sm:$0xff]  }
 0x66e   : > { %4255 = vmatprep.mubr.bf16.mxu0 %v9593_v22  ;;  %5255 = vmatpush1.bf16.msra.mxu1 %v7297_v13  ;;  %v9775_v22 = vld [vmem:[%s8384_s10 + $0x164] ss:$8 sps:$4 sm:$0xff]   ;;  %v7362_v13 = vld [vmem:[%s8384_s10 + $0x1d4] ss:$8 sps:$4 sm:$0xff]  }
 0x66f   : > { %5368 = vmatpush1.bf16.msra.mxu0 %v9761_v5  ;;  %5256 = vmatprep.subr.bf16.mxu1 %v7305_v15  ;;  %v7357_v15 = vld [vmem:[%s8384_s10 + $0xd0] ss:$8 sps:$4 sm:$0xff]  }
 0x670   : > { %5369 = vmatprep.subr.bf16.mxu0 %v9775_v22 }
 0x674   : > { %4143 = vmatmul.mubr.bf16.gmra.mxu1 %v9595_v17 }
 0x675   : > { %4256 = vmatmul.mubr.bf16.gmra.mxu0 %v9595_v17  ;;  %4152 = vmatprep.mubr.bf16.mxu1 %v9617_v14  ;;  %v7303_v17 = vld [vmem:[%s8384_s10 + $0x60] ss:$8 sps:$4 sm:$0xff]  }
 0x676   : > { %4265 = vmatprep.mubr.bf16.mxu0 %v9617_v14  ;;  %v9780_v14 = vld [vmem:[%s8384_s10 + $0x160] ss:$8 sps:$4 sm:$0xff]   ;;  %5257 = vmatpush1.bf16.msra.mxu1 %v7303_v17  ;;  %v7360_v17 = vld [vmem:[%s8384_s10 + $0x1d0] ss:$8 sps:$4 sm:$0xff]  }
 0x677   : > { %5370 = vmatpush1.bf16.msra.mxu0 %v9780_v14 }
 0x67c   : > { %4153 = vmatmul.mubr.bf16.gmra.mxu1 %v9619_v25 }
 0x67d   : > { %4266 = vmatmul.mubr.bf16.gmra.mxu0 %v9619_v25  ;;  %4162 = vmatprep.mubr.bf16.mxu1 %v9641_v57  ;;  %v7311_v25 = vld [vmem:[%s8384_s10 + $0x54] ss:$8 sps:$4 sm:$0xff]  }
 0x67e   : > { %4275 = vmatprep.mubr.bf16.mxu0 %v9641_v57  ;;  %v9788_v57 = vld [vmem:[%s8384_s10 + $0x154] ss:$8 sps:$4 sm:$0xff]   ;;  %5258 = vmatprep.subr.bf16.mxu1 %v7311_v25  ;;  %v7365_v25 = vld [vmem:[%s8384_s10 + $0xc4] ss:$8 sps:$4 sm:$0xff]  }
 0x67f   : > { %5371 = vmatprep.subr.bf16.mxu0 %v9788_v57 }
 0x684   : > { %4163 = vmatmul.mubr.bf16.gmra.mxu1 %v9643_v44 }
 0x685   : > { %4276 = vmatmul.mubr.bf16.gmra.mxu0 %v9643_v44  ;;  %4172 = vmatprep.mubr.bf16.mxu1 %v9665_v21  ;;  %v7309_v44 = vld [vmem:[%s8384_s10 + $0x50] ss:$8 sps:$4 sm:$0xff]  }
 0x686   : > { %4285 = vmatprep.mubr.bf16.mxu0 %v9665_v21  ;;  %v9793_v21 = vld [vmem:[%s8384_s10 + $0x150] ss:$8 sps:$4 sm:$0xff]   ;;  %5259 = vmatpush1.bf16.msra.mxu1 %v7309_v44  ;;  %v7368_v44 = vld [vmem:[%s8384_s10 + $0x1c4] ss:$8 sps:$4 sm:$0xff]  }
 0x687   : > { %10936 = vst [vmem:[#allocation57_spill] sm:$0xff] %v9793_v21  ;;  %5372 = vmatpush1.bf16.msra.mxu0 %v9793_v21 }
 0x68c   : > { %4173 = vmatmul.mubr.bf16.gmra.mxu1 %v9667_v39 }
 0x68d   : > { %4286 = vmatmul.mubr.bf16.gmra.mxu0 %v9667_v39  ;;  %4182 = vmatprep.mubr.bf16.mxu1 %v9689_v3  ;;  %v7317_v39 = vld [vmem:[%s8384_s10 + $0x44] ss:$8 sps:$4 sm:$0xff]  }
 0x68e   : > { %4295 = vmatprep.mubr.bf16.mxu0 %v9689_v3  ;;  %v9798_v3 = vld [vmem:[%s8384_s10 + $0x144] ss:$8 sps:$4 sm:$0xff]   ;;  %5260 = vmatprep.subr.bf16.mxu1 %v7317_v39  ;;  %v7363_v39 = vld [vmem:[%s8384_s10 + $0xc0] ss:$8 sps:$4 sm:$0xff]  }
 0x68f   : > { %10937 = vst [vmem:[#allocation58_spill] sm:$0xff] %v9798_v3  ;;  %5373 = vmatprep.subr.bf16.mxu0 %v9798_v3  ;;  %5261 = vmatpush1.bf16.msra.mxu1 %v7315_v4  ;;  %v7366_v4 = vld [vmem:[%s8384_s10 + $0x1c0] ss:$8 sps:$4 sm:$0xff]  }
 0x690   : > { %5374 = vmatpush1.bf16.msra.mxu0 %v9804_v46  ;;  %5262 = vmatprep.subr.bf16.mxu1 %v7323_v8  ;;  %v7371_v8 = vld [vmem:[%s8384_s10 + $0xb4] ss:$8 sps:$4 sm:$0xff]  }
 0x691   : > { %5375 = vmatprep.subr.bf16.mxu0 %v9812_v63 }
 0x693   : > { %5263 = vmatpush1.bf16.msra.mxu1 %v7321_v27  ;;  %v7374_v27 = vld [vmem:[%s8384_s10 + $0x1b4] ss:$8 sps:$4 sm:$0xff]  }
 0x694   : > { %4183 = vmatmul.mubr.bf16.gmra.mxu1 %v9691_v43  ;;  %5376 = vmatpush1.bf16.msra.mxu0 %v9817_v42 }
 0x695   : > { %4296 = vmatmul.mubr.bf16.gmra.mxu0 %v9691_v43  ;;  %4192 = vmatprep.mubr.bf16.mxu1 %v9713_v53  ;;  %v7329_v43 = vld [vmem:[%s8384_s10 + $0x24] ss:$8 sps:$4 sm:$0xff]  }
 0x696   : > { %4305 = vmatprep.mubr.bf16.mxu0 %v9713_v53  ;;  %v9829_v53 = vld [vmem:[%s8384_s10 + $0x124] ss:$8 sps:$4 sm:$0xff]   ;;  %5264 = vmatprep.subr.bf16.mxu1 %v7329_v43  ;;  %v7369_v43 = vld [vmem:[%s8384_s10 + $0xb0] ss:$8 sps:$4 sm:$0xff]  }
 0x697   : > { %10941 = vst [vmem:[#allocation62_spill] sm:$0xff] %v9829_v53  ;;  %5377 = vmatprep.subr.bf16.mxu0 %v9829_v53  ;;  %5265 = vmatpush1.bf16.msra.mxu1 %v7327_v50  ;;  %v7372_v50 = vld [vmem:[%s8384_s10 + $0x1b0] ss:$8 sps:$4 sm:$0xff]  }
 0x698   : > { %5378 = vmatpush1.bf16.msra.mxu0 %v7330_v6  ;;  %v7377_v6 = vld [vmem:[%s8384_s10 + $0xa4] ss:$8 sps:$4 sm:$0xff]  }
 0x699   : > { %5379 = vmatprep.subr.bf16.mxu0 %v7338_v54  ;;  %v7375_v54 = vld [vmem:[%s8384_s10 + $0xa0] ss:$8 sps:$4 sm:$0xff]  }
 0x69c   : > { %4193 = vmatmul.mubr.bf16.gmra.mxu1 %v9715_v19  ;;  %5380 = vmatpush1.bf16.msra.mxu0 %v7336_v29  ;;  %v7383_v29 = vld [vmem:[%s8384_s10 + $0x94] ss:$8 sps:$4 sm:$0xff]  }
 0x69d   : > { %4306 = vmatmul.mubr.bf16.gmra.mxu0 %v9715_v19  ;;  %4202 = vmatprep.mubr.bf16.mxu1 %v9737_v32  ;;  %v7335_v19 = vld [vmem:[%s8384_s10 + $0x14] ss:$8 sps:$4 sm:$0xff]  }
 0x69e   : > { %4315 = vmatprep.mubr.bf16.mxu0 %v9737_v32  ;;  %5266 = vmatprep.subr.bf16.mxu1 %v7335_v19  ;;  %v7347_v32 = vld [vmem:[%s8384_s10 + $0xf4] ss:$8 sps:$4 sm:$0xff]   ;;  %v7380_v19 = vld [vmem:[%s8384_s10 + $0x1a4] ss:$8 sps:$4 sm:$0xff]  }
 0x69f   : > { %5267 = vmatpush1.bf16.msra.mxu1 %v7333_v52  ;;  %5381 = vmatprep.subr.bf16.mxu0 %v7344_v61  ;;  %v7378_v52 = vld [vmem:[%s8384_s10 + $0x1a0] ss:$8 sps:$4 sm:$0xff]   ;;  %v7381_v61 = vld [vmem:[%s8384_s10 + $0x90] ss:$8 sps:$4 sm:$0xff]  }
 0x6a0   : > { %5268 = vmatprep.subr.bf16.mxu1 %v7341_v62  ;;  %5382 = vmatpush1.bf16.msra.mxu0 %v7342_v36  ;;  %v7386_v62 = vld [vmem:[%s8384_s10 + $0x194] ss:$8 sps:$4 sm:$0xff]   ;;  %v7389_v36 = vld [vmem:[%s8384_s10 + $0x84] ss:$8 sps:$4 sm:$0xff]  }
 0x6a3   : > { %5269 = vmatpush1.bf16.msra.mxu1 %v7339_v16  ;;  %v7384_v16 = vld [vmem:[%s8384_s10 + $0x190] ss:$8 sps:$4 sm:$0xff]  }
 0x6a4   : > { %4203 = vmatmul.mubr.bf16.gmra.mxu1 %v9739_v35  ;;  %5270 = vmatprep.subr.bf16.mxu1 %v7347_v32  ;;  %v7392_v32 = vld [vmem:[%s8384_s10 + $0x184] ss:$8 sps:$4 sm:$0xff]  }
 0x6a5   : > { %4316 = vmatmul.mubr.bf16.gmra.mxu0 %v9739_v35  ;;  %v7350_v35 = vld [vmem:[%s8384_s10 + $0x1f4] ss:$8 sps:$4 sm:$0xff]  }
 0x6a6   : > { %5383 = vmatprep.subr.bf16.mxu0 %v7350_v35  ;;  %v7387_v35 = vld [vmem:[%s8384_s10 + $0x80] ss:$8 sps:$4 sm:$0xff]  }
 0x6a7   : > { %5271 = vmatpush2.bf16.msra.mxu1 %v7345_v28  ;;  %5384 = vmatpush2.bf16.msra.mxu0 %v7348_v11  ;;  %v7390_v28 = vld [vmem:[%s8384_s10 + $0x180] ss:$8 sps:$4 sm:$0xff]  }
 0x6a8   : > { %5272 = vmatprep.subr.bf16.mxu1 %v7353_v56  ;;  %5385 = vmatprep.subr.bf16.mxu0 %v7356_v37 }
 0x6ab   : > { %5273 = vmatpush2.bf16.msra.mxu1 %v7351_v20  ;;  %5386 = vmatpush2.bf16.msra.mxu0 %v7354_v51 }
 0x6ac   : > { %5274 = vmatprep.subr.bf16.mxu1 %v7359_v34  ;;  %5387 = vmatprep.subr.bf16.mxu0 %v7362_v13 }
 0x6af   : > { %5275 = vmatpush2.bf16.msra.mxu1 %v7357_v15  ;;  %5388 = vmatpush2.bf16.msra.mxu0 %v7360_v17 }
 0x6b0   : > { %5276 = vmatprep.subr.bf16.mxu1 %v7365_v25  ;;  %5389 = vmatprep.subr.bf16.mxu0 %v7368_v44 }
 0x6b3   : > { %5277 = vmatpush2.bf16.msra.mxu1 %v7363_v39  ;;  %5390 = vmatpush2.bf16.msra.mxu0 %v7366_v4 }
 0x6b4   : > { %5278 = vmatprep.subr.bf16.mxu1 %v7371_v8  ;;  %5391 = vmatprep.subr.bf16.mxu0 %v7374_v27 }
 0x6b7   : > { %5279 = vmatpush2.bf16.msra.mxu1 %v7369_v43  ;;  %5392 = vmatpush2.bf16.msra.mxu0 %v7372_v50 }
 0x6b8   : > { %5280 = vmatprep.subr.bf16.mxu1 %v7377_v6  ;;  %5393 = vmatprep.subr.bf16.mxu0 %v7380_v19 }
 0x6bb   : > { %5281 = vmatpush2.bf16.msra.mxu1 %v7375_v54  ;;  %5394 = vmatpush2.bf16.msra.mxu0 %v7378_v52 }
 0x6bc   : > { %5282 = vmatprep.subr.bf16.mxu1 %v7383_v29  ;;  %5395 = vmatprep.subr.bf16.mxu0 %v7386_v62 }
 0x6bf   : > { %5283 = vmatpush2.bf16.msra.mxu1 %v7381_v61  ;;  %5396 = vmatpush2.bf16.msra.mxu0 %v7384_v16 }
 0x6c0   : > { %5284 = vmatprep.subr.bf16.mxu1 %v7389_v36  ;;  %5397 = vmatprep.subr.bf16.mxu0 %v7392_v32 }
 0x6c3   : > { %5285 = vmatpush2.bf16.msra.mxu1 %v7387_v35  ;;  %5398 = vmatpush2.bf16.msra.mxu0 %v7390_v28 }
 0x6c4   : > { %6925 = vmatprep.subr.bf16.mxu1 %v9757_v40 }
 0x6ec   : > { %v9875_v11 = vpop.f32.mrf.mxu1  ;;  %v9877_v56 = vpop.f32.mrf.mxu0 }
 0x6ed   : > { %v6562_v37 = vmul.f32 -1.442695, %v9875_v11  ;;  %v6564_v20 = vmul.f32 -1.442695, %v9877_v56 }
 0x6ee   : > { %v9881_v51 = vpop.f32.mrf.mxu1  ;;  %v9883_v34 = vpop.f32.mrf.mxu0 }
 0x6ef   : > { %7585 = vpow2.f32 %v6562_v37  ;;  %v6563_v13 = vmul.f32 -1.442695, %v9881_v51  ;;  %v6565_v15 = vmul.f32 -1.442695, %v9883_v34 }
 0x6f0   : > { %7587 = vpow2.f32 %v6564_v20  ;;  %v9887_v17 = vpop.f32.mrf.mxu1  ;;  %v9889_v40 = vpop.f32.mrf.mxu0 }
 0x6f1   : > { %7589 = vpow2.f32 %v6563_v13  ;;  %v6566_v25 = vmul.f32 -1.442695, %v9887_v17  ;;  %v6568_v44 = vmul.f32 -1.442695, %v9889_v40 }
 0x6f2   : > { %7591 = vpow2.f32 %v6565_v15  ;;  %v9893_v39 = vpop.f32.mrf.mxu1  ;;  %v9895_v4 = vpop.f32.mrf.mxu0 }
 0x6f3   : > { %7593 = vpow2.f32 %v6566_v25  ;;  %v6567_v8 = vmul.f32 -1.442695, %v9893_v39  ;;  %v6569_v27 = vmul.f32 -1.442695, %v9895_v4 }
 0x6f4   : > { %7595 = vpow2.f32 %v6568_v44  ;;  %v9899_v43 = vpop.f32.mrf.mxu1  ;;  %v9901_v50 = vpop.f32.mrf.mxu0 }
 0x6f5   : > { %7597 = vpow2.f32 %v6567_v8  ;;  %v6570_v6 = vmul.f32 -1.442695, %v9899_v43  ;;  %v6572_v19 = vmul.f32 -1.442695, %v9901_v50 }
 0x6f6   : > { %7599 = vpow2.f32 %v6569_v27  ;;  %v9905_v54 = vpop.f32.mrf.mxu1  ;;  %v9907_v52 = vpop.f32.mrf.mxu0 }
 0x6f7   : > { %7601 = vpow2.f32 %v6570_v6  ;;  %v6571_v29 = vmul.f32 -1.442695, %v9905_v54  ;;  %v6573_v62 = vmul.f32 -1.442695, %v9907_v52 }
 0x6f8   : > { %7603 = vpow2.f32 %v6572_v19  ;;  %v9911_v61 = vpop.f32.mrf.mxu1  ;;  %v9913_v16 = vpop.f32.mrf.mxu0 }
 0x6f9   : > { %7605 = vpow2.f32 %v6571_v29  ;;  %v6574_v35 = vmul.f32 -1.442695, %v9911_v61  ;;  %v6576_v37 = vmul.f32 -1.442695, %v9913_v16 }
 0x6fa   : > { %7607 = vpow2.f32 %v6573_v62  ;;  %v9915_v36 = vpop.f32.mrf.mxu1  ;;  %v9917_v32 = vpop.f32.mrf.mxu0 }
 0x6fb   : > { %v6575_v25 = vmul.f32 -1.442695, %v9915_v36  ;;  %v6577_v8 = vmul.f32 -1.442695, %v9917_v32  ;;  %7609 = vpow2.f32 %v6574_v35 }
 0x6fc   : > { %v7586_v28 = vpop.eup %7585  ;;  %v9921_v20 = vpop.f32.mrf.mxu1  ;;  %7611 = vpow2.f32 %v6576_v37 }
 0x6fd   : > { %v9923_v13 = vpop.f32.mrf.mxu0  ;;  %v7588_v15 = vpop.eup %7587  ;;  %v4518_v29 = vadd.f32 1.0, %v7586_v28  ;;  %7613 = vpow2.f32 %v6575_v25 }
 0x6fe   : > { %v7590_v44 = vpop.eup %7589  ;;  %v9927_v27 = vpop.f32.mrf.mxu1  ;;  %v4520_v55 = vadd.f32 1.0, %v7588_v15  ;;  %7615 = vpow2.f32 %v6577_v8 }
 0x6ff   : > { %v9929_v6 = vpop.f32.mrf.mxu0  ;;  %v7592_v19 = vpop.eup %7591  ;;  %v4519_v30 = vadd.f32 1.0, %v7590_v44  ;;  %7617 = vrcp.f32 %v4518_v29 }
 0x700   : > { %v7594_v62 = vpop.eup %7593  ;;  %v9931_v38 = vpop.f32.mrf.mxu1  ;;  %v4521_v12 = vadd.f32 1.0, %v7592_v19  ;;  %7619 = vrcp.f32 %v4520_v55 }
 0x701   : > { %10942 = vst [vmem:[#allocation63_spill] sm:$0xff] %v9931_v38  ;;  %v9933_v45 = vpop.f32.mrf.mxu0  ;;  %v7596_v48 = vpop.eup %7595  ;;  %v4522_v35 = vadd.f32 1.0, %v7594_v62  ;;  %7621 = vrcp.f32 %v4519_v30 }
 0x702   : > { %10943 = vst [vmem:[#allocation64_spill] sm:$0xff] %v9933_v45  ;;  %v7598_v58 = vpop.eup %7597  ;;  %v9935_v59 = vpop.f32.mrf.mxu1  ;;  %v4524_v37 = vadd.f32 1.0, %v7596_v48  ;;  %7623 = vrcp.f32 %v4521_v12  ;;  %v6578_v12 = vmul.f32 -1.442695, %v9921_v20  ;;  %v6584_v18 = vmul.f32 -1.442695, %v9933_v45 }
 0x703   : > { %10944 = vst [vmem:[#allocation65_spill] sm:$0xff] %v9935_v59  ;;  %v9937_v7 = vpop.f32.mrf.mxu0  ;;  %v7600_v47 = vpop.eup %7599  ;;  %v4523_v25 = vadd.f32 1.0, %v7598_v58  ;;  %7625 = vrcp.f32 %v4522_v35  ;;  %v6580_v35 = vmul.f32 -1.442695, %v9923_v13  ;;  %v6583_v24 = vmul.f32 -1.442695, %v9935_v59 }
 0x704   : > { %10945 = vst [vmem:[#allocation66_spill] sm:$0xff] %v9937_v7  ;;  %v7602_v28 = vpop.eup %7601  ;;  %v9939_v15 = vpop.f32.mrf.mxu1  ;;  %v4525_v8 = vadd.f32 1.0, %v7600_v47  ;;  %7627 = vrcp.f32 %v4524_v37 }
 0x705   : > { %10946 = vst [vmem:[#allocation67_spill] sm:$0xff] %v9939_v15  ;;  %v9941_v10 = vpop.f32.mrf.mxu0  ;;  %v7604_v41 = vpop.eup %7603  ;;  %v4526_v29 = vadd.f32 1.0, %v7602_v28  ;;  %7629 = vrcp.f32 %v4523_v25  ;;  %v6579_v25 = vmul.f32 -1.442695, %v9927_v27 }
 0x706   : > { %10947 = vst [vmem:[#allocation68_spill] sm:$0xff] %v9941_v10  ;;  %v7606_v44 = vpop.eup %7605  ;;  %v9943_v19 = vpop.f32.mrf.mxu1  ;;  %v4528_v55 = vadd.f32 1.0, %v7604_v41  ;;  %7631 = vrcp.f32 %v4525_v8 }
 0x707   : > { %10948 = vst [vmem:[#allocation69_spill] sm:$0xff] %v9943_v19  ;;  %v9945_v1 = vpop.f32.mrf.mxu0  ;;  %v7608_v23 = vpop.eup %7607  ;;  %v4527_v0 = vadd.f32 1.0, %v7606_v44  ;;  %7633 = vrcp.f32 %v4526_v29  ;;  %v6581_v44 = vmul.f32 -1.442695, %v9929_v6  ;;  %v6587_v42 = vmul.f32 -1.442695, %v9943_v19 }
 0x708   : > { %10949 = vst [vmem:[#allocation70_spill] sm:$0xff] %v9945_v1  ;;  %v9947_v48 = vpop.f32.mrf.mxu1  ;;  %v4529_v58 = vadd.f32 1.0, %v7608_v23  ;;  %v7610_v26 = vpop.eup %7609  ;;  %7635 = vrcp.f32 %v4528_v55  ;;  %v6582_v55 = vmul.f32 -1.442695, %v9931_v38 }
 0x709   : > { %10950 = vst [vmem:[#allocation71_spill] sm:$0xff] %v9947_v48  ;;  %v9949_v62 = vpop.f32.mrf.mxu0  ;;  %v7612_v37 = vpop.eup %7611  ;;  %7637 = vrcp.f32 %v4527_v0 }
 0x70a   : > { %10951 = vst [vmem:[#allocation72_spill] sm:$0xff] %v9949_v62  ;;  %v9951_v30 = vpop.f32.mrf.mxu1  ;;  %v7614_v23 = vpop.eup %7613  ;;  %7639 = vrcp.f32 %v4529_v58 }
 0x70b   : > { %10952 = vst [vmem:[#allocation73_spill] sm:$0xff] %v9951_v30  ;;  %v9953_v47 = vpop.f32.mrf.mxu0  ;;  %v7616_v33 = vpop.eup %7615  ;;  %7641 = vpow2.f32 %v6578_v12  ;;  %v6585_v12 = vmul.f32 -1.442695, %v9937_v7 }
 0x70c   : > { %10953 = vst [vmem:[#allocation74_spill] sm:$0xff] %v9953_v47  ;;  %v9957_v41 = vpop.f32.mrf.mxu1  ;;  %v9968_v2 = vpop.eup %7617  ;;  %7643 = vpow2.f32 %v6580_v35  ;;  %v4533_v7 = vadd.f32 1.0, %v7616_v33  ;;  %v6593_v59 = vmul.f32 -1.442695, %v9953_v47 }
 0x70d   : > { %10954 = vst [vmem:[#allocation75_spill] sm:$0xff] %v9957_v41  ;;  %v9959_v28 = vpop.f32.mrf.mxu0  ;;  %v9975_v58 = vpop.eup %7619  ;;  %7645 = vpow2.f32 %v6579_v25  ;;  %v6588_v25 = vmul.f32 -1.442695, %v9941_v10  ;;  %v4530_v10 = vadd.f32 1.0, %v7610_v26 }
 0x70e   : > { %10955 = vst [vmem:[#allocation76_spill] sm:$0xff] %v9959_v28  ;;  %v9963_v8 = vpop.f32.mrf.mxu1  ;;  %v9978_v49 = vpop.eup %7621  ;;  %7647 = vpow2.f32 %v6581_v44  ;;  %v6586_v28 = vmul.f32 -1.442695, %v9939_v15 }
 0x70f   : > { %10956 = vst [vmem:[#allocation77_spill] sm:$0xff] %v9963_v8  ;;  %v9965_v29 = vpop.f32.mrf.mxu0  ;;  %v9985_v35 = vpop.eup %7623  ;;  %7649 = vpow2.f32 %v6582_v55  ;;  %v6589_v55 = vmul.f32 -1.442695, %v9945_v1  ;;  %v4532_v1 = vadd.f32 1.0, %v7612_v37 }
 0x710   : > { %10957 = vst [vmem:[#allocation78_spill] sm:$0xff] %v9965_v29  ;;  %v9971_v0 = vpop.f32.mrf.mxu1  ;;  %7651 = vpow2.f32 %v6584_v18 }
 0x711   : > { %10958 = vst [vmem:[#allocation79_spill] sm:$0xff] %v9971_v0  ;;  %v9973_v60 = vpop.f32.mrf.mxu0  ;;  %7653 = vpow2.f32 %v6583_v24  ;;  %v6590_v24 = vmul.f32 -1.442695, %v9947_v48  ;;  %v4531_v48 = vadd.f32 1.0, %v7614_v23 }
 0x712   : > { %10959 = vst [vmem:[#allocation80_spill] sm:$0xff] %v9973_v60  ;;  %v9981_v9 = vpop.f32.mrf.mxu1  ;;  %v9988_v60 = vpop.eup %7625  ;;  %7655 = vpow2.f32 %v6585_v12 }
 0x713   : > { %10960 = vst [vmem:[#allocation81_spill] sm:$0xff] %v9981_v9  ;;  %v9983_v31 = vpop.f32.mrf.mxu0  ;;  %v9995_v44 = vpop.eup %7627  ;;  %7657 = vpow2.f32 %v6586_v28 }
 0x714   : > { %10961 = vst [vmem:[#allocation82_spill] sm:$0xff] %v9983_v31  ;;  %v9991_v29 = vpop.f32.mrf.mxu1  ;;  %v9998_v31 = vpop.eup %7629  ;;  %7659 = vpow2.f32 %v6588_v25 }
 0x715   : > { %10962 = vst [vmem:[#allocation83_spill] sm:$0xff] %v9991_v29  ;;  %v9993_v53 = vpop.f32.mrf.mxu0  ;;  %v10005_v18 = vpop.eup %7631  ;;  %7661 = vpow2.f32 %v6587_v42 }
 0x716   : > { %10963 = vst [vmem:[#allocation84_spill] sm:$0xff] %v9993_v53  ;;  %v10001_v63 = vpop.f32.mrf.mxu1  ;;  %v10007_v46 = vpop.eup %7633  ;;  %7663 = vpow2.f32 %v6589_v55  ;;  %v6591_v55 = vmul.f32 -1.442695, %v9951_v30 }
 0x717   : > { %v10003_v15 = vpop.f32.mrf.mxu0  ;;  %v10014_v12 = vpop.eup %7635  ;;  %7665 = vrcp.f32 %v4530_v10 }
 0x718   : > { %10964 = vst [vmem:[#allocation85_spill] sm:$0xff] %v10003_v15  ;;  %v10010_v53 = vpop.f32.mrf.mxu1  ;;  %v10016_v3 = vpop.eup %7637  ;;  %v6592_v15 = vmul.f32 -1.442695, %v9949_v62  ;;  %7667 = vpow2.f32 %v6590_v24 }
 0x719   : > { %v10012_v19 = vpop.f32.mrf.mxu0  ;;  %v10023_v25 = vpop.eup %7639  ;;  %7669 = vrcp.f32 %v4532_v1 }
 0x71a   : > { %10965 = vst [vmem:[#allocation86_spill] sm:$0xff] %v10012_v19  ;;  %v10019_v26 = vpop.f32.mrf.mxu1  ;;  %v7642_v21 = vpop.eup %7641  ;;  %7671 = vpow2.f32 %v6592_v15 }
 0x71b   : > { %v10021_v28 = vpop.f32.mrf.mxu0  ;;  %v7644_v42 = vpop.eup %7643  ;;  %7673 = vrcp.f32 %v4531_v48  ;;  %v4534_v33 = vadd.f32 1.0, %v7642_v21 }
 0x71c   : > { %10966 = vst [vmem:[#allocation87_spill] sm:$0xff] %v10021_v28  ;;  %v10025_v19 = vpop.f32.mrf.mxu1  ;;  %v7646_v62 = vpop.eup %7645  ;;  %7675 = vrcp.f32 %v4533_v7  ;;  %v4536_v24 = vadd.f32 1.0, %v7644_v42 }
 0x71d   : > { %10967 = vst [vmem:[#allocation88_spill] sm:$0xff] %v10025_v19  ;;  %v10027_v37 = vpop.f32.mrf.mxu0  ;;  %v7648_v10 = vpop.eup %7647  ;;  %v4535_v30 = vadd.f32 1.0, %v7646_v62  ;;  %7677 = vpow2.f32 %v6591_v55 }
 0x71e   : > { %10968 = vst [vmem:[#allocation89_spill] sm:$0xff] %v10027_v37  ;;  %v10031_v28 = vpop.f32.mrf.mxu1  ;;  %v7650_v23 = vpop.eup %7649  ;;  %v4537_v38 = vadd.f32 1.0, %v7648_v10  ;;  %7679 = vpow2.f32 %v6593_v59 }
 0x71f   : > { %10969 = vst [vmem:[#allocation90_spill] sm:$0xff] %v10031_v28  ;;  %v10033_v45 = vpop.f32.mrf.mxu0  ;;  %v7652_v1 = vpop.eup %7651  ;;  %7681 = vrcp.f32 %v4534_v33  ;;  %v4538_v21 = vadd.f32 1.0, %v7650_v23 }
 0x720   : > { %10970 = vst [vmem:[#allocation91_spill] sm:$0xff] %v10033_v45  ;;  %v10035_v19 = vpop.f32.mrf.mxu1  ;;  %v7654_v15 = vpop.eup %7653  ;;  %7683 = vrcp.f32 %v4536_v24  ;;  %v4540_v7 = vadd.f32 1.0, %v7652_v1 }
 0x721   : > { %10971 = vst [vmem:[#allocation92_spill] sm:$0xff] %v10035_v19  ;;  %v10037_v37 = vpop.f32.mrf.mxu0  ;;  %v7656_v45 = vpop.eup %7655  ;;  %7685 = vrcp.f32 %v4535_v30  ;;  %v4539_v62 = vadd.f32 1.0, %v7654_v15 }
 0x722   : > { %10972 = vst [vmem:[#allocation93_spill] sm:$0xff] %v10037_v37  ;;  %v10039_v47 = vpop.f32.mrf.mxu1  ;;  %v7658_v48 = vpop.eup %7657  ;;  %7687 = vrcp.f32 %v4537_v38  ;;  %v4541_v59 = vadd.f32 1.0, %v7656_v45 }
 0x723   : > { %10973 = vst [vmem:[#allocation94_spill] sm:$0xff] %v10039_v47  ;;  %v10041_v28 = vpop.f32.mrf.mxu0  ;;  %v7660_v37 = vpop.eup %7659  ;;  %7689 = vrcp.f32 %v4538_v21  ;;  %v4542_v33 = vadd.f32 1.0, %v7658_v48  ;;  %v6594_v48 = vmul.f32 -1.442695, %v9957_v41 }
 0x724   : > { %10974 = vst [vmem:[#allocation95_spill] sm:$0xff] %v10041_v28  ;;  %v10043_v42 = vpop.f32.mrf.mxu1  ;;  %v7662_v55 = vpop.eup %7661  ;;  %7691 = vrcp.f32 %v4540_v7  ;;  %v4544_v24 = vadd.f32 1.0, %v7660_v37 }
 0x725   : > { %10975 = vst [vmem:[#allocation96_spill] sm:$0xff] %v10043_v42  ;;  %v10045_v19 = vpop.f32.mrf.mxu0  ;;  %v7664_v28 = vpop.eup %7663  ;;  %7693 = vrcp.f32 %v4539_v62  ;;  %v4543_v15 = vadd.f32 1.0, %v7662_v55  ;;  %v4710_v62 = vmul.f32 %v9968_v2, %v9875_v11  ;;  %v6595_v55 = vmul.f32 -1.442695, %v9963_v8 }
 0x726   : > { %10976 = vst [vmem:[#allocation97_spill] sm:$0xff] %v10045_v19  ;;  %v10047_v10 = vpop.f32.mrf.mxu1  ;;  %v10051_v23 = vpop.eup %7665  ;;  %7695 = vrcp.f32 %v4541_v59  ;;  %v4545_v45 = vadd.f32 1.0, %v7664_v28  ;;  %v4712_v28 = vmul.f32 %v9975_v58, %v9877_v56  ;;  %v4714_v2 = vmul.f32 %v9988_v60, %v9887_v17 }
 0x727   : > { %10977 = vst [vmem:[#allocation98_spill] sm:$0xff] %v10047_v10  ;;  %v10049_v47 = vpop.f32.mrf.mxu0  ;;  %v7668_v30 = vpop.eup %7667  ;;  %7697 = vrcp.f32 %v4542_v33  ;;  %v4716_v11 = vmul.f32 %v9995_v44, %v9889_v40  ;;  %v6598_v56 = vmul.f32 -1.442695, %v9971_v0  ;;  %v6602_v17 = vmul.f32 -1.442695, %v9991_v29 }
 0x728   : > { %10978 = vst [vmem:[#allocation99_spill] sm:$0xff] %v10049_v47  ;;  %v10053_v1 = vpop.f32.mrf.mxu1  ;;  %v10057_v38 = vpop.eup %7669  ;;  %7699 = vrcp.f32 %v4544_v24  ;;  %v4546_v7 = vadd.f32 1.0, %v7668_v30  ;;  %v4713_v24 = vmul.f32 %v9985_v35, %v9883_v34  ;;  %v6599_v34 = vmul.f32 -1.442695, %v9981_v9 }
 0x729   : > { %10979 = vst [vmem:[#allocation100_spill] sm:$0xff] %v10053_v1  ;;  %v10055_v19 = vpop.f32.mrf.mxu0  ;;  %v7672_v21 = vpop.eup %7671  ;;  %7701 = vrcp.f32 %v4543_v15 }
 0x72a   : > { %10980 = vst [vmem:[#allocation101_spill] sm:$0xff] %v10055_v19  ;;  %v10059_v10 = vpop.f32.mrf.mxu1  ;;  %v10064_v37 = vpop.eup %7673  ;;  %7703 = vrcp.f32 %v4545_v45  ;;  %v4548_v30 = vadd.f32 1.0, %v7672_v21 }
 0x72b   : > { %10981 = vst [vmem:[#allocation102_spill] sm:$0xff] %v10059_v10  ;;  %v10061_v47 = vpop.f32.mrf.mxu0  ;;  %v10066_v1 = vpop.eup %7675  ;;  %7705 = vpow2.f32 %v6594_v48 }
 0x72c   : > { %10982 = vst [vmem:[#allocation103_spill] sm:$0xff] %v10061_v47  ;;  %v4134_v19 = vpop.f32.mrf.mxu1  ;;  %v7678_v33 = vpop.eup %7677  ;;  %v4711_v47 = vmul.f32 %v9978_v49, %v9881_v51  ;;  %v4715_v49 = vmul.f32 %v9998_v31, %v9893_v39  ;;  %v4717_v51 = vmul.f32 %v10005_v18, %v9895_v4  ;;  %7707 = vrcp.f32 %v4546_v7 }
 0x72d   : > { %v4247_v59 = vpop.f32.mrf.mxu0  ;;  %v7680_v42 = vpop.eup %7679  ;;  %7709 = vpow2.f32 %v6595_v55  ;;  %v4774_v40 = vmul.f32 %v4710_v62, %v4134_v19  ;;  %v4547_v48 = vadd.f32 1.0, %v7678_v33 }
 0x72e   : > { %v4136_v10 = vpop.f32.mrf.mxu1  ;;  %v10082_v15 = vpop.eup %7681  ;;  %7711 = vrcp.f32 %v4548_v30  ;;  %v4776_v31 = vmul.f32 %v4712_v28, %v4247_v59  ;;  %v4549_v29 = vadd.f32 1.0, %v7680_v42  ;;  %v6603_v28 = vmul.f32 -1.442695, %v10001_v63 }
 0x72f   : > { %v4249_v58 = vpop.f32.mrf.mxu0  ;;  %v10089_v60 = vpop.eup %7683  ;;  %7713 = vpow2.f32 %v6598_v56  ;;  %v4775_v18 = vmul.f32 %v4711_v47, %v4136_v10  ;;  %v4718_v47 = vmul.f32 %v10007_v46, %v9899_v43  ;;  %v4719_v46 = vmul.f32 %v10016_v3, %v9905_v54 }
 0x730   : > { %v4138_v35 = vpop.f32.mrf.mxu1  ;;  %v10092_v21 = vpop.eup %7685  ;;  %v4777_v19 = vmul.f32 %v4713_v24, %v4249_v58  ;;  %7715 = vpow2.f32 %v6599_v34  ;;  %v4722_v24 = vmul.f32 %v10051_v23, %v9911_v61  ;;  %v4724_v43 = vmul.f32 %v10057_v38, %v9913_v16 }
 0x731   : > { %v4778_v44 = vmul.f32 %v4714_v2, %v4138_v35  ;;  %v4251_v45 = vpop.f32.mrf.mxu0  ;;  %v10094_v4 = vpop.eup %7687  ;;  %7717 = vrcp.f32 %v4547_v48  ;;  %v4723_v58 = vmul.f32 %v10064_v37, %v9915_v36  ;;  %v4721_v54 = vmul.f32 %v10023_v25, %v9907_v52 }
 0x732   : > { %v4780_v39 = vmul.f32 %v4716_v11, %v4251_v45  ;;  %v4140_v8 = vpop.f32.mrf.mxu1  ;;  %v10096_v55 = vpop.eup %7689  ;;  %7719 = vpow2.f32 %v6602_v17  ;;  %v4725_v16 = vmul.f32 %v10066_v1, %v9917_v32 }
 0x733   : > { %v4838_v7 = vpack.c.bf16 %v4778_v44, %v4774_v40  ;;  %v4779_v9 = vmul.f32 %v4715_v49, %v4140_v8  ;;  %v4253_v0 = vpop.f32.mrf.mxu0  ;;  %v10098_v41 = vpop.eup %7691  ;;  %7721 = vrcp.f32 %v4549_v29 }
 0x734   : > { %v4840_v62 = vpack.c.bf16 %v4780_v39, %v4776_v31  ;;  %v4781_v2 = vmul.f32 %v4717_v51, %v4253_v0  ;;  %v4144_v35 = vpop.f32.mrf.mxu1  ;;  %v10101_v30 = vpop.eup %7693  ;;  %v4720_v0 = vmul.f32 %v10014_v12, %v9901_v50  ;;  %7723 = vpow2.f32 %v6603_v28 }
 0x735   : > { %v4839_v59 = vpack.c.bf16 %v4779_v9, %v4775_v18  ;;  %v4257_v33 = vpop.f32.mrf.mxu0  ;;  %v10105_v42 = vpop.eup %7695  ;;  %v6606_v9 = vmul.f32 -1.442695, %v10010_v53  ;;  %v6607_v12 = vmul.f32 -1.442695, %v10019_v26  ;;  %v4782_v23 = vmul.f32 %v4718_v47, %v4144_v35 }
 0x736   : > { %v4841_v8 = vpack.c.bf16 %v4781_v2, %v4777_v19  ;;  %v4146_v10 = vpop.f32.mrf.mxu1  ;;  %v10112_v56 = vpop.eup %7697  ;;  %v4784_v36 = vmul.f32 %v4720_v0, %v4257_v33  ;;  %v4726_v18 = vmul.f32 %v10082_v15, %v9921_v20  ;;  %v4727_v35 = vmul.f32 %v10092_v21, %v9927_v27  ;;  %v10984_v15 = vld [vmem:[#allocation64_spill] sm:$0xff]  ;;  %v10987_v0 = vld [vmem:[#allocation57_spill] sm:$0xff] }
 0x737   : > { %v4259_v11 = vpop.f32.mrf.mxu0  ;;  %5286 = vmatprep.mubr.bf16.mxu1 %v4839_v59  ;;  %v10120_v61 = vpop.eup %7699  ;;  %7725 = vpow2.f32 %v6606_v9  ;;  %v4783_v34 = vmul.f32 %v4719_v46, %v4146_v10  ;;  %v4729_v28 = vmul.f32 %v10094_v4, %v9929_v6  ;;  %v10983_v59 = vld [vmem:[#allocation63_spill] sm:$0xff]  ;;  %v10988_v46 = vld [vmem:[#allocation58_spill] sm:$0xff] }
 0x738   : > { %5399 = vmatprep.mubr.bf16.mxu0 %v4841_v8  ;;  %v4148_v50 = vpop.f32.mrf.mxu1  ;;  %5287 = vmatmul.mubr.bf16.vlgmr.msra.gmra.mxu1 %v4838_v7  ;;  %v10124_v3 = vpop.eup %7701  ;;  %v4785_v45 = vmul.f32 %v4721_v54, %v4259_v11  ;;  %7727 = vpow2.f32 %v6607_v12  ;;  %v4728_v7 = vmul.f32 %v10089_v60, %v9923_v13  ;;  %v4732_v13 = vmul.f32 %v10098_v41, %v10984_v15  ;;  %v10985_v60 = vld [vmem:[#allocation65_spill] sm:$0xff]  ;;  %v10986_v8 = vld [vmem:[#allocation66_spill] sm:$0xff] }
 0x739   : > { %v4786_v49 = vmul.f32 %v4722_v24, %v4148_v50  ;;  %v4261_v51 = vpop.f32.mrf.mxu0  ;;  %5400 = vmatmul.mubr.bf16.vlgmr.msra.gmra.mxu0 %v4840_v62  ;;  %6941 = vmatpush1.bf16.msra.mxu1 %v9761_v5  ;;  %v10131_v37 = vpop.eup %7703  ;;  %v4733_v10 = vmul.f32 %v10105_v42, %v10986_v8 }
 0x73a   : > { %v4788_v29 = vmul.f32 %v4724_v43, %v4261_v51  ;;  %v4150_v38 = vpop.f32.mrf.mxu1  ;;  %6926 = vmatprep.subr.bf16.mxu1 %v9775_v22  ;;  %v7706_v44 = vpop.eup %7705 }
 0x73b   : > { %v4842_v17 = vpack.c.bf16 %v4786_v49, %v4782_v23  ;;  %v4787_v40 = vmul.f32 %v4723_v58, %v4150_v38  ;;  %v4263_v5 = vpop.f32.mrf.mxu0  ;;  %v10133_v25 = vpop.eup %7707  ;;  %v4550_v32 = vadd.f32 1.0, %v7706_v44 }
 0x73c   : > { %v4844_v48 = vpack.c.bf16 %v4788_v29, %v4784_v36  ;;  %v4789_v31 = vmul.f32 %v4725_v16, %v4263_v5  ;;  %v4154_v52 = vpop.f32.mrf.mxu1  ;;  %v7710_v22 = vpop.eup %7709  ;;  %v10990_v5 = vld [vmem:[#allocation67_spill] sm:$0xff] }
 0x73d   : > { %v4843_v1 = vpack.c.bf16 %v4787_v40, %v4783_v34  ;;  %v4267_v39 = vpop.f32.mrf.mxu0  ;;  %6942 = vmatpush1.bf16.msra.mxu1 %v9780_v14  ;;  %v7712_v2 = vpop.eup %7711  ;;  %v4730_v14 = vmul.f32 %v10096_v55, %v10983_v59  ;;  %v4551_v33 = vadd.f32 1.0, %v7710_v22  ;;  %7729 = vrcp.f32 %v4550_v32  ;;  %v10992_v32 = vld [vmem:[#allocation60_spill] sm:$0xff]  ;;  %v10994_v22 = vld [vmem:[#allocation70_spill] sm:$0xff] }
 0x73e   : > { %v4845_v19 = vpack.c.bf16 %v4789_v31, %v4785_v45  ;;  %v4156_v62 = vpop.f32.mrf.mxu1  ;;  %6927 = vmatprep.subr.bf16.mxu1 %v9788_v57  ;;  %v7714_v20 = vpop.eup %7713  ;;  %v4731_v57 = vmul.f32 %v10101_v30, %v10985_v60  ;;  %v4790_v21 = vmul.f32 %v4726_v18, %v4154_v52  ;;  %v4792_v41 = vmul.f32 %v4728_v7, %v4267_v39  ;;  %v10991_v45 = vld [vmem:[#allocation68_spill] sm:$0xff]  ;;  %v10995_v7 = vld [vmem:[#allocation71_spill] sm:$0xff] }
 0x73f   : > { %v4269_v47 = vpop.f32.mrf.mxu0  ;;  %5296 = vmatprep.mubr.bf16.mxu1 %v4843_v1  ;;  %v4554_v6 = vadd.f32 1.0, %v7714_v20  ;;  %v7716_v24 = vpop.eup %7715  ;;  %7731 = vrcp.f32 %v4551_v33  ;;  %v4791_v9 = vmul.f32 %v4727_v35, %v4156_v62  ;;  %v4734_v44 = vmul.f32 %v10112_v56, %v10990_v5  ;;  %v10993_v1 = vld [vmem:[#allocation69_spill] sm:$0xff]  ;;  %v10998_v33 = vld [vmem:[#allocation74_spill] sm:$0xff]  ;;  %v11006_v5 = vld [vmem:[#allocation75_spill] sm:$0xff] }
 0x740   : > { %5409 = vmatprep.mubr.bf16.mxu0 %v4845_v19  ;;  %v4158_v27 = vpop.f32.mrf.mxu1  ;;  %5297 = vmatmul.mubr.bf16.gmra.mxu1 %v4842_v17  ;;  %v7718_v42 = vpop.eup %7717  ;;  %v4555_v43 = vadd.f32 1.0, %v7716_v24  ;;  %v4793_v49 = vmul.f32 %v4729_v28, %v4269_v47  ;;  %v10989_v17 = vld [vmem:[#allocation59_spill] sm:$0xff]  ;;  %v4735_v39 = vmul.f32 %v10124_v3, %v10993_v1  ;;  %v4737_v18 = vmul.f32 %v10131_v37, %v10994_v22  ;;  %v10996_v28 = vld [vmem:[#allocation72_spill] sm:$0xff] }
 0x741   : > { %v4794_v4 = vmul.f32 %v4730_v14, %v4158_v27  ;;  %v4271_v55 = vpop.f32.mrf.mxu0  ;;  %5410 = vmatmul.mubr.bf16.gmra.mxu0 %v4844_v48  ;;  %6943 = vmatpush1.bf16.msra.mxu1 %v10987_v0  ;;  %7733 = vrcp.f32 %v4554_v6  ;;  %v7720_v23 = vpop.eup %7719  ;;  %v4736_v48 = vmul.f32 %v10120_v61, %v10991_v45  ;;  %v4738_v19 = vmul.f32 %v10133_v25, %v10995_v7  ;;  %v10997_v61 = vld [vmem:[#allocation73_spill] sm:$0xff]  ;;  %v11000_v27 = vld [vmem:[#allocation62_spill] sm:$0xff]  ;;  %v11001_v0 = vld [vmem:[#allocation88_spill] sm:$0xff] }
 0x742   : > { %v4796_v11 = vmul.f32 %v4732_v13, %v4271_v55  ;;  %v4160_v30 = vpop.f32.mrf.mxu1  ;;  %6928 = vmatprep.subr.bf16.mxu1 %v10988_v46  ;;  %v7722_v36 = vpop.eup %7721  ;;  %7735 = vrcp.f32 %v4555_v43  ;;  %v4558_v29 = vadd.f32 1.0, %v7720_v23  ;;  %v4740_v59 = vmul.f32 %v7712_v2, %v10996_v28  ;;  %v10999_v25 = vld [vmem:[#allocation61_spill] sm:$0xff]  ;;  %v11002_v46 = vld [vmem:[#allocation90_spill] sm:$0xff]  ;;  %v11007_v45 = vld [vmem:[#allocation79_spill] sm:$0xff] }
 0x743   : > { %v4846_v58 = vpack.c.bf16 %v4794_v4, %v4790_v21  ;;  %v4795_v50 = vmul.f32 %v4731_v57, %v4160_v30  ;;  %v4273_v12 = vpop.f32.mrf.mxu0  ;;  %v7724_v40 = vpop.eup %7723  ;;  %v4739_v14 = vmul.f32 %v7718_v42, %v10997_v61  ;;  %v4741_v47 = vmul.f32 %v7722_v36, %v10998_v33  ;;  %v11004_v36 = vld [vmem:[#allocation92_spill] sm:$0xff]  ;;  %v11012_v61 = vld [vmem:[#allocation98_spill] sm:$0xff] }
 0x744   : > { %v4848_v51 = vpack.c.bf16 %v4796_v11, %v4792_v41  ;;  %v4797_v54 = vmul.f32 %v4733_v10, %v4273_v12  ;;  %v4164_v16 = vpop.f32.mrf.mxu1  ;;  %v4559_v62 = vadd.f32 1.0, %v7724_v40  ;;  %v7726_v56 = vpop.eup %7725  ;;  %7737 = vrcp.f32 %v4558_v29  ;;  %v11003_v12 = vld [vmem:[#allocation78_spill] sm:$0xff]  ;;  %v7893_v7 = vld [vmem:[%s8384_s10 + $0x104] ss:$8 sps:$4 sm:$0xff]  }
 0x745   : > { %v4847_v38 = vpack.c.bf16 %v4795_v50, %v4791_v9  ;;  %v4277_v34 = vpop.f32.mrf.mxu0  ;;  %6944 = vmatpush1.bf16.msra.mxu1 %v10989_v17  ;;  %v4562_v3 = vadd.f32 1.0, %v7726_v56  ;;  %v4798_v15 = vmul.f32 %v4734_v44, %v4164_v16  ;;  %v7728_v60 = vpop.eup %7727  ;;  %v6610_v24 = vmul.f32 -1.442695, %v11001_v0  ;;  %v11011_v28 = vld [vmem:[#allocation96_spill] sm:$0xff] }
 0x746   : > { %v4849_v31 = vpack.c.bf16 %v4797_v54, %v4793_v49  ;;  %v4166_v52 = vpop.f32.mrf.mxu1  ;;  %6929 = vmatprep.subr.bf16.mxu1 %v10992_v32  ;;  %7739 = vrcp.f32 %v4559_v62  ;;  %v4800_v57 = vmul.f32 %v4736_v48, %v4277_v34  ;;  %v4563_v6 = vadd.f32 1.0, %v7728_v60  ;;  %v7891_v54 = vld [vmem:[%s8384_s10 + $0x114] ss:$8 sps:$4 sm:$0xff]   ;;  %v7892_v32 = vld [vmem:[%s8384_s10 + $0x110] ss:$8 sps:$4 sm:$0xff]  }
 0x747   : > { %v4279_v35 = vpop.f32.mrf.mxu0  ;;  %5306 = vmatprep.mubr.bf16.mxu1 %v4847_v38  ;;  %v4799_v8 = vmul.f32 %v4735_v39, %v4166_v52  ;;  %7741 = vrcp.f32 %v4562_v3  ;;  %v6611_v42 = vmul.f32 -1.442695, %v11002_v46  ;;  %v6597_v23 = vmul.f32 -1.442695, %v11003_v12  ;;  %v11005_v34 = vld [vmem:[#allocation82_spill] sm:$0xff]  ;;  %v11009_v39 = vld [vmem:[#allocation77_spill] sm:$0xff] }
 0x748   : > { %5419 = vmatprep.mubr.bf16.mxu0 %v4849_v31  ;;  %v4168_v20 = vpop.f32.mrf.mxu1  ;;  %5307 = vmatmul.mubr.bf16.gmra.mxu1 %v4846_v58  ;;  %v4801_v41 = vmul.f32 %v4737_v18, %v4279_v35  ;;  %7743 = vrcp.f32 %v4563_v6  ;;  %v7890_v58 = vld [vmem:[%s8384_s10 + $0x120] ss:$8 sps:$4 sm:$0xff]   ;;  %v6614_v29 = vmul.f32 -1.442695, %v11004_v36  ;;  %v6601_v17 = vmul.f32 -1.442695, %v11005_v34 }
 0x749   : > { %v4802_v37 = vmul.f32 %v4738_v19, %v4168_v20  ;;  %v4281_v13 = vpop.f32.mrf.mxu0  ;;  %5420 = vmatmul.mubr.bf16.gmra.mxu0 %v4848_v51  ;;  %6945 = vmatpush1.bf16.msra.mxu1 %v10999_v25  ;;  %7745 = vpow2.f32 %v6610_v24  ;;  %v11008_v31 = vld [vmem:[#allocation94_spill] sm:$0xff]  ;;  %v11010_v19 = vld [vmem:[#allocation81_spill] sm:$0xff] }
 0x74a   : > { %v4804_v2 = vmul.f32 %v4740_v59, %v4281_v13  ;;  %v4170_v10 = vpop.f32.mrf.mxu1  ;;  %6930 = vmatprep.subr.bf16.mxu1 %v11000_v27  ;;  %v7730_v50 = vpop.eup %7729  ;;  %7747 = vpow2.f32 %v6611_v42  ;;  %v6615_v52 = vmul.f32 -1.442695, %v11008_v31  ;;  %v6618_v59 = vmul.f32 -1.442695, %v11011_v28  ;;  %v11013_v13 = vld [vmem:[#allocation76_spill] sm:$0xff] }
 0x74b   : > { %v4850_v21 = vpack.c.bf16 %v4802_v37, %v4798_v15  ;;  %v4803_v4 = vmul.f32 %v4739_v14, %v4170_v10  ;;  %v4283_v55 = vpop.f32.mrf.mxu0  ;;  %v4742_v44 = vmul.f32 %v7730_v50, %v11006_v5  ;;  %7749 = vpow2.f32 %v6597_v23  ;;  %v7894_v15 = vld [vmem:[%s8384_s10 + $0x100] ss:$8 sps:$4 sm:$0xff]   ;;  %v11020_v5 = vld [vmem:[#allocation85_spill] sm:$0xff] }
 0x74c   : > { %v4852_v9 = vpack.c.bf16 %v4804_v2, %v4800_v57  ;;  %v4805_v11 = vmul.f32 %v4741_v47, %v4283_v55  ;;  %v4174_v30 = vpop.f32.mrf.mxu1  ;;  %v7732_v16 = vpop.eup %7731  ;;  %7751 = vpow2.f32 %v6614_v29  ;;  %v6619_v14 = vmul.f32 -1.442695, %v11012_v61  ;;  %v11014_v10 = vld [vmem:[#allocation100_spill] sm:$0xff] }
 0x74d   : > { %v4851_v43 = vpack.c.bf16 %v4803_v4, %v4799_v8  ;;  %6946 = vmatpush1.bf16.msra.mxu1 %v7890_v58  ;;  %v4743_v22 = vmul.f32 %v7732_v16, %v11009_v39  ;;  %v4806_v35 = vmul.f32 %v4742_v44, %v4174_v30  ;;  %7753 = vpow2.f32 %v6601_v17  ;;  %v10190_v60 = vpop.f32.mrf.mxu0  ;;  %v7895_v8 = vld [vmem:[%s8384_s10 + $0x1f4] ss:$8 sps:$4 sm:$0xff]   ;;  %v11015_v4 = vld [vmem:[#allocation80_spill] sm:$0xff] }
 0x74e   : > { %v4853_v49 = vpack.c.bf16 %v4805_v11, %v4801_v41  ;;  %v4176_v51 = vpop.f32.mrf.mxu1  ;;  %6931 = vmatprep.subr.bf16.mxu1 %v7891_v54  ;;  %v7734_v38 = vpop.eup %7733  ;;  %7755 = vpow2.f32 %v6615_v52  ;;  %v6596_v25 = vmul.f32 -1.442695, %v11013_v13  ;;  %v6622_v27 = vmul.f32 -1.442695, %v11014_v10  ;;  %v11016_v41 = vld [vmem:[#allocation83_spill] sm:$0xff]  ;;  %v11017_v30 = vld [vmem:[#allocation102_spill] sm:$0xff] }
 0x74f   : > { %5316 = vmatprep.mubr.bf16.mxu1 %v4851_v43  ;;  %v4746_v48 = vmul.f32 %v7734_v38, %v11007_v45  ;;  %v7736_v1 = vpop.eup %7735  ;;  %v4807_v47 = vmul.f32 %v4743_v22, %v4176_v51  ;;  %v6600_v55 = vmul.f32 -1.442695, %v11015_v4  ;;  %7757 = vpow2.f32 %v6618_v59  ;;  %v7896_v43 = vld [vmem:[%s8384_s10 + $0x1f0] ss:$8 sps:$4 sm:$0xff]   ;;  %v11018_v50 = vld [vmem:[#allocation84_spill] sm:$0xff]  ;;  %v11019_v51 = vld [vmem:[#allocation87_spill] sm:$0xff]  ;;  %v10202_v16 = vpop.f32.mrf.mxu0 }
 0x750   : > { %5429 = vmatprep.mubr.bf16.mxu0 %v4853_v49  ;;  %v4178_v40 = vpop.f32.mrf.mxu1  ;;  %5317 = vmatmul.mubr.bf16.gmra.mxu1 %v4850_v21  ;;  %v4747_v62 = vmul.f32 %v7736_v1, %v11010_v19  ;;  %7759 = vpow2.f32 %v6619_v14  ;;  %v6623_v42 = vmul.f32 -1.442695, %v11017_v30  ;;  %v6604_v23 = vmul.f32 -1.442695, %v11018_v50  ;;  %v11021_v45 = vld [vmem:[#allocation86_spill] sm:$0xff] }
 0x751   : > { %5430 = vmatmul.mubr.bf16.gmra.mxu0 %v4852_v9  ;;  %6947 = vmatpush1.bf16.msra.mxu1 %v7892_v32  ;;  %v4810_v56 = vmul.f32 %v4746_v48, %v4178_v40  ;;  %v7738_v37 = vpop.eup %7737  ;;  %7761 = vpow2.f32 %v6596_v25  ;;  %v6609_v54 = vmul.f32 -1.442695, %v11019_v51  ;;  %v6605_v44 = vmul.f32 -1.442695, %v11020_v5  ;;  %v7898_v39 = vld [vmem:[%s8384_s10 + $0x1e0] ss:$8 sps:$4 sm:$0xff]  }
 0x752   : > { %v4180_v18 = vpop.f32.mrf.mxu1  ;;  %6932 = vmatprep.subr.bf16.mxu1 %v7893_v7  ;;  %v4750_v9 = vmul.f32 %v7738_v37, %v11016_v41  ;;  %7763 = vpow2.f32 %v6622_v27  ;;  %v7899_v7 = vld [vmem:[%s8384_s10 + $0x1d4] ss:$8 sps:$4 sm:$0xff]   ;;  %v7901_v25 = vld [vmem:[%s8384_s10 + $0x1c4] ss:$8 sps:$4 sm:$0xff]  }
 0x753   : > { %v4854_v20 = vpack.c.bf16 %v4810_v56, %v4806_v35  ;;  %v4811_v3 = vmul.f32 %v4747_v62, %v4180_v18  ;;  %v7740_v2 = vpop.eup %7739  ;;  %7765 = vpow2.f32 %v6600_v55 }
 0x754   : > { %v4184_v33 = vpop.f32.mrf.mxu1  ;;  %v7742_v21 = vpop.eup %7741  ;;  %v4751_v49 = vmul.f32 %v7740_v2, %v10001_v63  ;;  %v6608_v63 = vmul.f32 -1.442695, %v11021_v45  ;;  %7767 = vpow2.f32 %v6623_v42  ;;  %v7903_v42 = vld [vmem:[%s8384_s10 + $0x1b4] ss:$8 sps:$4 sm:$0xff]  }
 0x755   : > { %6948 = vmatpush1.bf16.msra.mxu1 %v7894_v15  ;;  %v4855_v6 = vpack.c.bf16 %v4811_v3, %v4807_v47  ;;  %v4754_v11 = vmul.f32 %v7742_v21, %v10010_v53  ;;  %v7744_v58 = vpop.eup %7743  ;;  %v7897_v53 = vld [vmem:[%s8384_s10 + $0x1e4] ss:$8 sps:$4 sm:$0xff]   ;;  %v4814_v17 = vmul.f32 %v4750_v9, %v4184_v33  ;;  %7769 = vpow2.f32 %v6604_v23  ;;  %v7900_v47 = vld [vmem:[%s8384_s10 + $0x1d0] ss:$8 sps:$4 sm:$0xff]  }
 0x756   : > { %v4186_v57 = vpop.f32.mrf.mxu1  ;;  %6933 = vmatprep.subr.bf16.mxu1 %v7895_v8  ;;  %v4755_v38 = vmul.f32 %v7744_v58, %v10019_v26  ;;  %v7746_v48 = vpop.eup %7745  ;;  %7771 = vpow2.f32 %v6609_v54  ;;  %v11022_v8 = vld [vmem:[#allocation95_spill] sm:$0xff] }
 0x757   : > { %5326 = vmatprep.mubr.bf16.mxu1 %v4855_v6  ;;  %v4815_v52 = vmul.f32 %v4751_v49, %v4186_v57  ;;  %v7748_v22 = vpop.eup %7747  ;;  %v10209_v26 = vpop.f32.mrf.mxu0  ;;  %7773 = vpow2.f32 %v6605_v44  ;;  %v4566_v59 = vadd.f32 1.0, %v7746_v48  ;;  %v6617_v2 = vmul.f32 -1.442695, %v11022_v8  ;;  %v11023_v21 = vld [vmem:[#allocation91_spill] sm:$0xff] }
 0x758   : > { %v4188_v24 = vpop.f32.mrf.mxu1  ;;  %5327 = vmatmul.mubr.bf16.gmra.mxu1 %v4854_v20  ;;  %v7750_v19 = vpop.eup %7749  ;;  %v4567_v62 = vadd.f32 1.0, %v7748_v22  ;;  %7775 = vpow2.f32 %v6608_v63  ;;  %v6613_v55 = vmul.f32 -1.442695, %v11023_v21  ;;  %v7905_v48 = vld [vmem:[%s8384_s10 + $0x1a4] ss:$8 sps:$4 sm:$0xff]  }
 0x759   : > { %6949 = vmatpush2.bf16.msra.mxu1 %v7896_v43  ;;  %v4818_v40 = vmul.f32 %v4754_v11, %v4188_v24  ;;  %v7752_v56 = vpop.eup %7751  ;;  %v4553_v3 = vadd.f32 1.0, %v7750_v19  ;;  %v10215_v15 = vpop.f32.mrf.mxu0  ;;  %v7902_v24 = vld [vmem:[%s8384_s10 + $0x1c0] ss:$8 sps:$4 sm:$0xff]  }
 0x75a   : > { %v4190_v29 = vpop.f32.mrf.mxu1  ;;  %6934 = vmatprep.subr.bf16.mxu1 %v7897_v53  ;;  %v7754_v14 = vpop.eup %7753  ;;  %v4570_v33 = vadd.f32 1.0, %v7752_v56  ;;  %7777 = vrcp.f32 %v4567_v62  ;;  %v7904_v53 = vld [vmem:[%s8384_s10 + $0x1b0] ss:$8 sps:$4 sm:$0xff]  }
 0x75b   : > { %v4858_v32 = vpack.c.bf16 %v4818_v40, %v4814_v17  ;;  %v4819_v1 = vmul.f32 %v4755_v38, %v4190_v29  ;;  %v7756_v20 = vpop.eup %7755  ;;  %v4557_v27 = vadd.f32 1.0, %v7754_v14  ;;  %v10223_v9 = vpop.f32.mrf.mxu0  ;;  %v11024_v17 = vld [vmem:[#allocation93_spill] sm:$0xff] }
 0x75c   : > { %v10211_v18 = vpop.f32.mrf.mxu1  ;;  %7779 = vrcp.f32 %v4570_v33  ;;  %v4571_v57 = vadd.f32 1.0, %v7756_v20  ;;  %v7758_v6 = vpop.eup %7757  ;;  %v6616_v40 = vmul.f32 -1.442695, %v11024_v17 }
 0x75d   : > { %6950 = vmatpush2.bf16.msra.mxu1 %v7898_v39  ;;  %v4859_v35 = vpack.c.bf16 %v4819_v1, %v4815_v52  ;;  %7781 = vrcp.f32 %v4566_v59  ;;  %v7760_v41 = vpop.eup %7759  ;;  %v4574_v49 = vadd.f32 1.0, %v7758_v6  ;;  %v10230_v44 = vpop.f32.mrf.mxu0  ;;  %v11025_v1 = vld [vmem:[#allocation103_spill] sm:$0xff] }
 0x75e   : > { %6935 = vmatprep.subr.bf16.mxu1 %v7899_v7  ;;  %v10217_v37 = vpop.f32.mrf.mxu1  ;;  %7783 = vrcp.f32 %v4571_v57  ;;  %v7762_v43 = vpop.eup %7761  ;;  %v4575_v58 = vadd.f32 1.0, %v7760_v41  ;;  %v6625_v39 = vmul.f32 -1.442695, %v11025_v1  ;;  %v11026_v7 = vld [vmem:[#allocation89_spill] sm:$0xff]  ;;  %v7906_v59 = vld [vmem:[%s8384_s10 + $0x1a0] ss:$8 sps:$4 sm:$0xff]  }
 0x75f   : > { %5336 = vmatprep.mubr.bf16.mxu1 %v4859_v35  ;;  %7785 = vrcp.f32 %v4553_v3  ;;  %v7764_v23 = vpop.eup %7763  ;;  %v6612_v19 = vmul.f32 -1.442695, %v11026_v7  ;;  %v11027_v35 = vld [vmem:[#allocation99_spill] sm:$0xff]  ;;  %v7907_v3 = vld [vmem:[%s8384_s10 + $0x194] ss:$8 sps:$4 sm:$0xff]  }
 0x760   : > { %5337 = vmatmul.mubr.bf16.gmra.mxu1 %v4858_v32  ;;  %v10225_v11 = vpop.f32.mrf.mxu1  ;;  %7787 = vpow2.f32 %v6617_v2  ;;  %v7766_v54 = vpop.eup %7765  ;;  %v4578_v29 = vadd.f32 1.0, %v7764_v23  ;;  %v6621_v56 = vmul.f32 -1.442695, %v11027_v35 }
 0x761   : > { %6951 = vmatpush2.bf16.msra.mxu1 %v7900_v47  ;;  %7789 = vrcp.f32 %v4557_v27  ;;  %v7768_v38 = vpop.eup %7767  ;;  %v4556_v33 = vadd.f32 1.0, %v7766_v54  ;;  %v10237_v47 = vpop.f32.mrf.mxu0  ;;  %v4552_v27 = vadd.f32 1.0, %v7762_v43 }
 0x762   : > { %6936 = vmatprep.subr.bf16.mxu1 %v7901_v25  ;;  %7791 = vpow2.f32 %v6613_v55  ;;  %v4200_v63 = vpop.f32.mrf.mxu1  ;;  %v7770_v52 = vpop.eup %7769  ;;  %v4579_v32 = vadd.f32 1.0, %v7768_v38 }
 0x763   : > { %7793 = vrcp.f32 %v4575_v58  ;;  %v7772_v22 = vpop.eup %7771  ;;  %v11028_v58 = vld [vmem:[#allocation101_spill] sm:$0xff] }
 0x764   : > { %7795 = vrcp.f32 %v4578_v29  ;;  %v7774_v62 = vpop.eup %7773  ;;  %v10239_v20 = vpop.f32.mrf.mxu1  ;;  %v4565_v57 = vadd.f32 1.0, %v7772_v22  ;;  %v6624_v23 = vmul.f32 -1.442695, %v11028_v58  ;;  %v7909_v29 = vld [vmem:[%s8384_s10 + $0x184] ss:$8 sps:$4 sm:$0xff]  }
 0x765   : > { %6952 = vmatpush2.bf16.msra.mxu1 %v7902_v24  ;;  %7797 = vrcp.f32 %v4574_v49  ;;  %v7776_v14 = vpop.eup %7775  ;;  %v4561_v55 = vadd.f32 1.0, %v7774_v62  ;;  %v7908_v24 = vld [vmem:[%s8384_s10 + $0x190] ss:$8 sps:$4 sm:$0xff]   ;;  %v10245_v49 = vpop.f32.mrf.mxu0 }
 0x766   : > { %6937 = vmatprep.subr.bf16.mxu1 %v7903_v42  ;;  %7799 = vrcp.f32 %v4579_v32  ;;  %v4206_v54 = vpop.f32.mrf.mxu1  ;;  %v11029_v32 = vld [vmem:[#allocation97_spill] sm:$0xff] }
 0x767   : > { %7801 = vpow2.f32 %v6616_v40  ;;  %v7778_v25 = vpop.eup %7777 }
 0x768   : > { %7803 = vpow2.f32 %v6625_v39  ;;  %v4759_v43 = vmul.f32 %v7778_v25, %v11002_v46 }
 0x769   : > { %6953 = vmatpush2.bf16.msra.mxu1 %v7904_v53  ;;  %v7780_v2 = vpop.eup %7779  ;;  %7805 = vpow2.f32 %v6612_v19 }
 0x76a   : > { %6938 = vmatprep.subr.bf16.mxu1 %v7905_v48  ;;  %v7782_v6 = vpop.eup %7781  ;;  %7807 = vpow2.f32 %v6621_v56  ;;  %v4762_v42 = vmul.f32 %v7780_v2, %v11004_v36  ;;  %v6620_v36 = vmul.f32 -1.442695, %v11029_v32  ;;  %v4823_v19 = vmul.f32 %v4759_v43, %v10217_v37  ;;  %v7910_v56 = vld [vmem:[%s8384_s10 + $0x180] ss:$8 sps:$4 sm:$0xff]  }
 0x76b   : > { %v7784_v41 = vpop.eup %7783  ;;  %7809 = vrcp.f32 %v4556_v33  ;;  %v4758_v48 = vmul.f32 %v7782_v6, %v11001_v0  ;;  %v4564_v33 = vadd.f32 1.0, %v7776_v14 }
 0x76c   : > { %v7786_v53 = vpop.eup %7785  ;;  %7811 = vrcp.f32 %v4565_v57  ;;  %v4763_v38 = vmul.f32 %v7784_v41, %v11008_v31  ;;  %v4826_v39 = vmul.f32 %v4762_v42, %v10225_v11  ;;  %v10256_v31 = vpop.f32.mrf.mxu0  ;;  %v4560_v11 = vadd.f32 1.0, %v7770_v52 }
 0x76d   : > { %6954 = vmatpush2.bf16.msra.mxu1 %v7906_v59  ;;  %v7788_v40 = vpop.eup %7787  ;;  %7813 = vrcp.f32 %v4552_v27  ;;  %v4822_v46 = vmul.f32 %v4758_v48, %v10211_v18 }
 0x76e   : > { %6939 = vmatprep.subr.bf16.mxu1 %v7907_v3  ;;  %v7790_v22 = vpop.eup %7789  ;;  %7815 = vrcp.f32 %v4561_v55  ;;  %v4827_v62 = vmul.f32 %v4763_v38, %v4200_v63  ;;  %v4208_v3 = vpop.f32.mrf.mxu1  ;;  %v4573_v25 = vadd.f32 1.0, %v7788_v40 }
 0x76f   : > { %v7792_v59 = vpop.eup %7791  ;;  %7817 = vpow2.f32 %v6624_v23  ;;  %v4862_v27 = vpack.c.bf16 %v4826_v39, %v4822_v46  ;;  %v10259_v55 = vpop.f32.mrf.mxu0  ;;  %v4749_v41 = vmul.f32 %v7790_v22, %v11005_v34 }
 0x770   : > { %v7794_v0 = vpop.eup %7793  ;;  %v4863_v57 = vpack.c.bf16 %v4827_v62, %v4823_v19  ;;  %7819 = vpow2.f32 %v6620_v36  ;;  %v4569_v37 = vadd.f32 1.0, %v7792_v59  ;;  %v4210_v18 = vpop.f32.mrf.mxu1 }
 0x771   : > { %6955 = vmatpush2.bf16.msra.mxu1 %v7908_v24  ;;  %v7796_v2 = vpop.eup %7795  ;;  %7821 = vrcp.f32 %v4564_v33  ;;  %v4767_v42 = vmul.f32 %v7794_v0, %v11012_v61  ;;  %v4813_v40 = vmul.f32 %v4749_v41, %v10215_v15  ;;  %v10267_v22 = vpop.f32.mrf.mxu0 }
 0x772   : > { %6940 = vmatprep.subr.bf16.mxu1 %v7909_v29  ;;  %v7798_v6 = vpop.eup %7797  ;;  %5346 = vmatprep.mubr.bf16.mxu1 %v4863_v57  ;;  %v4770_v14 = vmul.f32 %v7796_v2, %v11014_v10  ;;  %7823 = vrcp.f32 %v4573_v25  ;;  %v4745_v29 = vmul.f32 %v7786_v53, %v11003_v12 }
 0x773   : > { %v7800_v63 = vpop.eup %7799  ;;  %5347 = vmatmul.mubr.bf16.gmra.mxu1 %v4862_v27  ;;  %7825 = vrcp.f32 %v4560_v11  ;;  %v4766_v43 = vmul.f32 %v7798_v6, %v11011_v28  ;;  %v4831_v48 = vmul.f32 %v4767_v42, %v4206_v54 }
 0x774   : > { %v7802_v24 = vpop.eup %7801  ;;  %v4771_v52 = vmul.f32 %v7800_v63, %v11017_v30  ;;  %v4834_v38 = vmul.f32 %v4770_v14, %v4208_v3  ;;  %7827 = vrcp.f32 %v4569_v37  ;;  %v4809_v12 = vmul.f32 %v4745_v29, %v10202_v16  ;;  %v4313_v3 = vpop.f32.mrf.mxu0 }
 0x775   : > { %6956 = vmatpush2.bf16.msra.mxu1 %v7910_v56  ;;  %v7804_v23 = vpop.eup %7803  ;;  %v4572_v34 = vadd.f32 1.0, %v7802_v24  ;;  %v4830_v61 = vmul.f32 %v4766_v43, %v10239_v20 }
 0x776   : > { %v7806_v10 = vpop.eup %7805  ;;  %v4835_v36 = vmul.f32 %v4771_v52, %v4210_v18  ;;  %v4581_v19 = vadd.f32 1.0, %v7804_v23  ;;  %v4857_v46 = vpack.c.bf16 %v4813_v40, %v4809_v12  ;;  %v4317_v6 = vpop.f32.mrf.mxu0 }
 0x777   : > { %v7808_v39 = vpop.eup %7807  ;;  %v4568_v28 = vadd.f32 1.0, %v7806_v10  ;;  %v4866_v56 = vpack.c.bf16 %v4834_v38, %v4830_v61  ;;  %7829 = vrcp.f32 %v4572_v34 }
 0x778   : > { %v7810_v30 = vpop.eup %7809  ;;  %v4867_v53 = vpack.c.bf16 %v4835_v36, %v4831_v48  ;;  %v4577_v33 = vadd.f32 1.0, %v7808_v39  ;;  %7831 = vrcp.f32 %v4581_v19 }
 0x779   : > { %v7812_v62 = vpop.eup %7811  ;;  %v4748_v54 = vmul.f32 %v7810_v30, %v11015_v4  ;;  %7833 = vrcp.f32 %v4568_v28 }
 0x77a   : > { %v7814_v59 = vpop.eup %7813  ;;  %5356 = vmatprep.mubr.bf16.mxu1 %v4867_v53  ;;  %v4757_v20 = vmul.f32 %v7812_v62, %v11019_v51  ;;  %7835 = vrcp.f32 %v4577_v33  ;;  %v11030_v33 = vld [vmem:[#allocation25_spill] sm:$0xff] }
 0x77b   : > { %v7816_v15 = vpop.eup %7815  ;;  %5357 = vmatmul.mubr.bf16.gmra.mxu1 %v4866_v56  ;;  %v4744_v16 = vmul.f32 %v7814_v59, %v11013_v13  ;;  %v4812_v25 = vmul.f32 %v4748_v54, %v10209_v26 }
 0x77c   : > { %v7818_v0 = vpop.eup %7817  ;;  %5439 = vmatprep.mubr.bf16.mxu1 %v4857_v46  ;;  %v4753_v2 = vmul.f32 %v7816_v15, %v11020_v5  ;;  %v4821_v11 = vmul.f32 %v4757_v20, %v10245_v49  ;;  %v4319_v5 = vpop.f32.mrf.mxu0 }
 0x77d   : > { %v7820_v57 = vpop.eup %7819  ;;  %v4580_v4 = vadd.f32 1.0, %v7818_v0  ;;  %v4808_v27 = vmul.f32 %v4744_v16, %v10190_v60 }
 0x77e   : > { %v7822_v37 = vpop.eup %7821  ;;  %v4817_v51 = vmul.f32 %v4753_v2, %v10230_v44  ;;  %v4576_v14 = vadd.f32 1.0, %v7820_v57  ;;  %v4321_v29 = vpop.f32.mrf.mxu0 }
 0x77f   : > { %v7824_v63 = vpop.eup %7823  ;;  %v4856_v18 = vpack.c.bf16 %v4812_v25, %v4808_v27  ;;  %v4756_v26 = vmul.f32 %v7822_v37, %v11021_v45  ;;  %7837 = vrcp.f32 %v4580_v4  ;;  %v11032_v25 = vld [vmem:[#allocation27_spill] sm:$0xff]  ;;  %v11033_v27 = vld [vmem:[#allocation28_spill] sm:$0xff] }
 0x780   : > { %v7826_v13 = vpop.eup %7825  ;;  %v4861_v24 = vpack.c.bf16 %v4821_v11, %v4817_v51  ;;  %v4765_v49 = vmul.f32 %v7824_v63, %v11022_v8  ;;  %7839 = vrcp.f32 %v4576_v14  ;;  %v11034_v14 = vld [vmem:[#allocation29_spill] sm:$0xff] }
 0x781   : > { %v7828_v41 = vpop.eup %7827  ;;  %v4752_v60 = vmul.f32 %v7826_v13, %v11018_v50  ;;  %v4820_v42 = vmul.f32 %v4756_v26, %v10237_v47  ;;  %v4323_v50 = vpop.f32.mrf.mxu0  ;;  %v11035_v26 = vld [vmem:[#allocation30_spill] sm:$0xff] }
 0x782   : > { %v4761_v44 = vmul.f32 %v7828_v41, %v11023_v21  ;;  %v4829_v52 = vmul.f32 %v4765_v49, %v4313_v3 }
 0x783   : > { %5440 = vmatmul.mubr.bf16.vlgmr.msra.gmra.mxu1 %v4856_v18  ;;  %v4816_v23 = vmul.f32 %v4752_v60, %v10223_v9 }
 0x784   : > { %5449 = vmatprep.mubr.bf16.mxu1 %v4861_v24  ;;  %v7830_v43 = vpop.eup %7829  ;;  %v4825_v45 = vmul.f32 %v4761_v44, %v10259_v55  ;;  %v11036_v44 = vld [vmem:[#allocation31_spill] sm:$0xff] }
 0x785   : > { %v7832_v38 = vpop.eup %7831  ;;  %v4860_v10 = vpack.c.bf16 %v4820_v42, %v4816_v23  ;;  %v4764_v36 = vmul.f32 %v7830_v43, %v11024_v17 }
 0x786   : > { %v7834_v40 = vpop.eup %7833  ;;  %v4865_v48 = vpack.c.bf16 %v4829_v52, %v4825_v45  ;;  %v4773_v47 = vmul.f32 %v7832_v38, %v11025_v1  ;;  %v11037_v45 = vld [vmem:[#allocation32_spill] sm:$0xff] }
 0x787   : > { %v7836_v8 = vpop.eup %7835  ;;  %v4760_v21 = vmul.f32 %v7834_v40, %v11026_v7  ;;  %v4828_v9 = vmul.f32 %v4764_v36, %v10267_v22 }
 0x788   : > { %v4769_v39 = vmul.f32 %v7836_v8, %v11027_v35  ;;  %v4837_v34 = vmul.f32 %v4773_v47, %v4323_v50  ;;  %v11038_v8 = vld [vmem:[#allocation33_spill] sm:$0xff] }
 0x789   : > { %v4824_v55 = vmul.f32 %v4760_v21, %v10256_v31 }
 0x78a   : > { %v4833_v30 = vmul.f32 %v4769_v39, %v4319_v5 }
 0x78b   : > { %5450 = vmatmul.mubr.bf16.gmra.mxu1 %v4860_v10  ;;  %v4864_v19 = vpack.c.bf16 %v4828_v9, %v4824_v55  ;;  %v11039_v9 = vld [vmem:[#allocation34_spill] sm:$0xff] }
 0x78c   : > { %5459 = vmatprep.mubr.bf16.mxu1 %v4865_v48  ;;  %v7838_v61 = vpop.eup %7837  ;;  %v4869_v53 = vpack.c.bf16 %v4837_v34, %v4833_v30  ;;  %v11040_v30 = vld [vmem:[#allocation35_spill] sm:$0xff] }
 0x78d   : > { %v7840_v12 = vpop.eup %7839  ;;  %v4772_v17 = vmul.f32 %v7838_v61, %v11028_v58  ;;  %v11031_v58 = vld [vmem:[#allocation26_spill] sm:$0xff] }
 0x78e   : > { %v4768_v1 = vmul.f32 %v7840_v12, %v11029_v32 }
 0x78f   : > { %v4836_v62 = vmul.f32 %v4772_v17, %v4321_v29 }
 0x790   : > { %v4832_v7 = vmul.f32 %v4768_v1, %v4317_v6  ;;  %v11041_v1 = vld [vmem:[#allocation36_spill] sm:$0xff] }
 0x792   : > { %v4868_v28 = vpack.c.bf16 %v4836_v62, %v4832_v7 }
 0x793   : > { %5460 = vmatmul.mubr.bf16.gmra.mxu1 %v4864_v19 }
 0x794   : > { %5469 = vmatprep.mubr.bf16.mxu1 %v4869_v53 }
 0x79b   : > { %5470 = vmatmul.mubr.bf16.gmra.mxu1 %v4868_v28 }
 0x7f8   : > { %v5288_v22 = vpop.f32.mrf.mxu1 }
 0x7f9   : > { %v5401_v35 = vpop.f32.mrf.mxu0 }
 0x7fa   : > { %v5402_v56 = vadd.f32 %v5401_v35, %v5288_v22  ;;  %v5290_v59 = vpop.f32.mrf.mxu1  ;;  %v11042_v35 = vld [vmem:[#allocation37_spill] sm:$0xff] }
 0x7fb   : > { %v5403_v31 = vpop.f32.mrf.mxu0 }
 0x7fc   : > { %v10295_v46 = vadd.f32 %v5402_v56, %v11030_v33  ;;  %v5404_v15 = vadd.f32 %v5403_v31, %v5290_v59  ;;  %v5292_v54 = vpop.f32.mrf.mxu1 }
 0x7fd   : > { %v5405_v3 = vpop.f32.mrf.mxu0 }
 0x7fe   : > { %5512 = vst [vmem:[#allocation2 + $0xb0] sm:$0xff] %v10295_v46  ;;  %v10299_v0 = vadd.f32 %v5404_v15, %v11031_v58  ;;  %v5406_v32 = vadd.f32 %v5405_v3, %v5292_v54  ;;  %v5294_v20 = vpop.f32.mrf.mxu1  ;;  %v11043_v15 = vld [vmem:[#allocation38_spill] sm:$0xff] }
 0x7ff   : > { %v5407_v16 = vpop.f32.mrf.mxu0 }
 0x800   : > { %5513 = vst [vmem:[#allocation2] sm:$0xff] %v10299_v0  ;;  %v10303_v57 = vadd.f32 %v5406_v32, %v11032_v25  ;;  %v5408_v2 = vadd.f32 %v5407_v16, %v5294_v20  ;;  %v5298_v11 = vpop.f32.mrf.mxu1  ;;  %v11044_v20 = vld [vmem:[#allocation39_spill] sm:$0xff] }
 0x801   : > { %v5411_v4 = vpop.f32.mrf.mxu0 }
 0x802   : > { %5514 = vst [vmem:[#allocation2 + $0xd8] sm:$0xff] %v10303_v57  ;;  %v10307_v6 = vadd.f32 %v5408_v2, %v11033_v27  ;;  %v5412_v37 = vadd.f32 %v5411_v4, %v5298_v11  ;;  %v5300_v51 = vpop.f32.mrf.mxu1  ;;  %v11045_v2 = vld [vmem:[#allocation40_spill] sm:$0xff] }
 0x803   : > { %v5413_v63 = vpop.f32.mrf.mxu0 }
 0x804   : > { %5515 = vst [vmem:[#allocation2 + $0x18] sm:$0xff] %v10307_v6  ;;  %v10311_v18 = vadd.f32 %v5412_v37, %v11034_v14  ;;  %v5414_v13 = vadd.f32 %v5413_v63, %v5300_v51  ;;  %v5302_v24 = vpop.f32.mrf.mxu1 }
 0x805   : > { %v5415_v41 = vpop.f32.mrf.mxu0 }
 0x806   : > { %5516 = vst [vmem:[#allocation2 + $0x50] sm:$0xff] %v10311_v18  ;;  %v10315_v5 = vadd.f32 %v5414_v13, %v11035_v26  ;;  %v5416_v49 = vadd.f32 %v5415_v41, %v5302_v24  ;;  %v5304_v60 = vpop.f32.mrf.mxu1 }
 0x807   : > { %v5417_v42 = vpop.f32.mrf.mxu0 }
 0x808   : > { %5517 = vst [vmem:[#allocation2 + $0x68] sm:$0xff] %v10315_v5  ;;  %v10319_v52 = vadd.f32 %v5416_v49, %v11036_v44  ;;  %v5418_v23 = vadd.f32 %v5417_v42, %v5304_v60  ;;  %v5308_v29 = vpop.f32.mrf.mxu1 }
 0x809   : > { %v5421_v43 = vpop.f32.mrf.mxu0 }
 0x80a   : > { %5518 = vst [vmem:[#allocation2 + $0x30] sm:$0xff] %v10319_v52  ;;  %v10323_v38 = vadd.f32 %v5418_v23, %v11037_v45  ;;  %v5422_v10 = vadd.f32 %v5421_v43, %v5308_v29  ;;  %v5310_v40 = vpop.f32.mrf.mxu1 }
 0x80b   : > { %v5423_v48 = vpop.f32.mrf.mxu0 }
 0x80c   : > { %5519 = vst [vmem:[#allocation2 + $0x48] sm:$0xff] %v10323_v38  ;;  %v10327_v36 = vadd.f32 %v5422_v10, %v11038_v8  ;;  %v5424_v50 = vadd.f32 %v5423_v48, %v5310_v40  ;;  %v5312_v47 = vpop.f32.mrf.mxu1  ;;  %v11046_v40 = vld [vmem:[#allocation41_spill] sm:$0xff] }
 0x80d   : > { %v5425_v21 = vpop.f32.mrf.mxu0 }
 0x80e   : > { %5520 = vst [vmem:[#allocation2 + $0x80] sm:$0xff] %v10327_v36  ;;  %v10331_v39 = vadd.f32 %v5424_v50, %v11039_v9  ;;  %v5426_v34 = vadd.f32 %v5425_v21, %v5312_v47  ;;  %v5314_v55 = vpop.f32.mrf.mxu1  ;;  %v11047_v47 = vld [vmem:[#allocation42_spill] sm:$0xff] }
 0x80f   : > { %v5427_v61 = vpop.f32.mrf.mxu0 }
 0x810   : > { %5521 = vst [vmem:[#allocation2 + $0x88] sm:$0xff] %v10331_v39  ;;  %v10335_v19 = vadd.f32 %v5426_v34, %v11040_v30  ;;  %v5428_v12 = vadd.f32 %v5427_v61, %v5314_v55  ;;  %v5318_v53 = vpop.f32.mrf.mxu1  ;;  %v11048_v55 = vld [vmem:[#allocation43_spill] sm:$0xff] }
 0x811   : > { %v5431_v17 = vpop.f32.mrf.mxu0 }
 0x812   : > { %5522 = vst [vmem:[#allocation2 + $0xe8] sm:$0xff] %v10335_v19  ;;  %v10339_v62 = vadd.f32 %v5428_v12, %v11041_v1  ;;  %v5432_v7 = vadd.f32 %v5431_v17, %v5318_v53  ;;  %v5320_v28 = vpop.f32.mrf.mxu1  ;;  %v11049_v53 = vld [vmem:[#allocation44_spill] sm:$0xff] }
 0x813   : > { %v5433_v22 = vpop.f32.mrf.mxu0 }
 0x814   : > { %5523 = vst [vmem:[#allocation2 + $0xb8] sm:$0xff] %v10339_v62  ;;  %v10343_v56 = vadd.f32 %v5432_v7, %v11042_v35  ;;  %v5434_v59 = vadd.f32 %v5433_v22, %v5320_v28  ;;  %v5322_v31 = vpop.f32.mrf.mxu1  ;;  %v11050_v28 = vld [vmem:[#allocation45_spill] sm:$0xff] }
 0x815   : > { %v5435_v33 = vpop.f32.mrf.mxu0 }
 0x816   : > { %5524 = vst [vmem:[#allocation2 + $0x60] sm:$0xff] %v10343_v56  ;;  %v10347_v54 = vadd.f32 %v5434_v59, %v11043_v15  ;;  %v5436_v3 = vadd.f32 %v5435_v33, %v5322_v31  ;;  %v5324_v58 = vpop.f32.mrf.mxu1  ;;  %v11051_v31 = vld [vmem:[#allocation46_spill] sm:$0xff] }
 0x817   : > { %v5437_v32 = vpop.f32.mrf.mxu0 }
 0x818   : > { %5525 = vst [vmem:[#allocation2 + $0xf0] sm:$0xff] %v10347_v54  ;;  %v10351_v16 = vadd.f32 %v5436_v3, %v11044_v20  ;;  %v5438_v25 = vadd.f32 %v5437_v32, %v5324_v58  ;;  %v5328_v4 = vpop.f32.mrf.mxu1  ;;  %v11052_v58 = vld [vmem:[#allocation47_spill] sm:$0xff] }
 0x81a   : > { %5526 = vst [vmem:[#allocation2 + $0x8] sm:$0xff] %v10351_v16  ;;  %v10355_v11 = vadd.f32 %v5438_v25, %v11045_v2  ;;  %v5330_v27 = vpop.f32.mrf.mxu1  ;;  %v11053_v2 = vld [vmem:[#allocation48_spill] sm:$0xff] }
 0x81c   : > { %5527 = vst [vmem:[#allocation2 + $0x78] sm:$0xff] %v10355_v11  ;;  %v5332_v37 = vpop.f32.mrf.mxu1 }
 0x81e   : > { %v5334_v51 = vpop.f32.mrf.mxu1 }
 0x820   : > { %v5338_v63 = vpop.f32.mrf.mxu1 }
 0x822   : > { %v5340_v14 = vpop.f32.mrf.mxu1 }
 0x824   : > { %v5342_v13 = vpop.f32.mrf.mxu1 }
 0x826   : > { %v5344_v24 = vpop.f32.mrf.mxu1 }
 0x833   : > { %v5348_v41 = vpop.f32.mrf.mxu1 }
 0x835   : > { %v5350_v26 = vpop.f32.mrf.mxu1 }
 0x837   : > { %v5352_v49 = vpop.f32.mrf.mxu1 }
 0x839   : > { %v5354_v60 = vpop.f32.mrf.mxu1 }
 0x83b   : > { %v5358_v42 = vpop.f32.mrf.mxu1 }
 0x83d   : > { %v5360_v44 = vpop.f32.mrf.mxu1 }
 0x83f   : > { %v5362_v23 = vpop.f32.mrf.mxu1 }
 0x841   : > { %v5364_v29 = vpop.f32.mrf.mxu1 }
 0x843   : > { %v5441_v43 = vpop.f32.mrf.mxu1 }
 0x844   : > { %v5442_v45 = vadd.f32 %v5441_v43, %v5328_v4  ;;  %v11055_v43 = vld [vmem:[#allocation50_spill] sm:$0xff] }
 0x845   : > { %v5443_v10 = vpop.f32.mrf.mxu1 }
 0x846   : > { %v10359_v48 = vadd.f32 %v5442_v45, %v11046_v40  ;;  %v5444_v8 = vadd.f32 %v5443_v10, %v5330_v27  ;;  %v11056_v40 = vld [vmem:[#allocation51_spill] sm:$0xff] }
 0x847   : > { %v5445_v50 = vpop.f32.mrf.mxu1 }
 0x848   : > { %5528 = vst [vmem:[#allocation2 + $0x38] sm:$0xff] %v10359_v48  ;;  %v10363_v21 = vadd.f32 %v5444_v8, %v11047_v47  ;;  %v5446_v9 = vadd.f32 %v5445_v50, %v5332_v37  ;;  %v11057_v47 = vld [vmem:[#allocation52_spill] sm:$0xff] }
 0x849   : > { %v5447_v34 = vpop.f32.mrf.mxu1 }
 0x84a   : > { %5529 = vst [vmem:[#allocation2 + $0x58] sm:$0xff] %v10363_v21  ;;  %v10367_v61 = vadd.f32 %v5446_v9, %v11048_v55  ;;  %v5448_v30 = vadd.f32 %v5447_v34, %v5334_v51  ;;  %v11054_v51 = vld [vmem:[#allocation49_spill] sm:$0xff] }
 0x84b   : > { %v5451_v12 = vpop.f32.mrf.mxu1  ;;  %v11058_v55 = vld [vmem:[#allocation53_spill] sm:$0xff] }
 0x84c   : > { %5530 = vst [vmem:[#allocation2 + $0x40] sm:$0xff] %v10367_v61  ;;  %v10371_v17 = vadd.f32 %v5448_v30, %v11049_v53  ;;  %v5452_v1 = vadd.f32 %v5451_v12, %v5338_v63  ;;  %v11059_v53 = vld [vmem:[#allocation54_spill] sm:$0xff] }
 0x84d   : > { %v5453_v7 = vpop.f32.mrf.mxu1 }
 0x84e   : > { %5531 = vst [vmem:[#allocation2 + $0xc8] sm:$0xff] %v10371_v17  ;;  %v10375_v22 = vadd.f32 %v5452_v1, %v11050_v28  ;;  %v5454_v35 = vadd.f32 %v5453_v7, %v5340_v14  ;;  %v11060_v28 = vld [vmem:[#allocation55_spill] sm:$0xff] }
 0x84f   : > { %v5455_v59 = vpop.f32.mrf.mxu1 }
 0x850   : > { %5532 = vst [vmem:[#allocation2 + $0xe0] sm:$0xff] %v10375_v22  ;;  %v10379_v33 = vadd.f32 %v5454_v35, %v11051_v31  ;;  %v5456_v15 = vadd.f32 %v5455_v59, %v5342_v13  ;;  %v11061_v59 = vld [vmem:[#allocation56_spill] sm:$0xff] }
 0x851   : > { %v5457_v3 = vpop.f32.mrf.mxu1 }
 0x852   : > { %5533 = vst [vmem:[#allocation2 + $0x90] sm:$0xff] %v10379_v33  ;;  %v10383_v32 = vadd.f32 %v5456_v15, %v11052_v58  ;;  %v5458_v20 = vadd.f32 %v5457_v3, %v5344_v24 }
 0x853   : > { %v5461_v25 = vpop.f32.mrf.mxu1 }
 0x854   : > { %5534 = vst [vmem:[#allocation2 + $0x70] sm:$0xff] %v10383_v32  ;;  %v10387_v4 = vadd.f32 %v5458_v20, %v11053_v2  ;;  %v5462_v27 = vadd.f32 %v5461_v25, %v5348_v41 }
 0x855   : > { %v5463_v37 = vpop.f32.mrf.mxu1 }
 0x856   : > { %5535 = vst [vmem:[#allocation2 + $0xc0] sm:$0xff] %v10387_v4  ;;  %v10391_v63 = vadd.f32 %v5462_v27, %v11054_v51  ;;  %v5464_v14 = vadd.f32 %v5463_v37, %v5350_v26 }
 0x857   : > { %v5465_v13 = vpop.f32.mrf.mxu1 }
 0x858   : > { %5536 = vst [vmem:[#allocation2 + $0xa8] sm:$0xff] %v10391_v63  ;;  %v10395_v45 = vadd.f32 %v5464_v14, %v11055_v43  ;;  %v5466_v24 = vadd.f32 %v5465_v13, %v5352_v49 }
 0x859   : > { %v5467_v10 = vpop.f32.mrf.mxu1 }
 0x85a   : > { %5537 = vst [vmem:[#allocation2 + $0xd0] sm:$0xff] %v10395_v45  ;;  %v10399_v8 = vadd.f32 %v5466_v24, %v11056_v40  ;;  %v5468_v41 = vadd.f32 %v5467_v10, %v5354_v60 }
 0x85b   : > { %v5471_v50 = vpop.f32.mrf.mxu1 }
 0x85c   : > { %5538 = vst [vmem:[#allocation2 + $0x10] sm:$0xff] %v10399_v8  ;;  %v10403_v9 = vadd.f32 %v5468_v41, %v11057_v47  ;;  %v5472_v26 = vadd.f32 %v5471_v50, %v5358_v42 }
 0x85d   : > { %v5473_v34 = vpop.f32.mrf.mxu1 }
 0x85e   : > { %5539 = vst [vmem:[#allocation2 + $0x28] sm:$0xff] %v10403_v9  ;;  %v10407_v30 = vadd.f32 %v5472_v26, %v11058_v55  ;;  %v5474_v49 = vadd.f32 %v5473_v34, %v5360_v44 }
 0x85f   : > { %v5475_v12 = vpop.f32.mrf.mxu1 }
 0x860   : > { %5540 = vst [vmem:[#allocation2 + $0xa0] sm:$0xff] %v10407_v30  ;;  %v10411_v1 = vadd.f32 %v5474_v49, %v11059_v53  ;;  %v5476_v60 = vadd.f32 %v5475_v12, %v5362_v23 }
 0x861   : > { %v5477_v7 = vpop.f32.mrf.mxu1 }
 0x862   : > { %5541 = vst [vmem:[#allocation2 + $0xf8] sm:$0xff] %v10411_v1  ;;  %v10415_v35 = vadd.f32 %v5476_v60, %v11060_v28  ;;  %v5478_v42 = vadd.f32 %v5477_v7, %v5364_v29  ;;  %5547 = sbr.rel (%p6690_p1) target bundleno = 2547 (0x9f3), region = 76 }
 0x864   : > { %5542 = vst [vmem:[#allocation2 + $0x20] sm:$0xff] %v10415_v35  ;;  %v10419_v31 = vadd.f32 %v5478_v42, %v11061_v59 }
 0x866   : > { %5543 = vst [vmem:[#allocation2 + $0x98] sm:$0xff] %v10419_v31 }
 0x867   : > { %v5565_v44 = vmul.f32 %v10359_v48, %v10359_v48  ;;  %v5566_v23 = vmul.f32 %v10363_v21, %v10363_v21  ;;  %v5549_v15 = vmul.f32 %v10295_v46, %v10295_v46  ;;  %v5550_v29 = vmul.f32 %v10299_v0, %v10299_v0  ;;  %v7911_v3 = vld [vmem:[%s11062_s9 + $0x74] ss:$8 sps:$4 sm:$0xff]   ;;  %v7913_v27 = vld [vmem:[%s11062_s9 + $0x70] ss:$8 sps:$4 sm:$0xff]   ;;  %v7914_v24 = vld [vmem:[%s11062_s9 + $0x64] ss:$8 sps:$4 sm:$0xff]  }
 0x868   : > { %v5567_v58 = vmul.f32 %v10367_v61, %v10367_v61  ;;  %v5568_v20 = vmul.f32 %v10371_v17, %v10371_v17  ;;  %v5551_v25 = vmul.f32 %v10303_v57, %v10303_v57  ;;  %v5552_v2 = vmul.f32 %v10307_v6, %v10307_v6  ;;  %5960 = vmatprep.subr.bf16.mxu0 %v7911_v3  ;;  %v7916_v50 = vld [vmem:[%s11062_s9 + $0x60] ss:$8 sps:$4 sm:$0xff]   ;;  %v7917_v55 = vld [vmem:[%s11062_s9 + $0x54] ss:$8 sps:$4 sm:$0xff]   ;;  %v7919_v60 = vld [vmem:[%s11062_s9 + $0x50] ss:$8 sps:$4 sm:$0xff]  }
 0x869   : > { %v5605_v37 = vadd.f32 %v5566_v23, %v5565_v44  ;;  %v5581_v51 = vadd.f32 %v5550_v29, %v5549_v15  ;;  %v5555_v13 = vmul.f32 %v10319_v52, %v10319_v52  ;;  %v5556_v43 = vmul.f32 %v10323_v38, %v10323_v38  ;;  %6957 = vmatprep.subr.bf16.mxu1 %v7911_v3  ;;  %v7920_v59 = vld [vmem:[%s11062_s9 + $0x44] ss:$8 sps:$4 sm:$0xff]   ;;  %v7922_v29 = vld [vmem:[%s11062_s9 + $0x40] ss:$8 sps:$4 sm:$0xff]  }
 0x86a   : > { %v5608_v14 = vadd.f32 %v5568_v20, %v5567_v58  ;;  %v5584_v10 = vadd.f32 %v5552_v2, %v5551_v25  ;;  %v5553_v40 = vmul.f32 %v10311_v18, %v10311_v18  ;;  %v5554_v41 = vmul.f32 %v10315_v5, %v10315_v5  ;;  %5961 = vmatpush1.bf16.msra.mxu0 %v7913_v27  ;;  %v7923_v25 = vld [vmem:[%s11062_s9 + $0x34] ss:$8 sps:$4 sm:$0xff]  }
 0x86b   : > { %5606 = vadd.xlane.f32.xlu1 %v5605_v37  ;;  %5582 = vadd.xlane.f32.xlu0 %v5581_v51  ;;  %v5590_v47 = vadd.f32 %v5556_v43, %v5555_v13  ;;  %v5571_v26 = vmul.f32 %v10383_v32, %v10383_v32  ;;  %v5572_v34 = vmul.f32 %v10387_v4, %v10387_v4  ;;  %v7925_v51 = vld [vmem:[%s11062_s9 + $0x30] ss:$8 sps:$4 sm:$0xff]  }
 0x86c   : > { %6973 = vmatpush1.bf16.msra.mxu1 %v7913_v27  ;;  %5962 = vmatprep.subr.bf16.mxu0 %v7914_v24  ;;  %v5587_v49 = vadd.f32 %v5554_v41, %v5553_v40  ;;  %v5569_v12 = vmul.f32 %v10375_v22, %v10375_v22  ;;  %v5570_v53 = vmul.f32 %v10379_v33, %v10379_v33 }
 0x86d   : > { %6958 = vmatprep.subr.bf16.mxu1 %v7914_v24  ;;  %v5614_v7 = vadd.f32 %v5572_v34, %v5571_v26  ;;  %v5559_v28 = vmul.f32 %v10335_v19, %v10335_v19  ;;  %v5560_v42 = vmul.f32 %v10339_v62, %v10339_v62  ;;  %v5557_v23 = vmul.f32 %v10327_v36, %v10327_v36  ;;  %v7926_v24 = vld [vmem:[%s11062_s9 + $0x24] ss:$8 sps:$4 sm:$0xff]  }
 0x86e   : > { %5963 = vmatpush1.bf16.msra.mxu0 %v7916_v50  ;;  %v5611_v44 = vadd.f32 %v5570_v53, %v5569_v12  ;;  %v5558_v15 = vmul.f32 %v10331_v39, %v10331_v39  ;;  %v5575_v3 = vmul.f32 %v10399_v8, %v10399_v8  ;;  %v5576_v58 = vmul.f32 %v10403_v9, %v10403_v9 }
 0x86f   : > { %5609 = vadd.xlane.f32.xlu1 %v5608_v14  ;;  %5585 = vadd.xlane.f32.xlu0 %v5584_v10  ;;  %v5573_v20 = vmul.f32 %v10391_v63, %v10391_v63  ;;  %v5596_v2 = vadd.f32 %v5560_v42, %v5559_v28  ;;  %v5574_v37 = vmul.f32 %v10395_v45, %v10395_v45 }
 0x870   : > { %6974 = vmatpush1.bf16.msra.mxu1 %v7916_v50  ;;  %5964 = vmatprep.subr.bf16.mxu0 %v7917_v55  ;;  %v5593_v27 = vadd.f32 %v5558_v15, %v5557_v23  ;;  %v5620_v14 = vadd.f32 %v5576_v58, %v5575_v3  ;;  %v5563_v13 = vmul.f32 %v10351_v16, %v10351_v16  ;;  %v7928_v50 = vld [vmem:[%s11062_s9 + $0x20] ss:$8 sps:$4 sm:$0xff]   ;;  %v7937_v23 = vld [vmem:[%s11062_s9 + $0xf0] ss:$8 sps:$4 sm:$0xff]   ;;  %v7938_v15 = vld [vmem:[%s11062_s9 + $0xe4] ss:$8 sps:$4 sm:$0xff]  }
 0x871   : > { %6959 = vmatprep.subr.bf16.mxu1 %v7917_v55  ;;  %v5564_v43 = vmul.f32 %v10355_v11, %v10355_v11  ;;  %v5617_v10 = vadd.f32 %v5574_v37, %v5573_v20  ;;  %v5561_v40 = vmul.f32 %v10343_v56, %v10343_v56  ;;  %v5562_v41 = vmul.f32 %v10347_v54, %v10347_v54  ;;  %v7929_v55 = vld [vmem:[%s11062_s9 + $0x14] ss:$8 sps:$4 sm:$0xff]   ;;  %v7943_v58 = vld [vmem:[%s11062_s9 + $0xd0] ss:$8 sps:$4 sm:$0xff]   ;;  %v7944_v20 = vld [vmem:[%s11062_s9 + $0xc4] ss:$8 sps:$4 sm:$0xff]  }
 0x872   : > { %5965 = vmatpush1.bf16.msra.mxu0 %v7919_v60  ;;  %v5579_v26 = vmul.f32 %v10415_v35, %v10415_v35  ;;  %v5580_v34 = vmul.f32 %v10419_v31, %v10419_v31  ;;  %v5577_v12 = vmul.f32 %v10407_v30, %v10407_v30  ;;  %v5578_v53 = vmul.f32 %v10411_v1, %v10411_v1  ;;  %v7941_v3 = vld [vmem:[%s11062_s9 + $0xd4] ss:$8 sps:$4 sm:$0xff]   ;;  %v7950_v37 = vld [vmem:[%s11062_s9 + $0xa4] ss:$8 sps:$4 sm:$0xff]  }
 0x873   : > { %5591 = vadd.xlane.f32.xlu1 %v5590_v47  ;;  %5588 = vadd.xlane.f32.xlu0 %v5587_v49  ;;  %v5602_v47 = vadd.f32 %v5564_v43, %v5563_v13  ;;  %v5599_v49 = vadd.f32 %v5562_v41, %v5561_v40  ;;  %v7955_v13 = vld [vmem:[%s11062_s9 + $0x90] ss:$8 sps:$4 sm:$0xff]   ;;  %v7956_v43 = vld [vmem:[%s11062_s9 + $0x84] ss:$8 sps:$4 sm:$0xff]  }
 0x874   : > { %6975 = vmatpush1.bf16.msra.mxu1 %v7919_v60  ;;  %5966 = vmatprep.subr.bf16.mxu0 %v7920_v59  ;;  %v7931_v60 = vld [vmem:[%s11062_s9 + $0x10] ss:$8 sps:$4 sm:$0xff]   ;;  %v5626_v28 = vadd.f32 %v5580_v34, %v5579_v26  ;;  %v5623_v42 = vadd.f32 %v5578_v53, %v5577_v12 }
 0x875   : > { %6960 = vmatprep.subr.bf16.mxu1 %v7920_v59  ;;  %v7934_v59 = vld [vmem:[%s11062_s9] ss:$8 sps:$4 sm:$0xff]  }
 0x876   : > { %5967 = vmatpush1.bf16.msra.mxu0 %v7922_v29 }
 0x877   : > { %5615 = vadd.xlane.f32.xlu1 %v5614_v7  ;;  %5612 = vadd.xlane.f32.xlu0 %v5611_v44  ;;  %v7932_v7 = vld [vmem:[%s11062_s9 + $0x4] ss:$8 sps:$4 sm:$0xff]   ;;  %v7935_v44 = vld [vmem:[%s11062_s9 + $0xf4] ss:$8 sps:$4 sm:$0xff]  }
 0x878   : > { %6976 = vmatpush1.bf16.msra.mxu1 %v7922_v29  ;;  %5968 = vmatprep.subr.bf16.mxu0 %v7923_v25  ;;  %v7940_v29 = vld [vmem:[%s11062_s9 + $0xe0] ss:$8 sps:$4 sm:$0xff]  }
 0x879   : > { %6961 = vmatprep.subr.bf16.mxu1 %v7923_v25  ;;  %v7946_v25 = vld [vmem:[%s11062_s9 + $0xc0] ss:$8 sps:$4 sm:$0xff]  }
 0x87a   : > { %5969 = vmatpush1.bf16.msra.mxu0 %v7925_v51 }
 0x87b   : > { %5597 = vadd.xlane.f32.xlu1 %v5596_v2  ;;  %5594 = vadd.xlane.f32.xlu0 %v5593_v27  ;;  %v7947_v2 = vld [vmem:[%s11062_s9 + $0xb4] ss:$8 sps:$4 sm:$0xff]   ;;  %v7949_v27 = vld [vmem:[%s11062_s9 + $0xb0] ss:$8 sps:$4 sm:$0xff]  }
 0x87c   : > { %6977 = vmatpush1.bf16.msra.mxu1 %v7925_v51  ;;  %5970 = vmatprep.subr.bf16.mxu0 %v7926_v24  ;;  %v7952_v51 = vld [vmem:[%s11062_s9 + $0xa0] ss:$8 sps:$4 sm:$0xff]  }
 0x87d   : > { %6962 = vmatprep.subr.bf16.mxu1 %v7926_v24  ;;  %v7958_v24 = vld [vmem:[%s11062_s9 + $0x80] ss:$8 sps:$4 sm:$0xff]  }
 0x87e   : > { %5971 = vmatpush1.bf16.msra.mxu0 %v7928_v50 }
 0x87f   : > { %5621 = vadd.xlane.f32.xlu1 %v5620_v14  ;;  %5618 = vadd.xlane.f32.xlu0 %v5617_v10  ;;  %v7953_v14 = vld [vmem:[%s11062_s9 + $0x94] ss:$8 sps:$4 sm:$0xff]  }
 0x880   : > { %6978 = vmatpush1.bf16.msra.mxu1 %v7928_v50  ;;  %5972 = vmatprep.subr.bf16.mxu0 %v7929_v55 }
 0x881   : > { %6963 = vmatprep.subr.bf16.mxu1 %v7929_v55 }
 0x882   : > { %5973 = vmatpush1.bf16.msra.mxu0 %v7931_v60 }
 0x883   : > { %5603 = vadd.xlane.f32.xlu1 %v5602_v47  ;;  %5600 = vadd.xlane.f32.xlu0 %v5599_v49 }
 0x884   : > { %6979 = vmatpush1.bf16.msra.mxu1 %v7931_v60  ;;  %5974 = vmatprep.subr.bf16.mxu0 %v7932_v7 }
 0x885   : > { %6964 = vmatprep.subr.bf16.mxu1 %v7932_v7 }
 0x886   : > { %5975 = vmatpush1.bf16.msra.mxu0 %v7934_v59 }
 0x887   : > { %5627 = vadd.xlane.f32.xlu1 %v5626_v28  ;;  %5624 = vadd.xlane.f32.xlu0 %v5623_v42 }
 0x888   : > { %6980 = vmatpush1.bf16.msra.mxu1 %v7934_v59  ;;  %5976 = vmatprep.subr.bf16.mxu0 %v7935_v44 }
 0x889   : > { %6965 = vmatprep.subr.bf16.mxu1 %v7935_v44 }
 0x88a   : > { %5977 = vmatpush2.bf16.msra.mxu0 %v7937_v23 }
 0x88b   : > { %5978 = vmatprep.subr.bf16.mxu0 %v7938_v15 }
 0x88c   : > { %6981 = vmatpush2.bf16.msra.mxu1 %v7937_v23 }
 0x88d   : > { %6966 = vmatprep.subr.bf16.mxu1 %v7938_v15 }
 0x88e   : > { %5979 = vmatpush2.bf16.msra.mxu0 %v7940_v29 }
 0x88f   : > { %5980 = vmatprep.subr.bf16.mxu0 %v7941_v3 }
 0x890   : > { %6982 = vmatpush2.bf16.msra.mxu1 %v7940_v29 }
 0x891   : > { %6967 = vmatprep.subr.bf16.mxu1 %v7941_v3 }
 0x892   : > { %5981 = vmatpush2.bf16.msra.mxu0 %v7943_v58 }
 0x893   : > { %5982 = vmatprep.subr.bf16.mxu0 %v7944_v20 }
 0x894   : > { %6983 = vmatpush2.bf16.msra.mxu1 %v7943_v58 }
 0x895   : > { %6968 = vmatprep.subr.bf16.mxu1 %v7944_v20 }
 0x896   : > { %5983 = vmatpush2.bf16.msra.mxu0 %v7946_v25 }
 0x897   : > { %5984 = vmatprep.subr.bf16.mxu0 %v7947_v2 }
 0x898   : > { %6984 = vmatpush2.bf16.msra.mxu1 %v7946_v25 }
 0x899   : > { %6969 = vmatprep.subr.bf16.mxu1 %v7947_v2  ;;  %v5548_v2 = vld [vmem:[%s11063_s27] sm:$0x3] }
 0x89a   : > { %5985 = vmatpush2.bf16.msra.mxu0 %v7949_v27 }
 0x89b   : > { %5986 = vmatprep.subr.bf16.mxu0 %v7950_v37 }
 0x89c   : > { %6985 = vmatpush2.bf16.msra.mxu1 %v7949_v27 }
 0x89d   : > { %6970 = vmatprep.subr.bf16.mxu1 %v7950_v37 }
 0x89e   : > { %5987 = vmatpush2.bf16.msra.mxu0 %v7952_v51 }
 0x89f   : > { %5988 = vmatprep.subr.bf16.mxu0 %v7953_v14 }
 0x8a0   : > { %6986 = vmatpush2.bf16.msra.mxu1 %v7952_v51 }
 0x8a1   : > { %6971 = vmatprep.subr.bf16.mxu1 %v7953_v14 }
 0x8a2   : > { %5989 = vmatpush2.bf16.msra.mxu0 %v7955_v13 }
 0x8a3   : > { %5990 = vmatprep.subr.bf16.mxu0 %v7956_v43 }
 0x8a4   : > { %6987 = vmatpush2.bf16.msra.mxu1 %v7955_v13 }
 0x8a5   : > { %6972 = vmatprep.subr.bf16.mxu1 %v7956_v43  ;;  %v11064_v43 = vld [vmem:[#allocation23_spill] sm:$0xff] }
 0x8a6   : > { %5991 = vmatpush2.bf16.msra.mxu0 %v7958_v24 }
 0x8a8   : > { %6988 = vmatpush2.bf16.msra.mxu1 %v7958_v24  ;;  %v10587_v24 = vrot.slane %v5548_v2, %v11064_v43 }
 0x8f4   : > { %v5607_v10 = vpop.xlane.xlu1 %5606  ;;  %v5583_v40 = vpop.xlane.xlu0 %5582 }
 0x8f5   : > { %v5637_v41 = vmul.f32 0.00390625, %v5607_v10  ;;  %v5629_v50 = vmul.f32 0.00390625, %v5583_v40 }
 0x8f7   : > { %v5653_v47 = vadd.f32 1e-06, %v5637_v41  ;;  %v5645_v26 = vadd.f32 1e-06, %v5629_v50 }
 0x8f8   : > { %v5610_v34 = vpop.xlane.xlu1 %5609  ;;  %v5586_v55 = vpop.xlane.xlu0 %5585 }
 0x8f9   : > { %7959 = vrsqrt.f32 %v5653_v47  ;;  %v5638_v49 = vmul.f32 0.00390625, %v5610_v34  ;;  %v5630_v12 = vmul.f32 0.00390625, %v5586_v55  ;;  %v11065_v55 = vld [vmem:[#allocation24_spill] sm:$0xff] }
 0x8fa   : > { %7961 = vrsqrt.f32 %v5645_v26 }
 0x8fb   : > { %v5654_v53 = vadd.f32 1e-06, %v5638_v49  ;;  %v5646_v60 = vadd.f32 1e-06, %v5630_v12  ;;  %v10592_v49 = vrot.slane %v5548_v2, %v11065_v55 }
 0x8fc   : > { %v5592_v7 = vpop.xlane.xlu1 %5591  ;;  %v5589_v28 = vpop.xlane.xlu0 %5588 }
 0x8fd   : > { %7963 = vrsqrt.f32 %v5654_v53  ;;  %v5632_v42 = vmul.f32 0.00390625, %v5592_v7  ;;  %v5631_v59 = vmul.f32 0.00390625, %v5589_v28 }
 0x8fe   : > { %7965 = vrsqrt.f32 %v5646_v60 }
 0x8ff   : > { %v5648_v44 = vadd.f32 1e-06, %v5632_v42  ;;  %v5647_v23 = vadd.f32 1e-06, %v5631_v59 }
 0x900   : > { %v5616_v15 = vpop.xlane.xlu1 %5615  ;;  %v5613_v29 = vpop.xlane.xlu0 %5612 }
 0x901   : > { %7967 = vrsqrt.f32 %v5648_v44  ;;  %v5640_v3 = vmul.f32 0.00390625, %v5616_v15  ;;  %v5639_v58 = vmul.f32 0.00390625, %v5613_v29 }
 0x902   : > { %7969 = vrsqrt.f32 %v5647_v23 }
 0x903   : > { %v5656_v20 = vadd.f32 1e-06, %v5640_v3  ;;  %v5655_v25 = vadd.f32 1e-06, %v5639_v58 }
 0x904   : > { %v5598_v27 = vpop.xlane.xlu1 %5597  ;;  %v5595_v37 = vpop.xlane.xlu0 %5594 }
 0x905   : > { %7971 = vrsqrt.f32 %v5656_v20  ;;  %v5634_v51 = vmul.f32 0.00390625, %v5598_v27  ;;  %v5633_v14 = vmul.f32 0.00390625, %v5595_v37 }
 0x906   : > { %v7960_v13 = vpop.eup %7959  ;;  %7973 = vrsqrt.f32 %v5655_v25 }
 0x907   : > { %v7962_v10 = vpop.eup %7961  ;;  %v5650_v40 = vadd.f32 1e-06, %v5634_v51  ;;  %v5649_v41 = vadd.f32 1e-06, %v5633_v14  ;;  %v5694_v50 = vmul.f32 %v7960_v13, %v10363_v21  ;;  %v5693_v53 = vmul.f32 %v7960_v13, %v10359_v48 }
 0x908   : > { %v5622_v47 = vpop.xlane.xlu1 %5621  ;;  %v5619_v26 = vpop.xlane.xlu0 %5618  ;;  %v5678_v34 = vmul.f32 %v7962_v10, %v10299_v0  ;;  %v5677_v12 = vmul.f32 %v7962_v10, %v10295_v46 }
 0x909   : > { %7975 = vrsqrt.f32 %v5650_v40  ;;  %v5642_v60 = vmul.f32 0.00390625, %v5622_v47  ;;  %v5641_v7 = vmul.f32 0.00390625, %v5619_v26  ;;  %v5737_v21 = vmul.f32 %v10587_v24, %v5694_v50 }
 0x90a   : > { %v7964_v28 = vpop.eup %7963  ;;  %7977 = vrsqrt.f32 %v5649_v41  ;;  %v5721_v42 = vmul.f32 %v10587_v24, %v5678_v34  ;;  %v5720_v58 = vmul.f32 %v10592_v49, %v5677_v12  ;;  %v5736_v20 = vmul.f32 %v10592_v49, %v5693_v53 }
 0x90b   : > { %v7966_v59 = vpop.eup %7965  ;;  %v5658_v44 = vadd.f32 1e-06, %v5642_v60  ;;  %v5657_v23 = vadd.f32 1e-06, %v5641_v7  ;;  %v5696_v0 = vmul.f32 %v7964_v28, %v10371_v17  ;;  %v5695_v15 = vmul.f32 %v7964_v28, %v10367_v61 }
 0x90c   : > { %v5604_v29 = vpop.xlane.xlu1 %5603  ;;  %v5601_v46 = vpop.xlane.xlu0 %5600  ;;  %v5680_v48 = vmul.f32 %v7966_v59, %v10307_v6  ;;  %v5679_v3 = vmul.f32 %v7966_v59, %v10303_v57 }
 0x90d   : > { %7979 = vrsqrt.f32 %v5658_v44  ;;  %v5636_v25 = vmul.f32 0.00390625, %v5604_v29  ;;  %v5635_v2 = vmul.f32 0.00390625, %v5601_v46  ;;  %v5739_v27 = vmul.f32 %v10587_v24, %v5696_v0 }
 0x90e   : > { %v7968_v37 = vpop.eup %7967  ;;  %7981 = vrsqrt.f32 %v5657_v23  ;;  %v5723_v17 = vmul.f32 %v10587_v24, %v5680_v48  ;;  %v5722_v61 = vmul.f32 %v10592_v49, %v5679_v3  ;;  %v5738_v51 = vmul.f32 %v10592_v49, %v5695_v15 }
 0x90f   : > { %v7970_v6 = vpop.eup %7969  ;;  %v5652_v14 = vadd.f32 1e-06, %v5636_v25  ;;  %v5651_v57 = vadd.f32 1e-06, %v5635_v2  ;;  %v5761_v13 = vpack.c.bf16 %v5739_v27, %v5737_v21  ;;  %v5684_v43 = vmul.f32 %v7968_v37, %v10323_v38 }
 0x910   : > { %v5628_v10 = vpop.xlane.xlu1 %5627  ;;  %v5625_v40 = vpop.xlane.xlu0 %5624  ;;  %v5753_v41 = vpack.c.bf16 %v5723_v17, %v5721_v42  ;;  %v5752_v50 = vpack.c.bf16 %v5722_v61, %v5720_v58  ;;  %v5760_v47 = vpack.c.bf16 %v5738_v51, %v5736_v20  ;;  %v5682_v26 = vmul.f32 %v7970_v6, %v10315_v5 }
 0x911   : > { %7983 = vrsqrt.f32 %v5652_v14  ;;  %v5644_v34 = vmul.f32 0.00390625, %v5628_v10  ;;  %v5643_v55 = vmul.f32 0.00390625, %v5625_v40  ;;  %6032 = vmatprep.mubr.bf16.mxu1 %v5761_v13  ;;  %v5727_v12 = vmul.f32 %v10587_v24, %v5684_v43 }
 0x912   : > { %v7972_v53 = vpop.eup %7971  ;;  %7985 = vrsqrt.f32 %v5651_v57  ;;  %5992 = vmatprep.mubr.bf16.mxu0 %v5753_v41  ;;  %6033 = vmatmul.mubr.bf16.vlgmr.msra.gmra.mxu1 %v5760_v47  ;;  %v5725_v60 = vmul.f32 %v10587_v24, %v5682_v26  ;;  %v5681_v38 = vmul.f32 %v7970_v6, %v10311_v18  ;;  %v5683_v7 = vmul.f32 %v7968_v37, %v10319_v52 }
 0x913   : > { %v7974_v28 = vpop.eup %7973  ;;  %v5660_v42 = vadd.f32 1e-06, %v5644_v34  ;;  %v5659_v21 = vadd.f32 1e-06, %v5643_v55  ;;  %5993 = vmatmul.mubr.bf16.vlgmr.msra.gmra.mxu0 %v5752_v50  ;;  %v5700_v5 = vmul.f32 %v7972_v53, %v10387_v4  ;;  %v5699_v59 = vmul.f32 %v7972_v53, %v10383_v32 }
 0x914   : > { %v5755_v44 = vpack.c.bf16 %v5727_v12, %v5725_v60  ;;  %v5698_v23 = vmul.f32 %v7974_v28, %v10379_v33  ;;  %v5724_v0 = vmul.f32 %v10592_v49, %v5681_v38  ;;  %v5726_v15 = vmul.f32 %v10592_v49, %v5683_v7 }
 0x915   : > { %7987 = vrsqrt.f32 %v5660_v42  ;;  %v5743_v18 = vmul.f32 %v10587_v24, %v5700_v5  ;;  %v5697_v52 = vmul.f32 %v7974_v28, %v10375_v22  ;;  %v5742_v29 = vmul.f32 %v10592_v49, %v5699_v59 }
 0x916   : > { %v7976_v46 = vpop.eup %7975  ;;  %7989 = vrsqrt.f32 %v5659_v21  ;;  %6002 = vmatprep.mubr.bf16.mxu0 %v5755_v44  ;;  %v5741_v4 = vmul.f32 %v10587_v24, %v5698_v23  ;;  %v5754_v58 = vpack.c.bf16 %v5726_v15, %v5724_v0 }
 0x917   : > { %v7978_v32 = vpop.eup %7977  ;;  %v5740_v48 = vmul.f32 %v10592_v49, %v5697_v52  ;;  %v5688_v33 = vmul.f32 %v7976_v46, %v10339_v62  ;;  %v5687_v27 = vmul.f32 %v7976_v46, %v10335_v19 }
 0x918   : > { %v5763_v3 = vpack.c.bf16 %v5743_v18, %v5741_v4  ;;  %v5686_v20 = vmul.f32 %v7978_v32, %v10331_v39  ;;  %v5685_v22 = vmul.f32 %v7978_v32, %v10327_v36 }
 0x919   : > { %v5762_v25 = vpack.c.bf16 %v5742_v29, %v5740_v48  ;;  %v5731_v2 = vmul.f32 %v10587_v24, %v5688_v33  ;;  %v5730_v57 = vmul.f32 %v10592_v49, %v5687_v27 }
 0x91a   : > { %v7980_v37 = vpop.eup %7979  ;;  %6042 = vmatprep.mubr.bf16.mxu1 %v5763_v3  ;;  %v5729_v17 = vmul.f32 %v10587_v24, %v5686_v20  ;;  %v5728_v19 = vmul.f32 %v10592_v49, %v5685_v22 }
 0x91b   : > { %v7982_v61 = vpop.eup %7981  ;;  %6003 = vmatmul.mubr.bf16.gmra.mxu0 %v5754_v58  ;;  %6043 = vmatmul.mubr.bf16.gmra.mxu1 %v5762_v25  ;;  %v5704_v62 = vmul.f32 %v7980_v37, %v10403_v9  ;;  %v5703_v51 = vmul.f32 %v7980_v37, %v10399_v8 }
 0x91c   : > { %v5757_v6 = vpack.c.bf16 %v5731_v2, %v5729_v17  ;;  %v5702_v39 = vmul.f32 %v7982_v61, %v10395_v45  ;;  %v5701_v14 = vmul.f32 %v7982_v61, %v10391_v63  ;;  %v5756_v50 = vpack.c.bf16 %v5730_v57, %v5728_v19 }
 0x91d   : > { %v5747_v36 = vmul.f32 %v10587_v24, %v5704_v62  ;;  %v5746_v13 = vmul.f32 %v10592_v49, %v5703_v51 }
 0x91e   : > { %v7984_v43 = vpop.eup %7983  ;;  %6012 = vmatprep.mubr.bf16.mxu0 %v5757_v6  ;;  %v5745_v10 = vmul.f32 %v10587_v24, %v5702_v39  ;;  %v5744_v9 = vmul.f32 %v10592_v49, %v5701_v14 }
 0x91f   : > { %v7986_v8 = vpop.eup %7985  ;;  %v5692_v40 = vmul.f32 %v7984_v43, %v10355_v11  ;;  %v5691_v34 = vmul.f32 %v7984_v43, %v10351_v16 }
 0x920   : > { %v5765_v45 = vpack.c.bf16 %v5747_v36, %v5745_v10  ;;  %v5764_v41 = vpack.c.bf16 %v5746_v13, %v5744_v9  ;;  %v5690_v63 = vmul.f32 %v7986_v8, %v10347_v54  ;;  %v5689_v26 = vmul.f32 %v7986_v8, %v10343_v56 }
 0x921   : > { %v5735_v47 = vmul.f32 %v10587_v24, %v5692_v40  ;;  %v5734_v28 = vmul.f32 %v10592_v49, %v5691_v34 }
 0x922   : > { %v7988_v55 = vpop.eup %7987  ;;  %6052 = vmatprep.mubr.bf16.mxu1 %v5765_v45  ;;  %v5733_v12 = vmul.f32 %v10587_v24, %v5690_v63  ;;  %v5732_v16 = vmul.f32 %v10592_v49, %v5689_v26 }
 0x923   : > { %v7990_v53 = vpop.eup %7989  ;;  %6013 = vmatmul.mubr.bf16.gmra.mxu0 %v5756_v50  ;;  %6053 = vmatmul.mubr.bf16.gmra.mxu1 %v5764_v41  ;;  %v5708_v11 = vmul.f32 %v7988_v55, %v10419_v31  ;;  %v5707_v60 = vmul.f32 %v7988_v55, %v10415_v35 }
 0x924   : > { %v5759_v38 = vpack.c.bf16 %v5735_v47, %v5733_v12  ;;  %v5706_v54 = vmul.f32 %v7990_v53, %v10411_v1  ;;  %v5705_v7 = vmul.f32 %v7990_v53, %v10407_v30  ;;  %v5758_v21 = vpack.c.bf16 %v5734_v28, %v5732_v16 }
 0x925   : > { %v5751_v56 = vmul.f32 %v10587_v24, %v5708_v11  ;;  %v5750_v42 = vmul.f32 %v10592_v49, %v5707_v60 }
 0x926   : > { %6022 = vmatprep.mubr.bf16.mxu0 %v5759_v38  ;;  %v5749_v35 = vmul.f32 %v10587_v24, %v5706_v54  ;;  %v5748_v31 = vmul.f32 %v10592_v49, %v5705_v7 }
 0x928   : > { %v5767_v1 = vpack.c.bf16 %v5751_v56, %v5749_v35  ;;  %v5766_v30 = vpack.c.bf16 %v5750_v42, %v5748_v31 }
 0x92a   : > { %6062 = vmatprep.mubr.bf16.mxu1 %v5767_v1 }
 0x92b   : > { %6023 = vmatmul.mubr.bf16.gmra.mxu0 %v5758_v21  ;;  %6063 = vmatmul.mubr.bf16.gmra.mxu1 %v5766_v30 }
 0x9d2   : > { %v6034_v5 = vpop.f32.mrf.mxu1 }
 0x9d3   : > { %v5994_v59 = vpop.f32.mrf.mxu0  ;;  %6089 = vst [vmem:[%s8422_s18 + $0x80] sm:$0xff] %v6034_v5 }
 0x9d4   : > { %6073 = vst [vmem:[%s8422_s18] sm:$0xff] %v5994_v59  ;;  %v6036_v44 = vpop.f32.mrf.mxu1 }
 0x9d5   : > { %v5996_v24 = vpop.f32.mrf.mxu0  ;;  %6090 = vst [vmem:[%s8422_s18 + $0x88] sm:$0xff] %v6036_v44 }
 0x9d6   : > { %6074 = vst [vmem:[%s8422_s18 + $0x8] sm:$0xff] %v5996_v24  ;;  %v6038_v49 = vpop.f32.mrf.mxu1 }
 0x9d7   : > { %v5998_v23 = vpop.f32.mrf.mxu0  ;;  %6091 = vst [vmem:[%s8422_s18 + $0x90] sm:$0xff] %v6038_v49 }
 0x9d8   : > { %6075 = vst [vmem:[%s8422_s18 + $0x10] sm:$0xff] %v5998_v23  ;;  %v6040_v0 = vpop.f32.mrf.mxu1 }
 0x9d9   : > { %v6000_v15 = vpop.f32.mrf.mxu0  ;;  %6092 = vst [vmem:[%s8422_s18 + $0x98] sm:$0xff] %v6040_v0 }
 0x9da   : > { %6076 = vst [vmem:[%s8422_s18 + $0x18] sm:$0xff] %v6000_v15 }
 0x9db   : > { %v6004_v18 = vpop.f32.mrf.mxu0  ;;  %v6044_v52 = vpop.f32.mrf.mxu1 }
 0x9dc   : > { %6077 = vst [vmem:[%s8422_s18 + $0x20] sm:$0xff] %v6004_v18  ;;  %6093 = vst [vmem:[%s8422_s18 + $0xa0] sm:$0xff] %v6044_v52 }
 0x9dd   : > { %v6006_v29 = vpop.f32.mrf.mxu0  ;;  %v6046_v46 = vpop.f32.mrf.mxu1 }
 0x9de   : > { %6078 = vst [vmem:[%s8422_s18 + $0x28] sm:$0xff] %v6006_v29  ;;  %6094 = vst [vmem:[%s8422_s18 + $0xa8] sm:$0xff] %v6046_v46 }
 0x9df   : > { %v6008_v4 = vpop.f32.mrf.mxu0  ;;  %v6048_v32 = vpop.f32.mrf.mxu1 }
 0x9e0   : > { %6079 = vst [vmem:[%s8422_s18 + $0x30] sm:$0xff] %v6008_v4  ;;  %6095 = vst [vmem:[%s8422_s18 + $0xb0] sm:$0xff] %v6048_v32 }
 0x9e1   : > { %v6010_v48 = vpop.f32.mrf.mxu0  ;;  %v6050_v33 = vpop.f32.mrf.mxu1 }
 0x9e2   : > { %6080 = vst [vmem:[%s8422_s18 + $0x38] sm:$0xff] %v6010_v48  ;;  %6096 = vst [vmem:[%s8422_s18 + $0xb8] sm:$0xff] %v6050_v33 }
 0x9e3   : > { %v6014_v3 = vpop.f32.mrf.mxu0  ;;  %v6054_v58 = vpop.f32.mrf.mxu1 }
 0x9e4   : > { %6081 = vst [vmem:[%s8422_s18 + $0x40] sm:$0xff] %v6014_v3  ;;  %6097 = vst [vmem:[%s8422_s18 + $0xc0] sm:$0xff] %v6054_v58 }
 0x9e5   : > { %v6016_v20 = vpop.f32.mrf.mxu0  ;;  %v6056_v25 = vpop.f32.mrf.mxu1 }
 0x9e6   : > { %6082 = vst [vmem:[%s8422_s18 + $0x48] sm:$0xff] %v6016_v20  ;;  %6098 = vst [vmem:[%s8422_s18 + $0xc8] sm:$0xff] %v6056_v25 }
 0x9e7   : > { %v6018_v2 = vpop.f32.mrf.mxu0  ;;  %v6058_v22 = vpop.f32.mrf.mxu1 }
 0x9e8   : > { %6083 = vst [vmem:[%s8422_s18 + $0x50] sm:$0xff] %v6018_v2  ;;  %6099 = vst [vmem:[%s8422_s18 + $0xd0] sm:$0xff] %v6058_v22 }
 0x9e9   : > { %v6020_v27 = vpop.f32.mrf.mxu0  ;;  %v6060_v37 = vpop.f32.mrf.mxu1 }
 0x9ea   : > { %6084 = vst [vmem:[%s8422_s18 + $0x58] sm:$0xff] %v6020_v27  ;;  %6100 = vst [vmem:[%s8422_s18 + $0xd8] sm:$0xff] %v6060_v37 }
 0x9eb   : > { %v6024_v17 = vpop.f32.mrf.mxu0  ;;  %v6064_v61 = vpop.f32.mrf.mxu1 }
 0x9ec   : > { %6085 = vst [vmem:[%s8422_s18 + $0x60] sm:$0xff] %v6024_v17  ;;  %6101 = vst [vmem:[%s8422_s18 + $0xe0] sm:$0xff] %v6064_v61 }
 0x9ed   : > { %v6026_v62 = vpop.f32.mrf.mxu0  ;;  %v6066_v51 = vpop.f32.mrf.mxu1 }
 0x9ee   : > { %6086 = vst [vmem:[%s8422_s18 + $0x68] sm:$0xff] %v6026_v62  ;;  %6102 = vst [vmem:[%s8422_s18 + $0xe8] sm:$0xff] %v6066_v51 }
 0x9ef   : > { %v6028_v6 = vpop.f32.mrf.mxu0  ;;  %v6068_v39 = vpop.f32.mrf.mxu1 }
 0x9f0   : > { %6087 = vst [vmem:[%s8422_s18 + $0x70] sm:$0xff] %v6028_v6  ;;  %6103 = vst [vmem:[%s8422_s18 + $0xf0] sm:$0xff] %v6068_v39 }
 0x9f1   : > { %v6030_v14 = vpop.f32.mrf.mxu0  ;;  %v6070_v36 = vpop.f32.mrf.mxu1 }
 0x9f2   : > { %6088 = vst [vmem:[%s8422_s18 + $0x78] sm:$0xff] %v6030_v14  ;;  %6104 = vst [vmem:[%s8422_s18 + $0xf8] sm:$0xff] %v6070_v36 }
 0x9f3 PF: > { %s6732_s26 = sshll.u32 %s8159_s20, 12  ;;  %s11067_s13 = sld [smem:[#allocation108_spill]] }
 0x9f4   : > { %s6119_s7 = sshll.u32 %s8422_s18, 4  ;;  %s11069_s16 = sand.u32 1, %s8135_s14   ;;  %s10695_s7 = int_to_ptr.vmem [resolvable:$true] %s6119_s7 }
 0x9f5   : > { %s10699_s21 = scalar_lea.sflag [#allocation5], %s11069_s16  ;;  %s8047_s10 = scalar_lea.vmem %s10695_s7, 4096 }
 0x9f6   : > { %p8048_p6 = scmp.ne.s32.totalorder %s10695_s7, %s8047_s10  ;;  %s8179_s20 = smov [#allocation8]  }
 0x9f7   : > { %s8051_s19 = sshll.u32 %s8179_s20, 4  ;;  %s8052_s19 = int_to_ptr.vmem [resolvable:$false] %s8051_s19 }
 0x9f8   : > { %p8049_p3 = pnand %p8048_p6, %p8325_p12  ;;  %s8053_s22 = scalar_lea.vmem %s8052_s19, 8192 }
 0x9f9   : > { %s11068_s30 = smov %s11067_s13  ;;  %s10692_s15 = scalar_lea.hbm %s11067_s13, %s6732_s26 }
 0x9fa   : > { %p8050_p7 = pneg %p8049_p3  ;;  %p8054_p9 = scmp.lt.s32.totalorder %s10695_s7, %s8052_s19 }
 0x9fb   : > { %p8055_p10 = scmp.lt.s32.totalorder %s8053_s22, %s8047_s10 }
 0x9fd   : > { %p8056_p11 = por %p8055_p10, %p8054_p9 }
 0x9ff   : > { %p8057_p13 = pnand %p8056_p11, %p8050_p7 }
 0xa01   : > { %8060 = shalt.err (!%p8057_p13)
}
 0xa02   : > { %s8061_s18 = scalar_lea.hbm %s10692_s15, 4096  ;;  %s8065_s24 = scalar_lea.hbm %s11068_s30, 8192 }
 0xa03   : > { %p8062_p0 = scmp.ne.s32.totalorder %s10692_s15, %s8061_s18  ;;  %p8066_p8 = scmp.lt.s32.totalorder %s10692_s15, %s11068_s30 }
 0xa04   : > { %p8067_p1 = scmp.lt.s32.totalorder %s8065_s24, %s8061_s18 }
 0xa05   : > { %p8063_p4 = pnand %p8062_p0, %p8325_p12 }
 0xa06   : > { %p8068_p6 = por %p8067_p1, %p8066_p8 }
 0xa07   : > { %p8064_p5 = pneg %p8063_p4 }
 0xa09   : > { %p8069_p3 = pnand %p8068_p6, %p8064_p5 }
 0xa0b   : > { %8072 = shalt.err (!%p8069_p3)
}
 0xa0c   : > { %s8180_s27 = smov 256   ;;  %s8181_s26 = smov 16  }
 0xa0d   : > { %6996 = dma.vmem_to_hbm [thread:$0]  (%p8325_p12), %s10695_s7, 4096, %s10692_s15, %s10699_s21, %s8180_s27, %s8180_s27, %s8181_s26  }
 0xa0e PF: > { %s11070_s11 = sld [smem:[#allocation12_spill]]  ;;  %p7010_p7 = scmp.ge.s32.totalorder %s8171_s23, 2 }
 0xa10   : > { %p7006_p9 = pnand %p7010_p7, %p8335_p2 }
 0xa12   : > { %p7007_p10 = pneg %p7006_p9 }
 0xa14   : > { %s6134_s13 = sand.u32 1, %s11070_s11  }
 0xa15   : > { %s6135_s16 = scalar_lea.sflag [#allocation5], %s6134_s13 }
 0xa16   : > { %8126 = dma.done.wait (%p7007_p10), %s6135_s16, 4096  }
 0xa17   : > { %8128 = vsyncadd (%p7007_p10), %s6135_s16, 4294963200  ;;  %s29_s23 = sadd.s32 1, %s8171_s23   ;;  %s11072_s10 = sld [smem:[#allocation13_spill]] }
 0xa18   : > { %p26_p11 = scmp.ge.s32.totalorder %s29_s23, 6   ;;  %s11073_s15 = sld [smem:[#allocation20_spill]] }
 0xa19   : > { %s11074_s28 = sld [smem:[#allocation14_spill]]  ;;  %s11080_s13 = smov %s8135_s14 }
 0xa1a   : > { %s11075_s18 = sld [smem:[#allocation19_spill]]  ;;  %s11082_s16 = smov %s8147_s17 }
 0xa1b   : > { %s11076_s19 = sld [smem:[#allocation15_spill]]  ;;  %28 = sbr.rel (!%p26_p11) target bundleno = 17 (0x11), region = 141 }
 0xa1c   : > { %s11077_s20 = sld [smem:[#allocation16_spill]] }
 0xa1d   : > { %s11078_s21 = sld [smem:[#allocation17_spill]]  ;;  %s11081_s14 = smov %s11072_s10 }
 0xa1e   : > { %s11079_s22 = sld [smem:[#allocation18_spill]] }
 0xa1f   : > { %s11083_s17 = smov %s11074_s28 }
 0xa20   :  { %6140 = vsyncpa [#allocation4], 1 }
 0xa21   :  { %6142 = vsyncpa [#allocation4 + $0x1], 1 }
 0xa22   :  { %6143 = vsyncpa [#allocation7], 1 }
 0xa23   :  { %6145 = vsyncpa [#allocation7 + $0x1], 1 }
 0xa24   :  { %6146 = vsyncpa [#allocation5], 1 }
 0xa25   :  { %6148 = vsyncpa [#allocation5 + $0x1], 1 }

</bundles_post_ra>
